<compile_context>
chip_gen: v7x
topology: tpu7x:2x2x1
jax: 0.10.0
libtpu: 0.0.40
codegen_flags: <defaults>
</compile_context>

<pallas_src>
import math

import jax
import jax.numpy as jnp
from jax.experimental import pallas as pl
from jax.experimental.pallas import tpu as pltpu

# --- model hyperparameters (small, consistent with the module's __init__) ---
INPUT_DIM = 16
D_MODEL = 32
NHEAD = 4
NUM_LAYERS = 2
OUTPUT_DIM = 4
DIM_FF = 2048          # PyTorch nn.TransformerEncoderLayer default dim_feedforward
LN_EPS = 1e-5          # PyTorch LayerNorm default eps
HEAD_DIM = D_MODEL // NHEAD
PARAMS_PER_LAYER = 12
FF_CHUNK = 512         # DIM_FF tiling (multiple of 128 lanes)


# ----------------------------- fused Pallas kernel ---------------------------
def _make_fused_kernel(batch, seq):
    """Build the single-step fused kernel for a given (batch, seq)."""

    def kernel(*refs):
        # refs layout:
        #   [0]              x            (B*S, INPUT_DIM) f32
        #   [1], [2]         in_proj w,b  (INPUT_DIM, D) bf16, (1, D) f32
        #   [3 .. 3+12*L)    per layer: wqkv, bqkv, wo, bo, g1, be1,
        #                                w1, bf1, w2, bf2, g2, be2
        #   [-3], [-2]       fc w,b       (D, OUTPUT_DIM) bf16, (1, OUTPUT_DIM) f32
        #   [-1]             output       (B, OUTPUT_DIM) f32
        x_ref = refs[0]
        win_ref, binp_ref = refs[1], refs[2]
        n_layer_refs = PARAMS_PER_LAYER * NUM_LAYERS
        layer_refs = refs[3:3 + n_layer_refs]
        fcw_ref = refs[3 + n_layer_refs]
        fcb_ref = refs[4 + n_layer_refs]
        o_ref = refs[5 + n_layer_refs]

        # --- input projection (Linear input_dim -> d_model), bf16 ops / f32 acc ---
        x_bf = x_ref[...].astype(jnp.bfloat16)                       # (BS, IN)
        h = (jnp.dot(x_bf, win_ref[...], preferred_element_type=jnp.float32)
             + binp_ref[...])                                        # (BS, D) f32

        scale = 1.0 / math.sqrt(HEAD_DIM)

        for l in range(NUM_LAYERS):                  # static unrolled layers
            (wqkv_ref, bqkv_ref, wo_ref, bo_ref, g1_ref, be1_ref,
             w1_ref, bf1_ref, w2_ref, bf2_ref, g2_ref, be2_ref) = \
                layer_refs[l * PARAMS_PER_LAYER:(l + 1) * PARAMS_PER_LAYER]

            # --- multi-head self-attention ---
            h_bf = h.astype(jnp.bfloat16)
            qkv = (jnp.dot(h_bf, wqkv_ref[...],
                           preferred_element_type=jnp.float32)
                   + bqkv_ref[...])                                  # (BS, 3D)
            q = qkv[:, 0:D_MODEL] * scale        # fold 1/sqrt(head_dim) into q
            kT = qkv[:, D_MODEL:2 * D_MODEL].T   # ONE transpose per layer (D, BS)
            v = qkv[:, 2 * D_MODEL:3 * D_MODEL]
            wo = wo_ref[...]                                         # (D, D) bf16

            attn_parts = []
            for b in range(batch):               # static per-batch attention
                r0 = b * seq
                acc_b = jnp.zeros((seq, D_MODEL), jnp.float32)
                for hd in range(NHEAD):          # static unrolled head loop
                    lo = hd * HEAD_DIM
                    hi = lo + HEAD_DIM
                    # kT[lo:hi] is a sublane-aligned (8-row) slice: no per-head
                    # transpose, no lane-misaligned extract+XLU per head.
                    s = jnp.dot(q[r0:r0 + seq, lo:hi], kT[lo:hi, r0:r0 + seq],
                                preferred_element_type=jnp.float32)  # (S, S)
                    s = s - jnp.max(s, axis=-1, keepdims=True)
                    p = jnp.exp(s)
                    p = p * pl.reciprocal(jnp.sum(p, axis=-1, keepdims=True),
                                          approx=True)
                    ctx = jnp.dot(p, v[r0:r0 + seq, lo:hi],
                                  preferred_element_type=jnp.float32)  # (S, Dh)
                    # per-head out-projection contribution, accumulated
                    acc_b = acc_b + jnp.dot(ctx.astype(jnp.bfloat16), wo[lo:hi, :],
                                            preferred_element_type=jnp.float32)
                attn_parts.append(acc_b)
            attn = jnp.concatenate(attn_parts, axis=0) + bo_ref[...]  # (BS, D)

            # --- residual + LayerNorm1 (f32 vector math) ---
            h1 = h + attn
            mu = jnp.mean(h1, axis=-1, keepdims=True)
            var = jnp.mean((h1 - mu) ** 2, axis=-1, keepdims=True)
            h1 = (h1 - mu) * jax.lax.rsqrt(var + LN_EPS) * g1_ref[...] + be1_ref[...]

            # --- feed-forward (relu), chunked over DIM_FF ---
            h1_bf = h1.astype(jnp.bfloat16)
            ff = jnp.zeros((batch * seq, D_MODEL), jnp.float32)
            for c0 in range(0, DIM_FF, FF_CHUNK):
                a = (jnp.dot(h1_bf, w1_ref[:, c0:c0 + FF_CHUNK],
                             preferred_element_type=jnp.float32)
                     + bf1_ref[:, c0:c0 + FF_CHUNK])                 # (BS, FF_CHUNK)
                a = jnp.maximum(a, 0.0)
                ff = ff + jnp.dot(a.astype(jnp.bfloat16), w2_ref[c0:c0 + FF_CHUNK, :],
                                  preferred_element_type=jnp.float32)
            ff = ff + bf2_ref[...]

            # --- residual + LayerNorm2 ---
            h2 = h1 + ff
            mu = jnp.mean(h2, axis=-1, keepdims=True)
            var = jnp.mean((h2 - mu) ** 2, axis=-1, keepdims=True)
            h = (h2 - mu) * jax.lax.rsqrt(var + LN_EPS) * g2_ref[...] + be2_ref[...]

        # --- last token per batch -> dropout (identity, eval) -> final fc ---
        last = jnp.concatenate(
            [h[b * seq + seq - 1: b * seq + seq, :] for b in range(batch)],
            axis=0)                                                  # (B, D)
        out = (jnp.dot(last.astype(jnp.bfloat16), fcw_ref[...],
                       preferred_element_type=jnp.float32)
               + fcb_ref[...])                                       # (B, OUT)
        o_ref[...] = out.astype(o_ref.dtype)                         # single dense store

    return kernel


# --------------------------- parameter creation -----------------------------
def _lin_init(key, fan_in, w_shape, b_shape):
    """Deterministic uniform(-1/sqrt(fan_in), 1/sqrt(fan_in)) init (Linear-like)."""
    bound = 1.0 / math.sqrt(fan_in)
    kw, kb = jax.random.split(key)
    w = jax.random.uniform(kw, w_shape, jnp.float32, -bound, bound)
    b = jax.random.uniform(kb, b_shape, jnp.float32, -bound, bound)
    return w, b


def init_params(key):
    """Weights feeding the MXU are stored as bf16 ONCE here (no per-call casts)."""
    bf16 = jnp.bfloat16
    keys = jax.random.split(key, 2 + NUM_LAYERS)
    params = {}
    w, b = _lin_init(keys[0], INPUT_DIM, (INPUT_DIM, D_MODEL), (1, D_MODEL))
    params["in_proj_w"], params["in_proj_b"] = w.astype(bf16), b
    w, b = _lin_init(keys[1], D_MODEL, (D_MODEL, OUTPUT_DIM), (1, OUTPUT_DIM))
    params["fc_w"], params["fc_b"] = w.astype(bf16), b
    layers = []
    for i in range(NUM_LAYERS):
        ks = jax.random.split(keys[2 + i], 4)
        wqkv, bqkv = _lin_init(ks[0], D_MODEL, (D_MODEL, 3 * D_MODEL), (1, 3 * D_MODEL))
        wo, bo = _lin_init(ks[1], D_MODEL, (D_MODEL, D_MODEL), (1, D_MODEL))
        w1, bf1 = _lin_init(ks[2], D_MODEL, (D_MODEL, DIM_FF), (1, DIM_FF))
        w2, bf2 = _lin_init(ks[3], DIM_FF, (DIM_FF, D_MODEL), (1, D_MODEL))
        g1 = jnp.ones((1, D_MODEL), jnp.float32)
        be1 = jnp.zeros((1, D_MODEL), jnp.float32)
        g2 = jnp.ones((1, D_MODEL), jnp.float32)
        be2 = jnp.zeros((1, D_MODEL), jnp.float32)
        layers.append((wqkv.astype(bf16), bqkv, wo.astype(bf16), bo, g1, be1,
                       w1.astype(bf16), bf1, w2.astype(bf16), bf2, g2, be2))
    params["layers"] = layers
    return params


# ------------------------------ full forward --------------------------------
def transformer_forward(x, params):
    """x: (B, S, INPUT_DIM) float32 -> (B, OUTPUT_DIM). One grid-less pallas_call."""
    B, S, IN = x.shape
    x2 = x.reshape(B * S, IN)       # fold batch onto the sublane axis

    args = [x2, params["in_proj_w"], params["in_proj_b"]]
    for layer in params["layers"]:
        args += list(layer)
    args += [params["fc_w"], params["fc_b"]]

    # No grid: single step, every array is one full-extent VMEM-resident block
    # (weights DMA'd exactly once; ~0.6 MiB total, far under any VMEM budget).
    in_specs = [pl.BlockSpec(memory_space=pltpu.MemorySpace.VMEM) for _ in args]
    out_specs = pl.BlockSpec(memory_space=pltpu.MemorySpace.VMEM)

    out = pl.pallas_call(
        _make_fused_kernel(B, S),
        out_shape=jax.ShapeDtypeStruct((B, OUTPUT_DIM), jnp.float32),
        in_specs=in_specs,
        out_specs=out_specs,
        compiler_params=pltpu.CompilerParams(
            vmem_limit_bytes=16 * 1024 * 1024,   # ~2 MiB actually needed
        ),
    )(*args)
    return out


if __name__ == "__main__":
    key = jax.random.PRNGKey(0)
    kx, kp = jax.random.split(key)
    B, S = 2, 8
    x = jax.random.normal(kx, (B, S, INPUT_DIM), jnp.float32)
    params = init_params(kp)

    fwd = jax.jit(transformer_forward)
    out = fwd(x, params)
    out = jax.block_until_ready(out)
    assert out.shape == (B, OUTPUT_DIM), out.shape
    assert jnp.all(jnp.isfinite(out))
    print("KERNEL_OK")
</pallas_src>

<mosaic_0001>
module attributes {stable_mosaic.version = 11 : i64} {
  func.func @kernel(%arg0: memref<16x16xf32, #tpu.memory_space<vmem>>, %arg1: memref<16x32xbf16, #tpu.memory_space<vmem>>, %arg2: memref<1x32xf32, #tpu.memory_space<vmem>>, %arg3: memref<32x96xbf16, #tpu.memory_space<vmem>>, %arg4: memref<1x96xf32, #tpu.memory_space<vmem>>, %arg5: memref<32x32xbf16, #tpu.memory_space<vmem>>, %arg6: memref<1x32xf32, #tpu.memory_space<vmem>>, %arg7: memref<1x32xf32, #tpu.memory_space<vmem>>, %arg8: memref<1x32xf32, #tpu.memory_space<vmem>>, %arg9: memref<32x2048xbf16, #tpu.memory_space<vmem>>, %arg10: memref<1x2048xf32, #tpu.memory_space<vmem>>, %arg11: memref<2048x32xbf16, #tpu.memory_space<vmem>>, %arg12: memref<1x32xf32, #tpu.memory_space<vmem>>, %arg13: memref<1x32xf32, #tpu.memory_space<vmem>>, %arg14: memref<1x32xf32, #tpu.memory_space<vmem>>, %arg15: memref<32x96xbf16, #tpu.memory_space<vmem>>, %arg16: memref<1x96xf32, #tpu.memory_space<vmem>>, %arg17: memref<32x32xbf16, #tpu.memory_space<vmem>>, %arg18: memref<1x32xf32, #tpu.memory_space<vmem>>, %arg19: memref<1x32xf32, #tpu.memory_space<vmem>>, %arg20: memref<1x32xf32, #tpu.memory_space<vmem>>, %arg21: memref<32x2048xbf16, #tpu.memory_space<vmem>>, %arg22: memref<1x2048xf32, #tpu.memory_space<vmem>>, %arg23: memref<2048x32xbf16, #tpu.memory_space<vmem>>, %arg24: memref<1x32xf32, #tpu.memory_space<vmem>>, %arg25: memref<1x32xf32, #tpu.memory_space<vmem>>, %arg26: memref<1x32xf32, #tpu.memory_space<vmem>>, %arg27: memref<32x4xbf16, #tpu.memory_space<vmem>>, %arg28: memref<1x4xf32, #tpu.memory_space<vmem>>, %arg29: memref<2x4xf32, #tpu.memory_space<vmem>>) attributes {dimension_semantics = [], scalar_prefetch = 0 : i64, scratch_operands = 0 : i64, tpu.core_type = #tpu.core_type<tc>} {
    %c0 = arith.constant 0 : index
    %c0_0 = arith.constant 0 : index
    %0 = vector.load %arg0[%c0, %c0_0] : memref<16x16xf32, #tpu.memory_space<vmem>>, vector<16x16xf32>
    %1 = arith.truncf %0 : vector<16x16xf32> to vector<16x16xbf16>
    %c0_1 = arith.constant 0 : index
    %c0_2 = arith.constant 0 : index
    %2 = vector.load %arg1[%c0_1, %c0_2] : memref<16x32xbf16, #tpu.memory_space<vmem>>, vector<16x32xbf16>
    %cst = arith.constant dense<0.000000e+00> : vector<16x32xf32>
    %3 = tpu.matmul %1, %2, %cst {dimension_numbers = #tpu.dot_dimension_numbers<[1], [0], [0], [1], [0, 0, 1, 1], [], []>} : vector<16x16xbf16>, vector<16x32xbf16>, vector<16x32xf32> -> vector<16x32xf32>
    %c0_3 = arith.constant 0 : index
    %c0_4 = arith.constant 0 : index
    %4 = vector.load %arg2[%c0_3, %c0_4] : memref<1x32xf32, #tpu.memory_space<vmem>>, vector<1x32xf32>
    %5 = vector.broadcast %4 : vector<1x32xf32> to vector<16x32xf32>
    %6 = arith.addf %3, %5 : vector<16x32xf32>
    %7 = arith.truncf %6 : vector<16x32xf32> to vector<16x32xbf16>
    %c0_5 = arith.constant 0 : index
    %c0_6 = arith.constant 0 : index
    %8 = vector.load %arg3[%c0_5, %c0_6] : memref<32x96xbf16, #tpu.memory_space<vmem>>, vector<32x96xbf16>
    %cst_7 = arith.constant dense<0.000000e+00> : vector<16x96xf32>
    %9 = tpu.matmul %7, %8, %cst_7 {dimension_numbers = #tpu.dot_dimension_numbers<[1], [0], [0], [1], [0, 0, 1, 1], [], []>} : vector<16x32xbf16>, vector<32x96xbf16>, vector<16x96xf32> -> vector<16x96xf32>
    %c0_8 = arith.constant 0 : index
    %c0_9 = arith.constant 0 : index
    %10 = vector.load %arg4[%c0_8, %c0_9] : memref<1x96xf32, #tpu.memory_space<vmem>>, vector<1x96xf32>
    %11 = vector.broadcast %10 : vector<1x96xf32> to vector<16x96xf32>
    %12 = arith.addf %9, %11 : vector<16x96xf32>
    %13 = vector.extract_strided_slice %12 {offsets = [0, 0], sizes = [16, 32], strides = [1, 1]} : vector<16x96xf32> to vector<16x32xf32>
    %cst_10 = arith.constant 0.353553385 : f32
    %14 = vector.broadcast %cst_10 : f32 to vector<16x32xf32>
    %15 = arith.mulf %13, %14 : vector<16x32xf32>
    %16 = vector.extract_strided_slice %12 {offsets = [0, 32], sizes = [16, 32], strides = [1, 1]} : vector<16x96xf32> to vector<16x32xf32>
    %17 = tpu.transpose %16, [1, 0] : vector<16x32xf32> -> vector<32x16xf32>
    %18 = vector.extract_strided_slice %12 {offsets = [0, 64], sizes = [16, 32], strides = [1, 1]} : vector<16x96xf32> to vector<16x32xf32>
    %c0_11 = arith.constant 0 : index
    %c0_12 = arith.constant 0 : index
    %19 = vector.load %arg5[%c0_11, %c0_12] : memref<32x32xbf16, #tpu.memory_space<vmem>>, vector<32x32xbf16>
    %cst_13 = arith.constant 0.000000e+00 : f32
    %20 = vector.broadcast %cst_13 : f32 to vector<8x32xf32>
    %21 = vector.extract_strided_slice %15 {offsets = [0, 0], sizes = [8, 8], strides = [1, 1]} : vector<16x32xf32> to vector<8x8xf32>
    %22 = vector.extract_strided_slice %17 {offsets = [0, 0], sizes = [8, 8], strides = [1, 1]} : vector<32x16xf32> to vector<8x8xf32>
    %cst_14 = arith.constant dense<0.000000e+00> : vector<8x8xf32>
    %23 = tpu.matmul %21, %22, %cst_14 {dimension_numbers = #tpu.dot_dimension_numbers<[1], [0], [0], [1], [0, 0, 1, 1], [], []>} : vector<8x8xf32>, vector<8x8xf32>, vector<8x8xf32> -> vector<8x8xf32>
    %cst_15 = arith.constant dense<0xFF800000> : vector<8xf32>
    %24 = vector.multi_reduction <maximumf>, %23, %cst_15 [1] : vector<8x8xf32> to vector<8xf32>
    %25 = vector.shape_cast %24 : vector<8xf32> to vector<8x1xf32>
    %26 = vector.broadcast %25 : vector<8x1xf32> to vector<8x8xf32>
    %27 = arith.subf %23, %26 : vector<8x8xf32>
    %28 = math.exp %27 : vector<8x8xf32>
    %cst_16 = arith.constant dense<0.000000e+00> : vector<8xf32>
    %29 = vector.multi_reduction <add>, %28, %cst_16 [1] : vector<8x8xf32> to vector<8xf32>
    %30 = vector.shape_cast %29 : vector<8xf32> to vector<8x1xf32>
    %31 = tpu.reciprocal %30 {approx = true} : vector<8x1xf32> -> vector<8x1xf32>
    %32 = vector.broadcast %31 : vector<8x1xf32> to vector<8x8xf32>
    %33 = arith.mulf %28, %32 : vector<8x8xf32>
    %34 = vector.extract_strided_slice %18 {offsets = [0, 0], sizes = [8, 8], strides = [1, 1]} : vector<16x32xf32> to vector<8x8xf32>
    %cst_17 = arith.constant dense<0.000000e+00> : vector<8x8xf32>
    %35 = tpu.matmul %33, %34, %cst_17 {dimension_numbers = #tpu.dot_dimension_numbers<[1], [0], [0], [1], [0, 0, 1, 1], [], []>} : vector<8x8xf32>, vector<8x8xf32>, vector<8x8xf32> -> vector<8x8xf32>
    %36 = arith.truncf %35 : vector<8x8xf32> to vector<8x8xbf16>
    %37 = vector.extract_strided_slice %19 {offsets = [0, 0], sizes = [8, 32], strides = [1, 1]} : vector<32x32xbf16> to vector<8x32xbf16>
    %cst_18 = arith.constant dense<0.000000e+00> : vector<8x32xf32>
    %38 = tpu.matmul %36, %37, %cst_18 {dimension_numbers = #tpu.dot_dimension_numbers<[1], [0], [0], [1], [0, 0, 1, 1], [], []>} : vector<8x8xbf16>, vector<8x32xbf16>, vector<8x32xf32> -> vector<8x32xf32>
    %39 = arith.addf %20, %38 : vector<8x32xf32>
    %40 = vector.extract_strided_slice %15 {offsets = [0, 8], sizes = [8, 8], strides = [1, 1]} : vector<16x32xf32> to vector<8x8xf32>
    %41 = vector.extract_strided_slice %17 {offsets = [8, 0], sizes = [8, 8], strides = [1, 1]} : vector<32x16xf32> to vector<8x8xf32>
    %cst_19 = arith.constant dense<0.000000e+00> : vector<8x8xf32>
    %42 = tpu.matmul %40, %41, %cst_19 {dimension_numbers = #tpu.dot_dimension_numbers<[1], [0], [0], [1], [0, 0, 1, 1], [], []>} : vector<8x8xf32>, vector<8x8xf32>, vector<8x8xf32> -> vector<8x8xf32>
    %cst_20 = arith.constant dense<0xFF800000> : vector<8xf32>
    %43 = vector.multi_reduction <maximumf>, %42, %cst_20 [1] : vector<8x8xf32> to vector<8xf32>
    %44 = vector.shape_cast %43 : vector<8xf32> to vector<8x1xf32>
    %45 = vector.broadcast %44 : vector<8x1xf32> to vector<8x8xf32>
    %46 = arith.subf %42, %45 : vector<8x8xf32>
    %47 = math.exp %46 : vector<8x8xf32>
    %cst_21 = arith.constant dense<0.000000e+00> : vector<8xf32>
    %48 = vector.multi_reduction <add>, %47, %cst_21 [1] : vector<8x8xf32> to vector<8xf32>
    %49 = vector.shape_cast %48 : vector<8xf32> to vector<8x1xf32>
    %50 = tpu.reciprocal %49 {approx = true} : vector<8x1xf32> -> vector<8x1xf32>
    %51 = vector.broadcast %50 : vector<8x1xf32> to vector<8x8xf32>
    %52 = arith.mulf %47, %51 : vector<8x8xf32>
    %53 = vector.extract_strided_slice %18 {offsets = [0, 8], sizes = [8, 8], strides = [1, 1]} : vector<16x32xf32> to vector<8x8xf32>
    %cst_22 = arith.constant dense<0.000000e+00> : vector<8x8xf32>
    %54 = tpu.matmul %52, %53, %cst_22 {dimension_numbers = #tpu.dot_dimension_numbers<[1], [0], [0], [1], [0, 0, 1, 1], [], []>} : vector<8x8xf32>, vector<8x8xf32>, vector<8x8xf32> -> vector<8x8xf32>
    %55 = arith.truncf %54 : vector<8x8xf32> to vector<8x8xbf16>
    %56 = vector.extract_strided_slice %19 {offsets = [8, 0], sizes = [8, 32], strides = [1, 1]} : vector<32x32xbf16> to vector<8x32xbf16>
    %cst_23 = arith.constant dense<0.000000e+00> : vector<8x32xf32>
    %57 = tpu.matmul %55, %56, %cst_23 {dimension_numbers = #tpu.dot_dimension_numbers<[1], [0], [0], [1], [0, 0, 1, 1], [], []>} : vector<8x8xbf16>, vector<8x32xbf16>, vector<8x32xf32> -> vector<8x32xf32>
    %58 = arith.addf %39, %57 : vector<8x32xf32>
    %59 = vector.extract_strided_slice %15 {offsets = [0, 16], sizes = [8, 8], strides = [1, 1]} : vector<16x32xf32> to vector<8x8xf32>
    %60 = vector.extract_strided_slice %17 {offsets = [16, 0], sizes = [8, 8], strides = [1, 1]} : vector<32x16xf32> to vector<8x8xf32>
    %cst_24 = arith.constant dense<0.000000e+00> : vector<8x8xf32>
    %61 = tpu.matmul %59, %60, %cst_24 {dimension_numbers = #tpu.dot_dimension_numbers<[1], [0], [0], [1], [0, 0, 1, 1], [], []>} : vector<8x8xf32>, vector<8x8xf32>, vector<8x8xf32> -> vector<8x8xf32>
    %cst_25 = arith.constant dense<0xFF800000> : vector<8xf32>
    %62 = vector.multi_reduction <maximumf>, %61, %cst_25 [1] : vector<8x8xf32> to vector<8xf32>
    %63 = vector.shape_cast %62 : vector<8xf32> to vector<8x1xf32>
    %64 = vector.broadcast %63 : vector<8x1xf32> to vector<8x8xf32>
    %65 = arith.subf %61, %64 : vector<8x8xf32>
    %66 = math.exp %65 : vector<8x8xf32>
    %cst_26 = arith.constant dense<0.000000e+00> : vector<8xf32>
    %67 = vector.multi_reduction <add>, %66, %cst_26 [1] : vector<8x8xf32> to vector<8xf32>
    %68 = vector.shape_cast %67 : vector<8xf32> to vector<8x1xf32>
    %69 = tpu.reciprocal %68 {approx = true} : vector<8x1xf32> -> vector<8x1xf32>
    %70 = vector.broadcast %69 : vector<8x1xf32> to vector<8x8xf32>
    %71 = arith.mulf %66, %70 : vector<8x8xf32>
    %72 = vector.extract_strided_slice %18 {offsets = [0, 16], sizes = [8, 8], strides = [1, 1]} : vector<16x32xf32> to vector<8x8xf32>
    %cst_27 = arith.constant dense<0.000000e+00> : vector<8x8xf32>
    %73 = tpu.matmul %71, %72, %cst_27 {dimension_numbers = #tpu.dot_dimension_numbers<[1], [0], [0], [1], [0, 0, 1, 1], [], []>} : vector<8x8xf32>, vector<8x8xf32>, vector<8x8xf32> -> vector<8x8xf32>
    %74 = arith.truncf %73 : vector<8x8xf32> to vector<8x8xbf16>
    %75 = vector.extract_strided_slice %19 {offsets = [16, 0], sizes = [8, 32], strides = [1, 1]} : vector<32x32xbf16> to vector<8x32xbf16>
    %cst_28 = arith.constant dense<0.000000e+00> : vector<8x32xf32>
    %76 = tpu.matmul %74, %75, %cst_28 {dimension_numbers = #tpu.dot_dimension_numbers<[1], [0], [0], [1], [0, 0, 1, 1], [], []>} : vector<8x8xbf16>, vector<8x32xbf16>, vector<8x32xf32> -> vector<8x32xf32>
    %77 = arith.addf %58, %76 : vector<8x32xf32>
    %78 = vector.extract_strided_slice %15 {offsets = [0, 24], sizes = [8, 8], strides = [1, 1]} : vector<16x32xf32> to vector<8x8xf32>
    %79 = vector.extract_strided_slice %17 {offsets = [24, 0], sizes = [8, 8], strides = [1, 1]} : vector<32x16xf32> to vector<8x8xf32>
    %cst_29 = arith.constant dense<0.000000e+00> : vector<8x8xf32>
    %80 = tpu.matmul %78, %79, %cst_29 {dimension_numbers = #tpu.dot_dimension_numbers<[1], [0], [0], [1], [0, 0, 1, 1], [], []>} : vector<8x8xf32>, vector<8x8xf32>, vector<8x8xf32> -> vector<8x8xf32>
    %cst_30 = arith.constant dense<0xFF800000> : vector<8xf32>
    %81 = vector.multi_reduction <maximumf>, %80, %cst_30 [1] : vector<8x8xf32> to vector<8xf32>
    %82 = vector.shape_cast %81 : vector<8xf32> to vector<8x1xf32>
    %83 = vector.broadcast %82 : vector<8x1xf32> to vector<8x8xf32>
    %84 = arith.subf %80, %83 : vector<8x8xf32>
    %85 = math.exp %84 : vector<8x8xf32>
    %cst_31 = arith.constant dense<0.000000e+00> : vector<8xf32>
    %86 = vector.multi_reduction <add>, %85, %cst_31 [1] : vector<8x8xf32> to vector<8xf32>
    %87 = vector.shape_cast %86 : vector<8xf32> to vector<8x1xf32>
    %88 = tpu.reciprocal %87 {approx = true} : vector<8x1xf32> -> vector<8x1xf32>
    %89 = vector.broadcast %88 : vector<8x1xf32> to vector<8x8xf32>
    %90 = arith.mulf %85, %89 : vector<8x8xf32>
    %91 = vector.extract_strided_slice %18 {offsets = [0, 24], sizes = [8, 8], strides = [1, 1]} : vector<16x32xf32> to vector<8x8xf32>
    %cst_32 = arith.constant dense<0.000000e+00> : vector<8x8xf32>
    %92 = tpu.matmul %90, %91, %cst_32 {dimension_numbers = #tpu.dot_dimension_numbers<[1], [0], [0], [1], [0, 0, 1, 1], [], []>} : vector<8x8xf32>, vector<8x8xf32>, vector<8x8xf32> -> vector<8x8xf32>
    %93 = arith.truncf %92 : vector<8x8xf32> to vector<8x8xbf16>
    %94 = vector.extract_strided_slice %19 {offsets = [24, 0], sizes = [8, 32], strides = [1, 1]} : vector<32x32xbf16> to vector<8x32xbf16>
    %cst_33 = arith.constant dense<0.000000e+00> : vector<8x32xf32>
    %95 = tpu.matmul %93, %94, %cst_33 {dimension_numbers = #tpu.dot_dimension_numbers<[1], [0], [0], [1], [0, 0, 1, 1], [], []>} : vector<8x8xbf16>, vector<8x32xbf16>, vector<8x32xf32> -> vector<8x32xf32>
    %96 = arith.addf %77, %95 : vector<8x32xf32>
    %cst_34 = arith.constant 0.000000e+00 : f32
    %97 = vector.broadcast %cst_34 : f32 to vector<8x32xf32>
    %98 = vector.extract_strided_slice %15 {offsets = [8, 0], sizes = [8, 8], strides = [1, 1]} : vector<16x32xf32> to vector<8x8xf32>
    %99 = vector.extract_strided_slice %17 {offsets = [0, 8], sizes = [8, 8], strides = [1, 1]} : vector<32x16xf32> to vector<8x8xf32>
    %cst_35 = arith.constant dense<0.000000e+00> : vector<8x8xf32>
    %100 = tpu.matmul %98, %99, %cst_35 {dimension_numbers = #tpu.dot_dimension_numbers<[1], [0], [0], [1], [0, 0, 1, 1], [], []>} : vector<8x8xf32>, vector<8x8xf32>, vector<8x8xf32> -> vector<8x8xf32>
    %cst_36 = arith.constant dense<0xFF800000> : vector<8xf32>
    %101 = vector.multi_reduction <maximumf>, %100, %cst_36 [1] : vector<8x8xf32> to vector<8xf32>
    %102 = vector.shape_cast %101 : vector<8xf32> to vector<8x1xf32>
    %103 = vector.broadcast %102 : vector<8x1xf32> to vector<8x8xf32>
    %104 = arith.subf %100, %103 : vector<8x8xf32>
    %105 = math.exp %104 : vector<8x8xf32>
    %cst_37 = arith.constant dense<0.000000e+00> : vector<8xf32>
    %106 = vector.multi_reduction <add>, %105, %cst_37 [1] : vector<8x8xf32> to vector<8xf32>
    %107 = vector.shape_cast %106 : vector<8xf32> to vector<8x1xf32>
    %108 = tpu.reciprocal %107 {approx = true} : vector<8x1xf32> -> vector<8x1xf32>
    %109 = vector.broadcast %108 : vector<8x1xf32> to vector<8x8xf32>
    %110 = arith.mulf %105, %109 : vector<8x8xf32>
    %111 = vector.extract_strided_slice %18 {offsets = [8, 0], sizes = [8, 8], strides = [1, 1]} : vector<16x32xf32> to vector<8x8xf32>
    %cst_38 = arith.constant dense<0.000000e+00> : vector<8x8xf32>
    %112 = tpu.matmul %110, %111, %cst_38 {dimension_numbers = #tpu.dot_dimension_numbers<[1], [0], [0], [1], [0, 0, 1, 1], [], []>} : vector<8x8xf32>, vector<8x8xf32>, vector<8x8xf32> -> vector<8x8xf32>
    %113 = arith.truncf %112 : vector<8x8xf32> to vector<8x8xbf16>
    %114 = vector.extract_strided_slice %19 {offsets = [0, 0], sizes = [8, 32], strides = [1, 1]} : vector<32x32xbf16> to vector<8x32xbf16>
    %cst_39 = arith.constant dense<0.000000e+00> : vector<8x32xf32>
    %115 = tpu.matmul %113, %114, %cst_39 {dimension_numbers = #tpu.dot_dimension_numbers<[1], [0], [0], [1], [0, 0, 1, 1], [], []>} : vector<8x8xbf16>, vector<8x32xbf16>, vector<8x32xf32> -> vector<8x32xf32>
    %116 = arith.addf %97, %115 : vector<8x32xf32>
    %117 = vector.extract_strided_slice %15 {offsets = [8, 8], sizes = [8, 8], strides = [1, 1]} : vector<16x32xf32> to vector<8x8xf32>
    %118 = vector.extract_strided_slice %17 {offsets = [8, 8], sizes = [8, 8], strides = [1, 1]} : vector<32x16xf32> to vector<8x8xf32>
    %cst_40 = arith.constant dense<0.000000e+00> : vector<8x8xf32>
    %119 = tpu.matmul %117, %118, %cst_40 {dimension_numbers = #tpu.dot_dimension_numbers<[1], [0], [0], [1], [0, 0, 1, 1], [], []>} : vector<8x8xf32>, vector<8x8xf32>, vector<8x8xf32> -> vector<8x8xf32>
    %cst_41 = arith.constant dense<0xFF800000> : vector<8xf32>
    %120 = vector.multi_reduction <maximumf>, %119, %cst_41 [1] : vector<8x8xf32> to vector<8xf32>
    %121 = vector.shape_cast %120 : vector<8xf32> to vector<8x1xf32>
    %122 = vector.broadcast %121 : vector<8x1xf32> to vector<8x8xf32>
    %123 = arith.subf %119, %122 : vector<8x8xf32>
    %124 = math.exp %123 : vector<8x8xf32>
    %cst_42 = arith.constant dense<0.000000e+00> : vector<8xf32>
    %125 = vector.multi_reduction <add>, %124, %cst_42 [1] : vector<8x8xf32> to vector<8xf32>
    %126 = vector.shape_cast %125 : vector<8xf32> to vector<8x1xf32>
    %127 = tpu.reciprocal %126 {approx = true} : vector<8x1xf32> -> vector<8x1xf32>
    %128 = vector.broadcast %127 : vector<8x1xf32> to vector<8x8xf32>
    %129 = arith.mulf %124, %128 : vector<8x8xf32>
    %130 = vector.extract_strided_slice %18 {offsets = [8, 8], sizes = [8, 8], strides = [1, 1]} : vector<16x32xf32> to vector<8x8xf32>
    %cst_43 = arith.constant dense<0.000000e+00> : vector<8x8xf32>
    %131 = tpu.matmul %129, %130, %cst_43 {dimension_numbers = #tpu.dot_dimension_numbers<[1], [0], [0], [1], [0, 0, 1, 1], [], []>} : vector<8x8xf32>, vector<8x8xf32>, vector<8x8xf32> -> vector<8x8xf32>
    %132 = arith.truncf %131 : vector<8x8xf32> to vector<8x8xbf16>
    %133 = vector.extract_strided_slice %19 {offsets = [8, 0], sizes = [8, 32], strides = [1, 1]} : vector<32x32xbf16> to vector<8x32xbf16>
    %cst_44 = arith.constant dense<0.000000e+00> : vector<8x32xf32>
    %134 = tpu.matmul %132, %133, %cst_44 {dimension_numbers = #tpu.dot_dimension_numbers<[1], [0], [0], [1], [0, 0, 1, 1], [], []>} : vector<8x8xbf16>, vector<8x32xbf16>, vector<8x32xf32> -> vector<8x32xf32>
    %135 = arith.addf %116, %134 : vector<8x32xf32>
    %136 = vector.extract_strided_slice %15 {offsets = [8, 16], sizes = [8, 8], strides = [1, 1]} : vector<16x32xf32> to vector<8x8xf32>
    %137 = vector.extract_strided_slice %17 {offsets = [16, 8], sizes = [8, 8], strides = [1, 1]} : vector<32x16xf32> to vector<8x8xf32>
    %cst_45 = arith.constant dense<0.000000e+00> : vector<8x8xf32>
    %138 = tpu.matmul %136, %137, %cst_45 {dimension_numbers = #tpu.dot_dimension_numbers<[1], [0], [0], [1], [0, 0, 1, 1], [], []>} : vector<8x8xf32>, vector<8x8xf32>, vector<8x8xf32> -> vector<8x8xf32>
    %cst_46 = arith.constant dense<0xFF800000> : vector<8xf32>
    %139 = vector.multi_reduction <maximumf>, %138, %cst_46 [1] : vector<8x8xf32> to vector<8xf32>
    %140 = vector.shape_cast %139 : vector<8xf32> to vector<8x1xf32>
    %141 = vector.broadcast %140 : vector<8x1xf32> to vector<8x8xf32>
    %142 = arith.subf %138, %141 : vector<8x8xf32>
    %143 = math.exp %142 : vector<8x8xf32>
    %cst_47 = arith.constant dense<0.000000e+00> : vector<8xf32>
    %144 = vector.multi_reduction <add>, %143, %cst_47 [1] : vector<8x8xf32> to vector<8xf32>
    %145 = vector.shape_cast %144 : vector<8xf32> to vector<8x1xf32>
    %146 = tpu.reciprocal %145 {approx = true} : vector<8x1xf32> -> vector<8x1xf32>
    %147 = vector.broadcast %146 : vector<8x1xf32> to vector<8x8xf32>
    %148 = arith.mulf %143, %147 : vector<8x8xf32>
    %149 = vector.extract_strided_slice %18 {offsets = [8, 16], sizes = [8, 8], strides = [1, 1]} : vector<16x32xf32> to vector<8x8xf32>
    %cst_48 = arith.constant dense<0.000000e+00> : vector<8x8xf32>
    %150 = tpu.matmul %148, %149, %cst_48 {dimension_numbers = #tpu.dot_dimension_numbers<[1], [0], [0], [1], [0, 0, 1, 1], [], []>} : vector<8x8xf32>, vector<8x8xf32>, vector<8x8xf32> -> vector<8x8xf32>
    %151 = arith.truncf %150 : vector<8x8xf32> to vector<8x8xbf16>
    %152 = vector.extract_strided_slice %19 {offsets = [16, 0], sizes = [8, 32], strides = [1, 1]} : vector<32x32xbf16> to vector<8x32xbf16>
    %cst_49 = arith.constant dense<0.000000e+00> : vector<8x32xf32>
    %153 = tpu.matmul %151, %152, %cst_49 {dimension_numbers = #tpu.dot_dimension_numbers<[1], [0], [0], [1], [0, 0, 1, 1], [], []>} : vector<8x8xbf16>, vector<8x32xbf16>, vector<8x32xf32> -> vector<8x32xf32>
    %154 = arith.addf %135, %153 : vector<8x32xf32>
    %155 = vector.extract_strided_slice %15 {offsets = [8, 24], sizes = [8, 8], strides = [1, 1]} : vector<16x32xf32> to vector<8x8xf32>
    %156 = vector.extract_strided_slice %17 {offsets = [24, 8], sizes = [8, 8], strides = [1, 1]} : vector<32x16xf32> to vector<8x8xf32>
    %cst_50 = arith.constant dense<0.000000e+00> : vector<8x8xf32>
    %157 = tpu.matmul %155, %156, %cst_50 {dimension_numbers = #tpu.dot_dimension_numbers<[1], [0], [0], [1], [0, 0, 1, 1], [], []>} : vector<8x8xf32>, vector<8x8xf32>, vector<8x8xf32> -> vector<8x8xf32>
    %cst_51 = arith.constant dense<0xFF800000> : vector<8xf32>
    %158 = vector.multi_reduction <maximumf>, %157, %cst_51 [1] : vector<8x8xf32> to vector<8xf32>
    %159 = vector.shape_cast %158 : vector<8xf32> to vector<8x1xf32>
    %160 = vector.broadcast %159 : vector<8x1xf32> to vector<8x8xf32>
    %161 = arith.subf %157, %160 : vector<8x8xf32>
    %162 = math.exp %161 : vector<8x8xf32>
    %cst_52 = arith.constant dense<0.000000e+00> : vector<8xf32>
    %163 = vector.multi_reduction <add>, %162, %cst_52 [1] : vector<8x8xf32> to vector<8xf32>
    %164 = vector.shape_cast %163 : vector<8xf32> to vector<8x1xf32>
    %165 = tpu.reciprocal %164 {approx = true} : vector<8x1xf32> -> vector<8x1xf32>
    %166 = vector.broadcast %165 : vector<8x1xf32> to vector<8x8xf32>
    %167 = arith.mulf %162, %166 : vector<8x8xf32>
    %168 = vector.extract_strided_slice %18 {offsets = [8, 24], sizes = [8, 8], strides = [1, 1]} : vector<16x32xf32> to vector<8x8xf32>
    %cst_53 = arith.constant dense<0.000000e+00> : vector<8x8xf32>
    %169 = tpu.matmul %167, %168, %cst_53 {dimension_numbers = #tpu.dot_dimension_numbers<[1], [0], [0], [1], [0, 0, 1, 1], [], []>} : vector<8x8xf32>, vector<8x8xf32>, vector<8x8xf32> -> vector<8x8xf32>
    %170 = arith.truncf %169 : vector<8x8xf32> to vector<8x8xbf16>
    %171 = vector.extract_strided_slice %19 {offsets = [24, 0], sizes = [8, 32], strides = [1, 1]} : vector<32x32xbf16> to vector<8x32xbf16>
    %cst_54 = arith.constant dense<0.000000e+00> : vector<8x32xf32>
    %172 = tpu.matmul %170, %171, %cst_54 {dimension_numbers = #tpu.dot_dimension_numbers<[1], [0], [0], [1], [0, 0, 1, 1], [], []>} : vector<8x8xbf16>, vector<8x32xbf16>, vector<8x32xf32> -> vector<8x32xf32>
    %173 = arith.addf %154, %172 : vector<8x32xf32>
    %174 = tpu.concatenate %96, %173 in 0 : vector<8x32xf32>, vector<8x32xf32> -> vector<16x32xf32>
    %c0_55 = arith.constant 0 : index
    %c0_56 = arith.constant 0 : index
    %175 = vector.load %arg6[%c0_55, %c0_56] : memref<1x32xf32, #tpu.memory_space<vmem>>, vector<1x32xf32>
    %176 = vector.broadcast %175 : vector<1x32xf32> to vector<16x32xf32>
    %177 = arith.addf %174, %176 : vector<16x32xf32>
    %178 = arith.addf %6, %177 : vector<16x32xf32>
    %cst_57 = arith.constant dense<0.000000e+00> : vector<16xf32>
    %179 = vector.multi_reduction <add>, %178, %cst_57 [1] : vector<16x32xf32> to vector<16xf32>
    %180 = vector.shape_cast %179 : vector<16xf32> to vector<16x1xf32>
    %cst_58 = arith.constant 3.200000e+01 : f32
    %181 = vector.broadcast %cst_58 : f32 to vector<16x1xf32>
    %182 = arith.divf %180, %181 : vector<16x1xf32>
    %183 = vector.broadcast %182 : vector<16x1xf32> to vector<16x32xf32>
    %184 = arith.subf %178, %183 : vector<16x32xf32>
    %185 = arith.mulf %184, %184 : vector<16x32xf32>
    %cst_59 = arith.constant dense<0.000000e+00> : vector<16xf32>
    %186 = vector.multi_reduction <add>, %185, %cst_59 [1] : vector<16x32xf32> to vector<16xf32>
    %187 = vector.shape_cast %186 : vector<16xf32> to vector<16x1xf32>
    %cst_60 = arith.constant 3.200000e+01 : f32
    %188 = vector.broadcast %cst_60 : f32 to vector<16x1xf32>
    %189 = arith.divf %187, %188 : vector<16x1xf32>
    %190 = vector.broadcast %182 : vector<16x1xf32> to vector<16x32xf32>
    %191 = arith.subf %178, %190 : vector<16x32xf32>
    %cst_61 = arith.constant 9.99999974E-6 : f32
    %192 = vector.broadcast %cst_61 : f32 to vector<16x1xf32>
    %193 = arith.addf %189, %192 : vector<16x1xf32>
    %194 = math.rsqrt %193 : vector<16x1xf32>
    %195 = vector.broadcast %194 : vector<16x1xf32> to vector<16x32xf32>
    %196 = arith.mulf %191, %195 : vector<16x32xf32>
    %c0_62 = arith.constant 0 : index
    %c0_63 = arith.constant 0 : index
    %197 = vector.load %arg7[%c0_62, %c0_63] : memref<1x32xf32, #tpu.memory_space<vmem>>, vector<1x32xf32>
    %198 = vector.broadcast %197 : vector<1x32xf32> to vector<16x32xf32>
    %199 = arith.mulf %196, %198 : vector<16x32xf32>
    %c0_64 = arith.constant 0 : index
    %c0_65 = arith.constant 0 : index
    %200 = vector.load %arg8[%c0_64, %c0_65] : memref<1x32xf32, #tpu.memory_space<vmem>>, vector<1x32xf32>
    %201 = vector.broadcast %200 : vector<1x32xf32> to vector<16x32xf32>
    %202 = arith.addf %199, %201 : vector<16x32xf32>
    %203 = arith.truncf %202 : vector<16x32xf32> to vector<16x32xbf16>
    %cst_66 = arith.constant 0.000000e+00 : f32
    %204 = vector.broadcast %cst_66 : f32 to vector<16x32xf32>
    %c0_67 = arith.constant 0 : index
    %c0_68 = arith.constant 0 : index
    %205 = vector.load %arg9[%c0_67, %c0_68] : memref<32x2048xbf16, #tpu.memory_space<vmem>>, vector<32x512xbf16>
    %cst_69 = arith.constant dense<0.000000e+00> : vector<16x512xf32>
    %206 = tpu.matmul %203, %205, %cst_69 {dimension_numbers = #tpu.dot_dimension_numbers<[1], [0], [0], [1], [0, 0, 1, 1], [], []>} : vector<16x32xbf16>, vector<32x512xbf16>, vector<16x512xf32> -> vector<16x512xf32>
    %c0_70 = arith.constant 0 : index
    %c0_71 = arith.constant 0 : index
    %207 = vector.load %arg10[%c0_70, %c0_71] : memref<1x2048xf32, #tpu.memory_space<vmem>>, vector<1x512xf32>
    %208 = vector.broadcast %207 : vector<1x512xf32> to vector<16x512xf32>
    %209 = arith.addf %206, %208 : vector<16x512xf32>
    %cst_72 = arith.constant 0.000000e+00 : f32
    %210 = vector.broadcast %cst_72 : f32 to vector<16x512xf32>
    %211 = arith.maximumf %209, %210 : vector<16x512xf32>
    %212 = arith.truncf %211 : vector<16x512xf32> to vector<16x512xbf16>
    %c0_73 = arith.constant 0 : index
    %c0_74 = arith.constant 0 : index
    %213 = vector.load %arg11[%c0_73, %c0_74] : memref<2048x32xbf16, #tpu.memory_space<vmem>>, vector<512x32xbf16>
    %cst_75 = arith.constant dense<0.000000e+00> : vector<16x32xf32>
    %214 = tpu.matmul %212, %213, %cst_75 {dimension_numbers = #tpu.dot_dimension_numbers<[1], [0], [0], [1], [0, 0, 1, 1], [], []>} : vector<16x512xbf16>, vector<512x32xbf16>, vector<16x32xf32> -> vector<16x32xf32>
    %215 = arith.addf %204, %214 : vector<16x32xf32>
    %c0_76 = arith.constant 0 : index
    %c512 = arith.constant 512 : index
    %216 = vector.load %arg9[%c0_76, %c512] : memref<32x2048xbf16, #tpu.memory_space<vmem>>, vector<32x512xbf16>
    %cst_77 = arith.constant dense<0.000000e+00> : vector<16x512xf32>
    %217 = tpu.matmul %203, %216, %cst_77 {dimension_numbers = #tpu.dot_dimension_numbers<[1], [0], [0], [1], [0, 0, 1, 1], [], []>} : vector<16x32xbf16>, vector<32x512xbf16>, vector<16x512xf32> -> vector<16x512xf32>
    %c0_78 = arith.constant 0 : index
    %c512_79 = arith.constant 512 : index
    %218 = vector.load %arg10[%c0_78, %c512_79] : memref<1x2048xf32, #tpu.memory_space<vmem>>, vector<1x512xf32>
    %219 = vector.broadcast %218 : vector<1x512xf32> to vector<16x512xf32>
    %220 = arith.addf %217, %219 : vector<16x512xf32>
    %cst_80 = arith.constant 0.000000e+00 : f32
    %221 = vector.broadcast %cst_80 : f32 to vector<16x512xf32>
    %222 = arith.maximumf %220, %221 : vector<16x512xf32>
    %223 = arith.truncf %222 : vector<16x512xf32> to vector<16x512xbf16>
    %c512_81 = arith.constant 512 : index
    %c0_82 = arith.constant 0 : index
    %224 = vector.load %arg11[%c512_81, %c0_82] : memref<2048x32xbf16, #tpu.memory_space<vmem>>, vector<512x32xbf16>
    %cst_83 = arith.constant dense<0.000000e+00> : vector<16x32xf32>
    %225 = tpu.matmul %223, %224, %cst_83 {dimension_numbers = #tpu.dot_dimension_numbers<[1], [0], [0], [1], [0, 0, 1, 1], [], []>} : vector<16x512xbf16>, vector<512x32xbf16>, vector<16x32xf32> -> vector<16x32xf32>
    %226 = arith.addf %215, %225 : vector<16x32xf32>
    %c0_84 = arith.constant 0 : index
    %c1024 = arith.constant 1024 : index
    %227 = vector.load %arg9[%c0_84, %c1024] : memref<32x2048xbf16, #tpu.memory_space<vmem>>, vector<32x512xbf16>
    %cst_85 = arith.constant dense<0.000000e+00> : vector<16x512xf32>
    %228 = tpu.matmul %203, %227, %cst_85 {dimension_numbers = #tpu.dot_dimension_numbers<[1], [0], [0], [1], [0, 0, 1, 1], [], []>} : vector<16x32xbf16>, vector<32x512xbf16>, vector<16x512xf32> -> vector<16x512xf32>
    %c0_86 = arith.constant 0 : index
    %c1024_87 = arith.constant 1024 : index
    %229 = vector.load %arg10[%c0_86, %c1024_87] : memref<1x2048xf32, #tpu.memory_space<vmem>>, vector<1x512xf32>
    %230 = vector.broadcast %229 : vector<1x512xf32> to vector<16x512xf32>
    %231 = arith.addf %228, %230 : vector<16x512xf32>
    %cst_88 = arith.constant 0.000000e+00 : f32
    %232 = vector.broadcast %cst_88 : f32 to vector<16x512xf32>
    %233 = arith.maximumf %231, %232 : vector<16x512xf32>
    %234 = arith.truncf %233 : vector<16x512xf32> to vector<16x512xbf16>
    %c1024_89 = arith.constant 1024 : index
    %c0_90 = arith.constant 0 : index
    %235 = vector.load %arg11[%c1024_89, %c0_90] : memref<2048x32xbf16, #tpu.memory_space<vmem>>, vector<512x32xbf16>
    %cst_91 = arith.constant dense<0.000000e+00> : vector<16x32xf32>
    %236 = tpu.matmul %234, %235, %cst_91 {dimension_numbers = #tpu.dot_dimension_numbers<[1], [0], [0], [1], [0, 0, 1, 1], [], []>} : vector<16x512xbf16>, vector<512x32xbf16>, vector<16x32xf32> -> vector<16x32xf32>
    %237 = arith.addf %226, %236 : vector<16x32xf32>
    %c0_92 = arith.constant 0 : index
    %c1536 = arith.constant 1536 : index
    %238 = vector.load %arg9[%c0_92, %c1536] : memref<32x2048xbf16, #tpu.memory_space<vmem>>, vector<32x512xbf16>
    %cst_93 = arith.constant dense<0.000000e+00> : vector<16x512xf32>
    %239 = tpu.matmul %203, %238, %cst_93 {dimension_numbers = #tpu.dot_dimension_numbers<[1], [0], [0], [1], [0, 0, 1, 1], [], []>} : vector<16x32xbf16>, vector<32x512xbf16>, vector<16x512xf32> -> vector<16x512xf32>
    %c0_94 = arith.constant 0 : index
    %c1536_95 = arith.constant 1536 : index
    %240 = vector.load %arg10[%c0_94, %c1536_95] : memref<1x2048xf32, #tpu.memory_space<vmem>>, vector<1x512xf32>
    %241 = vector.broadcast %240 : vector<1x512xf32> to vector<16x512xf32>
    %242 = arith.addf %239, %241 : vector<16x512xf32>
    %cst_96 = arith.constant 0.000000e+00 : f32
    %243 = vector.broadcast %cst_96 : f32 to vector<16x512xf32>
    %244 = arith.maximumf %242, %243 : vector<16x512xf32>
    %245 = arith.truncf %244 : vector<16x512xf32> to vector<16x512xbf16>
    %c1536_97 = arith.constant 1536 : index
    %c0_98 = arith.constant 0 : index
    %246 = vector.load %arg11[%c1536_97, %c0_98] : memref<2048x32xbf16, #tpu.memory_space<vmem>>, vector<512x32xbf16>
    %cst_99 = arith.constant dense<0.000000e+00> : vector<16x32xf32>
    %247 = tpu.matmul %245, %246, %cst_99 {dimension_numbers = #tpu.dot_dimension_numbers<[1], [0], [0], [1], [0, 0, 1, 1], [], []>} : vector<16x512xbf16>, vector<512x32xbf16>, vector<16x32xf32> -> vector<16x32xf32>
    %248 = arith.addf %237, %247 : vector<16x32xf32>
    %c0_100 = arith.constant 0 : index
    %c0_101 = arith.constant 0 : index
    %249 = vector.load %arg12[%c0_100, %c0_101] : memref<1x32xf32, #tpu.memory_space<vmem>>, vector<1x32xf32>
    %250 = vector.broadcast %249 : vector<1x32xf32> to vector<16x32xf32>
    %251 = arith.addf %248, %250 : vector<16x32xf32>
    %252 = arith.addf %202, %251 : vector<16x32xf32>
    %cst_102 = arith.constant dense<0.000000e+00> : vector<16xf32>
    %253 = vector.multi_reduction <add>, %252, %cst_102 [1] : vector<16x32xf32> to vector<16xf32>
    %254 = vector.shape_cast %253 : vector<16xf32> to vector<16x1xf32>
    %cst_103 = arith.constant 3.200000e+01 : f32
    %255 = vector.broadcast %cst_103 : f32 to vector<16x1xf32>
    %256 = arith.divf %254, %255 : vector<16x1xf32>
    %257 = vector.broadcast %256 : vector<16x1xf32> to vector<16x32xf32>
    %258 = arith.subf %252, %257 : vector<16x32xf32>
    %259 = arith.mulf %258, %258 : vector<16x32xf32>
    %cst_104 = arith.constant dense<0.000000e+00> : vector<16xf32>
    %260 = vector.multi_reduction <add>, %259, %cst_104 [1] : vector<16x32xf32> to vector<16xf32>
    %261 = vector.shape_cast %260 : vector<16xf32> to vector<16x1xf32>
    %cst_105 = arith.constant 3.200000e+01 : f32
    %262 = vector.broadcast %cst_105 : f32 to vector<16x1xf32>
    %263 = arith.divf %261, %262 : vector<16x1xf32>
    %264 = vector.broadcast %256 : vector<16x1xf32> to vector<16x32xf32>
    %265 = arith.subf %252, %264 : vector<16x32xf32>
    %cst_106 = arith.constant 9.99999974E-6 : f32
    %266 = vector.broadcast %cst_106 : f32 to vector<16x1xf32>
    %267 = arith.addf %263, %266 : vector<16x1xf32>
    %268 = math.rsqrt %267 : vector<16x1xf32>
    %269 = vector.broadcast %268 : vector<16x1xf32> to vector<16x32xf32>
    %270 = arith.mulf %265, %269 : vector<16x32xf32>
    %c0_107 = arith.constant 0 : index
    %c0_108 = arith.constant 0 : index
    %271 = vector.load %arg13[%c0_107, %c0_108] : memref<1x32xf32, #tpu.memory_space<vmem>>, vector<1x32xf32>
    %272 = vector.broadcast %271 : vector<1x32xf32> to vector<16x32xf32>
    %273 = arith.mulf %270, %272 : vector<16x32xf32>
    %c0_109 = arith.constant 0 : index
    %c0_110 = arith.constant 0 : index
    %274 = vector.load %arg14[%c0_109, %c0_110] : memref<1x32xf32, #tpu.memory_space<vmem>>, vector<1x32xf32>
    %275 = vector.broadcast %274 : vector<1x32xf32> to vector<16x32xf32>
    %276 = arith.addf %273, %275 : vector<16x32xf32>
    %277 = arith.truncf %276 : vector<16x32xf32> to vector<16x32xbf16>
    %c0_111 = arith.constant 0 : index
    %c0_112 = arith.constant 0 : index
    %278 = vector.load %arg15[%c0_111, %c0_112] : memref<32x96xbf16, #tpu.memory_space<vmem>>, vector<32x96xbf16>
    %cst_113 = arith.constant dense<0.000000e+00> : vector<16x96xf32>
    %279 = tpu.matmul %277, %278, %cst_113 {dimension_numbers = #tpu.dot_dimension_numbers<[1], [0], [0], [1], [0, 0, 1, 1], [], []>} : vector<16x32xbf16>, vector<32x96xbf16>, vector<16x96xf32> -> vector<16x96xf32>
    %c0_114 = arith.constant 0 : index
    %c0_115 = arith.constant 0 : index
    %280 = vector.load %arg16[%c0_114, %c0_115] : memref<1x96xf32, #tpu.memory_space<vmem>>, vector<1x96xf32>
    %281 = vector.broadcast %280 : vector<1x96xf32> to vector<16x96xf32>
    %282 = arith.addf %279, %281 : vector<16x96xf32>
    %283 = vector.extract_strided_slice %282 {offsets = [0, 0], sizes = [16, 32], strides = [1, 1]} : vector<16x96xf32> to vector<16x32xf32>
    %cst_116 = arith.constant 0.353553385 : f32
    %284 = vector.broadcast %cst_116 : f32 to vector<16x32xf32>
    %285 = arith.mulf %283, %284 : vector<16x32xf32>
    %286 = vector.extract_strided_slice %282 {offsets = [0, 32], sizes = [16, 32], strides = [1, 1]} : vector<16x96xf32> to vector<16x32xf32>
    %287 = tpu.transpose %286, [1, 0] : vector<16x32xf32> -> vector<32x16xf32>
    %288 = vector.extract_strided_slice %282 {offsets = [0, 64], sizes = [16, 32], strides = [1, 1]} : vector<16x96xf32> to vector<16x32xf32>
    %c0_117 = arith.constant 0 : index
    %c0_118 = arith.constant 0 : index
    %289 = vector.load %arg17[%c0_117, %c0_118] : memref<32x32xbf16, #tpu.memory_space<vmem>>, vector<32x32xbf16>
    %cst_119 = arith.constant 0.000000e+00 : f32
    %290 = vector.broadcast %cst_119 : f32 to vector<8x32xf32>
    %291 = vector.extract_strided_slice %285 {offsets = [0, 0], sizes = [8, 8], strides = [1, 1]} : vector<16x32xf32> to vector<8x8xf32>
    %292 = vector.extract_strided_slice %287 {offsets = [0, 0], sizes = [8, 8], strides = [1, 1]} : vector<32x16xf32> to vector<8x8xf32>
    %cst_120 = arith.constant dense<0.000000e+00> : vector<8x8xf32>
    %293 = tpu.matmul %291, %292, %cst_120 {dimension_numbers = #tpu.dot_dimension_numbers<[1], [0], [0], [1], [0, 0, 1, 1], [], []>} : vector<8x8xf32>, vector<8x8xf32>, vector<8x8xf32> -> vector<8x8xf32>
    %cst_121 = arith.constant dense<0xFF800000> : vector<8xf32>
    %294 = vector.multi_reduction <maximumf>, %293, %cst_121 [1] : vector<8x8xf32> to vector<8xf32>
    %295 = vector.shape_cast %294 : vector<8xf32> to vector<8x1xf32>
    %296 = vector.broadcast %295 : vector<8x1xf32> to vector<8x8xf32>
    %297 = arith.subf %293, %296 : vector<8x8xf32>
    %298 = math.exp %297 : vector<8x8xf32>
    %cst_122 = arith.constant dense<0.000000e+00> : vector<8xf32>
    %299 = vector.multi_reduction <add>, %298, %cst_122 [1] : vector<8x8xf32> to vector<8xf32>
    %300 = vector.shape_cast %299 : vector<8xf32> to vector<8x1xf32>
    %301 = tpu.reciprocal %300 {approx = true} : vector<8x1xf32> -> vector<8x1xf32>
    %302 = vector.broadcast %301 : vector<8x1xf32> to vector<8x8xf32>
    %303 = arith.mulf %298, %302 : vector<8x8xf32>
    %304 = vector.extract_strided_slice %288 {offsets = [0, 0], sizes = [8, 8], strides = [1, 1]} : vector<16x32xf32> to vector<8x8xf32>
    %cst_123 = arith.constant dense<0.000000e+00> : vector<8x8xf32>
    %305 = tpu.matmul %303, %304, %cst_123 {dimension_numbers = #tpu.dot_dimension_numbers<[1], [0], [0], [1], [0, 0, 1, 1], [], []>} : vector<8x8xf32>, vector<8x8xf32>, vector<8x8xf32> -> vector<8x8xf32>
    %306 = arith.truncf %305 : vector<8x8xf32> to vector<8x8xbf16>
    %307 = vector.extract_strided_slice %289 {offsets = [0, 0], sizes = [8, 32], strides = [1, 1]} : vector<32x32xbf16> to vector<8x32xbf16>
    %cst_124 = arith.constant dense<0.000000e+00> : vector<8x32xf32>
    %308 = tpu.matmul %306, %307, %cst_124 {dimension_numbers = #tpu.dot_dimension_numbers<[1], [0], [0], [1], [0, 0, 1, 1], [], []>} : vector<8x8xbf16>, vector<8x32xbf16>, vector<8x32xf32> -> vector<8x32xf32>
    %309 = arith.addf %290, %308 : vector<8x32xf32>
    %310 = vector.extract_strided_slice %285 {offsets = [0, 8], sizes = [8, 8], strides = [1, 1]} : vector<16x32xf32> to vector<8x8xf32>
    %311 = vector.extract_strided_slice %287 {offsets = [8, 0], sizes = [8, 8], strides = [1, 1]} : vector<32x16xf32> to vector<8x8xf32>
    %cst_125 = arith.constant dense<0.000000e+00> : vector<8x8xf32>
    %312 = tpu.matmul %310, %311, %cst_125 {dimension_numbers = #tpu.dot_dimension_numbers<[1], [0], [0], [1], [0, 0, 1, 1], [], []>} : vector<8x8xf32>, vector<8x8xf32>, vector<8x8xf32> -> vector<8x8xf32>
    %cst_126 = arith.constant dense<0xFF800000> : vector<8xf32>
    %313 = vector.multi_reduction <maximumf>, %312, %cst_126 [1] : vector<8x8xf32> to vector<8xf32>
    %314 = vector.shape_cast %313 : vector<8xf32> to vector<8x1xf32>
    %315 = vector.broadcast %314 : vector<8x1xf32> to vector<8x8xf32>
    %316 = arith.subf %312, %315 : vector<8x8xf32>
    %317 = math.exp %316 : vector<8x8xf32>
    %cst_127 = arith.constant dense<0.000000e+00> : vector<8xf32>
    %318 = vector.multi_reduction <add>, %317, %cst_127 [1] : vector<8x8xf32> to vector<8xf32>
    %319 = vector.shape_cast %318 : vector<8xf32> to vector<8x1xf32>
    %320 = tpu.reciprocal %319 {approx = true} : vector<8x1xf32> -> vector<8x1xf32>
    %321 = vector.broadcast %320 : vector<8x1xf32> to vector<8x8xf32>
    %322 = arith.mulf %317, %321 : vector<8x8xf32>
    %323 = vector.extract_strided_slice %288 {offsets = [0, 8], sizes = [8, 8], strides = [1, 1]} : vector<16x32xf32> to vector<8x8xf32>
    %cst_128 = arith.constant dense<0.000000e+00> : vector<8x8xf32>
    %324 = tpu.matmul %322, %323, %cst_128 {dimension_numbers = #tpu.dot_dimension_numbers<[1], [0], [0], [1], [0, 0, 1, 1], [], []>} : vector<8x8xf32>, vector<8x8xf32>, vector<8x8xf32> -> vector<8x8xf32>
    %325 = arith.truncf %324 : vector<8x8xf32> to vector<8x8xbf16>
    %326 = vector.extract_strided_slice %289 {offsets = [8, 0], sizes = [8, 32], strides = [1, 1]} : vector<32x32xbf16> to vector<8x32xbf16>
    %cst_129 = arith.constant dense<0.000000e+00> : vector<8x32xf32>
    %327 = tpu.matmul %325, %326, %cst_129 {dimension_numbers = #tpu.dot_dimension_numbers<[1], [0], [0], [1], [0, 0, 1, 1], [], []>} : vector<8x8xbf16>, vector<8x32xbf16>, vector<8x32xf32> -> vector<8x32xf32>
    %328 = arith.addf %309, %327 : vector<8x32xf32>
    %329 = vector.extract_strided_slice %285 {offsets = [0, 16], sizes = [8, 8], strides = [1, 1]} : vector<16x32xf32> to vector<8x8xf32>
    %330 = vector.extract_strided_slice %287 {offsets = [16, 0], sizes = [8, 8], strides = [1, 1]} : vector<32x16xf32> to vector<8x8xf32>
    %cst_130 = arith.constant dense<0.000000e+00> : vector<8x8xf32>
    %331 = tpu.matmul %329, %330, %cst_130 {dimension_numbers = #tpu.dot_dimension_numbers<[1], [0], [0], [1], [0, 0, 1, 1], [], []>} : vector<8x8xf32>, vector<8x8xf32>, vector<8x8xf32> -> vector<8x8xf32>
    %cst_131 = arith.constant dense<0xFF800000> : vector<8xf32>
    %332 = vector.multi_reduction <maximumf>, %331, %cst_131 [1] : vector<8x8xf32> to vector<8xf32>
    %333 = vector.shape_cast %332 : vector<8xf32> to vector<8x1xf32>
    %334 = vector.broadcast %333 : vector<8x1xf32> to vector<8x8xf32>
    %335 = arith.subf %331, %334 : vector<8x8xf32>
    %336 = math.exp %335 : vector<8x8xf32>
    %cst_132 = arith.constant dense<0.000000e+00> : vector<8xf32>
    %337 = vector.multi_reduction <add>, %336, %cst_132 [1] : vector<8x8xf32> to vector<8xf32>
    %338 = vector.shape_cast %337 : vector<8xf32> to vector<8x1xf32>
    %339 = tpu.reciprocal %338 {approx = true} : vector<8x1xf32> -> vector<8x1xf32>
    %340 = vector.broadcast %339 : vector<8x1xf32> to vector<8x8xf32>
    %341 = arith.mulf %336, %340 : vector<8x8xf32>
    %342 = vector.extract_strided_slice %288 {offsets = [0, 16], sizes = [8, 8], strides = [1, 1]} : vector<16x32xf32> to vector<8x8xf32>
    %cst_133 = arith.constant dense<0.000000e+00> : vector<8x8xf32>
    %343 = tpu.matmul %341, %342, %cst_133 {dimension_numbers = #tpu.dot_dimension_numbers<[1], [0], [0], [1], [0, 0, 1, 1], [], []>} : vector<8x8xf32>, vector<8x8xf32>, vector<8x8xf32> -> vector<8x8xf32>
    %344 = arith.truncf %343 : vector<8x8xf32> to vector<8x8xbf16>
    %345 = vector.extract_strided_slice %289 {offsets = [16, 0], sizes = [8, 32], strides = [1, 1]} : vector<32x32xbf16> to vector<8x32xbf16>
    %cst_134 = arith.constant dense<0.000000e+00> : vector<8x32xf32>
    %346 = tpu.matmul %344, %345, %cst_134 {dimension_numbers = #tpu.dot_dimension_numbers<[1], [0], [0], [1], [0, 0, 1, 1], [], []>} : vector<8x8xbf16>, vector<8x32xbf16>, vector<8x32xf32> -> vector<8x32xf32>
    %347 = arith.addf %328, %346 : vector<8x32xf32>
    %348 = vector.extract_strided_slice %285 {offsets = [0, 24], sizes = [8, 8], strides = [1, 1]} : vector<16x32xf32> to vector<8x8xf32>
    %349 = vector.extract_strided_slice %287 {offsets = [24, 0], sizes = [8, 8], strides = [1, 1]} : vector<32x16xf32> to vector<8x8xf32>
    %cst_135 = arith.constant dense<0.000000e+00> : vector<8x8xf32>
    %350 = tpu.matmul %348, %349, %cst_135 {dimension_numbers = #tpu.dot_dimension_numbers<[1], [0], [0], [1], [0, 0, 1, 1], [], []>} : vector<8x8xf32>, vector<8x8xf32>, vector<8x8xf32> -> vector<8x8xf32>
    %cst_136 = arith.constant dense<0xFF800000> : vector<8xf32>
    %351 = vector.multi_reduction <maximumf>, %350, %cst_136 [1] : vector<8x8xf32> to vector<8xf32>
    %352 = vector.shape_cast %351 : vector<8xf32> to vector<8x1xf32>
    %353 = vector.broadcast %352 : vector<8x1xf32> to vector<8x8xf32>
    %354 = arith.subf %350, %353 : vector<8x8xf32>
    %355 = math.exp %354 : vector<8x8xf32>
    %cst_137 = arith.constant dense<0.000000e+00> : vector<8xf32>
    %356 = vector.multi_reduction <add>, %355, %cst_137 [1] : vector<8x8xf32> to vector<8xf32>
    %357 = vector.shape_cast %356 : vector<8xf32> to vector<8x1xf32>
    %358 = tpu.reciprocal %357 {approx = true} : vector<8x1xf32> -> vector<8x1xf32>
    %359 = vector.broadcast %358 : vector<8x1xf32> to vector<8x8xf32>
    %360 = arith.mulf %355, %359 : vector<8x8xf32>
    %361 = vector.extract_strided_slice %288 {offsets = [0, 24], sizes = [8, 8], strides = [1, 1]} : vector<16x32xf32> to vector<8x8xf32>
    %cst_138 = arith.constant dense<0.000000e+00> : vector<8x8xf32>
    %362 = tpu.matmul %360, %361, %cst_138 {dimension_numbers = #tpu.dot_dimension_numbers<[1], [0], [0], [1], [0, 0, 1, 1], [], []>} : vector<8x8xf32>, vector<8x8xf32>, vector<8x8xf32> -> vector<8x8xf32>
    %363 = arith.truncf %362 : vector<8x8xf32> to vector<8x8xbf16>
    %364 = vector.extract_strided_slice %289 {offsets = [24, 0], sizes = [8, 32], strides = [1, 1]} : vector<32x32xbf16> to vector<8x32xbf16>
    %cst_139 = arith.constant dense<0.000000e+00> : vector<8x32xf32>
    %365 = tpu.matmul %363, %364, %cst_139 {dimension_numbers = #tpu.dot_dimension_numbers<[1], [0], [0], [1], [0, 0, 1, 1], [], []>} : vector<8x8xbf16>, vector<8x32xbf16>, vector<8x32xf32> -> vector<8x32xf32>
    %366 = arith.addf %347, %365 : vector<8x32xf32>
    %cst_140 = arith.constant 0.000000e+00 : f32
    %367 = vector.broadcast %cst_140 : f32 to vector<8x32xf32>
    %368 = vector.extract_strided_slice %285 {offsets = [8, 0], sizes = [8, 8], strides = [1, 1]} : vector<16x32xf32> to vector<8x8xf32>
    %369 = vector.extract_strided_slice %287 {offsets = [0, 8], sizes = [8, 8], strides = [1, 1]} : vector<32x16xf32> to vector<8x8xf32>
    %cst_141 = arith.constant dense<0.000000e+00> : vector<8x8xf32>
    %370 = tpu.matmul %368, %369, %cst_141 {dimension_numbers = #tpu.dot_dimension_numbers<[1], [0], [0], [1], [0, 0, 1, 1], [], []>} : vector<8x8xf32>, vector<8x8xf32>, vector<8x8xf32> -> vector<8x8xf32>
    %cst_142 = arith.constant dense<0xFF800000> : vector<8xf32>
    %371 = vector.multi_reduction <maximumf>, %370, %cst_142 [1] : vector<8x8xf32> to vector<8xf32>
    %372 = vector.shape_cast %371 : vector<8xf32> to vector<8x1xf32>
    %373 = vector.broadcast %372 : vector<8x1xf32> to vector<8x8xf32>
    %374 = arith.subf %370, %373 : vector<8x8xf32>
    %375 = math.exp %374 : vector<8x8xf32>
    %cst_143 = arith.constant dense<0.000000e+00> : vector<8xf32>
    %376 = vector.multi_reduction <add>, %375, %cst_143 [1] : vector<8x8xf32> to vector<8xf32>
    %377 = vector.shape_cast %376 : vector<8xf32> to vector<8x1xf32>
    %378 = tpu.reciprocal %377 {approx = true} : vector<8x1xf32> -> vector<8x1xf32>
    %379 = vector.broadcast %378 : vector<8x1xf32> to vector<8x8xf32>
    %380 = arith.mulf %375, %379 : vector<8x8xf32>
    %381 = vector.extract_strided_slice %288 {offsets = [8, 0], sizes = [8, 8], strides = [1, 1]} : vector<16x32xf32> to vector<8x8xf32>
    %cst_144 = arith.constant dense<0.000000e+00> : vector<8x8xf32>
    %382 = tpu.matmul %380, %381, %cst_144 {dimension_numbers = #tpu.dot_dimension_numbers<[1], [0], [0], [1], [0, 0, 1, 1], [], []>} : vector<8x8xf32>, vector<8x8xf32>, vector<8x8xf32> -> vector<8x8xf32>
    %383 = arith.truncf %382 : vector<8x8xf32> to vector<8x8xbf16>
    %384 = vector.extract_strided_slice %289 {offsets = [0, 0], sizes = [8, 32], strides = [1, 1]} : vector<32x32xbf16> to vector<8x32xbf16>
    %cst_145 = arith.constant dense<0.000000e+00> : vector<8x32xf32>
    %385 = tpu.matmul %383, %384, %cst_145 {dimension_numbers = #tpu.dot_dimension_numbers<[1], [0], [0], [1], [0, 0, 1, 1], [], []>} : vector<8x8xbf16>, vector<8x32xbf16>, vector<8x32xf32> -> vector<8x32xf32>
    %386 = arith.addf %367, %385 : vector<8x32xf32>
    %387 = vector.extract_strided_slice %285 {offsets = [8, 8], sizes = [8, 8], strides = [1, 1]} : vector<16x32xf32> to vector<8x8xf32>
    %388 = vector.extract_strided_slice %287 {offsets = [8, 8], sizes = [8, 8], strides = [1, 1]} : vector<32x16xf32> to vector<8x8xf32>
    %cst_146 = arith.constant dense<0.000000e+00> : vector<8x8xf32>
    %389 = tpu.matmul %387, %388, %cst_146 {dimension_numbers = #tpu.dot_dimension_numbers<[1], [0], [0], [1], [0, 0, 1, 1], [], []>} : vector<8x8xf32>, vector<8x8xf32>, vector<8x8xf32> -> vector<8x8xf32>
    %cst_147 = arith.constant dense<0xFF800000> : vector<8xf32>
    %390 = vector.multi_reduction <maximumf>, %389, %cst_147 [1] : vector<8x8xf32> to vector<8xf32>
    %391 = vector.shape_cast %390 : vector<8xf32> to vector<8x1xf32>
    %392 = vector.broadcast %391 : vector<8x1xf32> to vector<8x8xf32>
    %393 = arith.subf %389, %392 : vector<8x8xf32>
    %394 = math.exp %393 : vector<8x8xf32>
    %cst_148 = arith.constant dense<0.000000e+00> : vector<8xf32>
    %395 = vector.multi_reduction <add>, %394, %cst_148 [1] : vector<8x8xf32> to vector<8xf32>
    %396 = vector.shape_cast %395 : vector<8xf32> to vector<8x1xf32>
    %397 = tpu.reciprocal %396 {approx = true} : vector<8x1xf32> -> vector<8x1xf32>
    %398 = vector.broadcast %397 : vector<8x1xf32> to vector<8x8xf32>
    %399 = arith.mulf %394, %398 : vector<8x8xf32>
    %400 = vector.extract_strided_slice %288 {offsets = [8, 8], sizes = [8, 8], strides = [1, 1]} : vector<16x32xf32> to vector<8x8xf32>
    %cst_149 = arith.constant dense<0.000000e+00> : vector<8x8xf32>
    %401 = tpu.matmul %399, %400, %cst_149 {dimension_numbers = #tpu.dot_dimension_numbers<[1], [0], [0], [1], [0, 0, 1, 1], [], []>} : vector<8x8xf32>, vector<8x8xf32>, vector<8x8xf32> -> vector<8x8xf32>
    %402 = arith.truncf %401 : vector<8x8xf32> to vector<8x8xbf16>
    %403 = vector.extract_strided_slice %289 {offsets = [8, 0], sizes = [8, 32], strides = [1, 1]} : vector<32x32xbf16> to vector<8x32xbf16>
    %cst_150 = arith.constant dense<0.000000e+00> : vector<8x32xf32>
    %404 = tpu.matmul %402, %403, %cst_150 {dimension_numbers = #tpu.dot_dimension_numbers<[1], [0], [0], [1], [0, 0, 1, 1], [], []>} : vector<8x8xbf16>, vector<8x32xbf16>, vector<8x32xf32> -> vector<8x32xf32>
    %405 = arith.addf %386, %404 : vector<8x32xf32>
    %406 = vector.extract_strided_slice %285 {offsets = [8, 16], sizes = [8, 8], strides = [1, 1]} : vector<16x32xf32> to vector<8x8xf32>
    %407 = vector.extract_strided_slice %287 {offsets = [16, 8], sizes = [8, 8], strides = [1, 1]} : vector<32x16xf32> to vector<8x8xf32>
    %cst_151 = arith.constant dense<0.000000e+00> : vector<8x8xf32>
    %408 = tpu.matmul %406, %407, %cst_151 {dimension_numbers = #tpu.dot_dimension_numbers<[1], [0], [0], [1], [0, 0, 1, 1], [], []>} : vector<8x8xf32>, vector<8x8xf32>, vector<8x8xf32> -> vector<8x8xf32>
    %cst_152 = arith.constant dense<0xFF800000> : vector<8xf32>
    %409 = vector.multi_reduction <maximumf>, %408, %cst_152 [1] : vector<8x8xf32> to vector<8xf32>
    %410 = vector.shape_cast %409 : vector<8xf32> to vector<8x1xf32>
    %411 = vector.broadcast %410 : vector<8x1xf32> to vector<8x8xf32>
    %412 = arith.subf %408, %411 : vector<8x8xf32>
    %413 = math.exp %412 : vector<8x8xf32>
    %cst_153 = arith.constant dense<0.000000e+00> : vector<8xf32>
    %414 = vector.multi_reduction <add>, %413, %cst_153 [1] : vector<8x8xf32> to vector<8xf32>
    %415 = vector.shape_cast %414 : vector<8xf32> to vector<8x1xf32>
    %416 = tpu.reciprocal %415 {approx = true} : vector<8x1xf32> -> vector<8x1xf32>
    %417 = vector.broadcast %416 : vector<8x1xf32> to vector<8x8xf32>
    %418 = arith.mulf %413, %417 : vector<8x8xf32>
    %419 = vector.extract_strided_slice %288 {offsets = [8, 16], sizes = [8, 8], strides = [1, 1]} : vector<16x32xf32> to vector<8x8xf32>
    %cst_154 = arith.constant dense<0.000000e+00> : vector<8x8xf32>
    %420 = tpu.matmul %418, %419, %cst_154 {dimension_numbers = #tpu.dot_dimension_numbers<[1], [0], [0], [1], [0, 0, 1, 1], [], []>} : vector<8x8xf32>, vector<8x8xf32>, vector<8x8xf32> -> vector<8x8xf32>
    %421 = arith.truncf %420 : vector<8x8xf32> to vector<8x8xbf16>
    %422 = vector.extract_strided_slice %289 {offsets = [16, 0], sizes = [8, 32], strides = [1, 1]} : vector<32x32xbf16> to vector<8x32xbf16>
    %cst_155 = arith.constant dense<0.000000e+00> : vector<8x32xf32>
    %423 = tpu.matmul %421, %422, %cst_155 {dimension_numbers = #tpu.dot_dimension_numbers<[1], [0], [0], [1], [0, 0, 1, 1], [], []>} : vector<8x8xbf16>, vector<8x32xbf16>, vector<8x32xf32> -> vector<8x32xf32>
    %424 = arith.addf %405, %423 : vector<8x32xf32>
    %425 = vector.extract_strided_slice %285 {offsets = [8, 24], sizes = [8, 8], strides = [1, 1]} : vector<16x32xf32> to vector<8x8xf32>
    %426 = vector.extract_strided_slice %287 {offsets = [24, 8], sizes = [8, 8], strides = [1, 1]} : vector<32x16xf32> to vector<8x8xf32>
    %cst_156 = arith.constant dense<0.000000e+00> : vector<8x8xf32>
    %427 = tpu.matmul %425, %426, %cst_156 {dimension_numbers = #tpu.dot_dimension_numbers<[1], [0], [0], [1], [0, 0, 1, 1], [], []>} : vector<8x8xf32>, vector<8x8xf32>, vector<8x8xf32> -> vector<8x8xf32>
    %cst_157 = arith.constant dense<0xFF800000> : vector<8xf32>
    %428 = vector.multi_reduction <maximumf>, %427, %cst_157 [1] : vector<8x8xf32> to vector<8xf32>
    %429 = vector.shape_cast %428 : vector<8xf32> to vector<8x1xf32>
    %430 = vector.broadcast %429 : vector<8x1xf32> to vector<8x8xf32>
    %431 = arith.subf %427, %430 : vector<8x8xf32>
    %432 = math.exp %431 : vector<8x8xf32>
    %cst_158 = arith.constant dense<0.000000e+00> : vector<8xf32>
    %433 = vector.multi_reduction <add>, %432, %cst_158 [1] : vector<8x8xf32> to vector<8xf32>
    %434 = vector.shape_cast %433 : vector<8xf32> to vector<8x1xf32>
    %435 = tpu.reciprocal %434 {approx = true} : vector<8x1xf32> -> vector<8x1xf32>
    %436 = vector.broadcast %435 : vector<8x1xf32> to vector<8x8xf32>
    %437 = arith.mulf %432, %436 : vector<8x8xf32>
    %438 = vector.extract_strided_slice %288 {offsets = [8, 24], sizes = [8, 8], strides = [1, 1]} : vector<16x32xf32> to vector<8x8xf32>
    %cst_159 = arith.constant dense<0.000000e+00> : vector<8x8xf32>
    %439 = tpu.matmul %437, %438, %cst_159 {dimension_numbers = #tpu.dot_dimension_numbers<[1], [0], [0], [1], [0, 0, 1, 1], [], []>} : vector<8x8xf32>, vector<8x8xf32>, vector<8x8xf32> -> vector<8x8xf32>
    %440 = arith.truncf %439 : vector<8x8xf32> to vector<8x8xbf16>
    %441 = vector.extract_strided_slice %289 {offsets = [24, 0], sizes = [8, 32], strides = [1, 1]} : vector<32x32xbf16> to vector<8x32xbf16>
    %cst_160 = arith.constant dense<0.000000e+00> : vector<8x32xf32>
    %442 = tpu.matmul %440, %441, %cst_160 {dimension_numbers = #tpu.dot_dimension_numbers<[1], [0], [0], [1], [0, 0, 1, 1], [], []>} : vector<8x8xbf16>, vector<8x32xbf16>, vector<8x32xf32> -> vector<8x32xf32>
    %443 = arith.addf %424, %442 : vector<8x32xf32>
    %444 = tpu.concatenate %366, %443 in 0 : vector<8x32xf32>, vector<8x32xf32> -> vector<16x32xf32>
    %c0_161 = arith.constant 0 : index
    %c0_162 = arith.constant 0 : index
    %445 = vector.load %arg18[%c0_161, %c0_162] : memref<1x32xf32, #tpu.memory_space<vmem>>, vector<1x32xf32>
    %446 = vector.broadcast %445 : vector<1x32xf32> to vector<16x32xf32>
    %447 = arith.addf %444, %446 : vector<16x32xf32>
    %448 = arith.addf %276, %447 : vector<16x32xf32>
    %cst_163 = arith.constant dense<0.000000e+00> : vector<16xf32>
    %449 = vector.multi_reduction <add>, %448, %cst_163 [1] : vector<16x32xf32> to vector<16xf32>
    %450 = vector.shape_cast %449 : vector<16xf32> to vector<16x1xf32>
    %cst_164 = arith.constant 3.200000e+01 : f32
    %451 = vector.broadcast %cst_164 : f32 to vector<16x1xf32>
    %452 = arith.divf %450, %451 : vector<16x1xf32>
    %453 = vector.broadcast %452 : vector<16x1xf32> to vector<16x32xf32>
    %454 = arith.subf %448, %453 : vector<16x32xf32>
    %455 = arith.mulf %454, %454 : vector<16x32xf32>
    %cst_165 = arith.constant dense<0.000000e+00> : vector<16xf32>
    %456 = vector.multi_reduction <add>, %455, %cst_165 [1] : vector<16x32xf32> to vector<16xf32>
    %457 = vector.shape_cast %456 : vector<16xf32> to vector<16x1xf32>
    %cst_166 = arith.constant 3.200000e+01 : f32
    %458 = vector.broadcast %cst_166 : f32 to vector<16x1xf32>
    %459 = arith.divf %457, %458 : vector<16x1xf32>
    %460 = vector.broadcast %452 : vector<16x1xf32> to vector<16x32xf32>
    %461 = arith.subf %448, %460 : vector<16x32xf32>
    %cst_167 = arith.constant 9.99999974E-6 : f32
    %462 = vector.broadcast %cst_167 : f32 to vector<16x1xf32>
    %463 = arith.addf %459, %462 : vector<16x1xf32>
    %464 = math.rsqrt %463 : vector<16x1xf32>
    %465 = vector.broadcast %464 : vector<16x1xf32> to vector<16x32xf32>
    %466 = arith.mulf %461, %465 : vector<16x32xf32>
    %c0_168 = arith.constant 0 : index
    %c0_169 = arith.constant 0 : index
    %467 = vector.load %arg19[%c0_168, %c0_169] : memref<1x32xf32, #tpu.memory_space<vmem>>, vector<1x32xf32>
    %468 = vector.broadcast %467 : vector<1x32xf32> to vector<16x32xf32>
    %469 = arith.mulf %466, %468 : vector<16x32xf32>
    %c0_170 = arith.constant 0 : index
    %c0_171 = arith.constant 0 : index
    %470 = vector.load %arg20[%c0_170, %c0_171] : memref<1x32xf32, #tpu.memory_space<vmem>>, vector<1x32xf32>
    %471 = vector.broadcast %470 : vector<1x32xf32> to vector<16x32xf32>
    %472 = arith.addf %469, %471 : vector<16x32xf32>
    %473 = arith.truncf %472 : vector<16x32xf32> to vector<16x32xbf16>
    %cst_172 = arith.constant 0.000000e+00 : f32
    %474 = vector.broadcast %cst_172 : f32 to vector<16x32xf32>
    %c0_173 = arith.constant 0 : index
    %c0_174 = arith.constant 0 : index
    %475 = vector.load %arg21[%c0_173, %c0_174] : memref<32x2048xbf16, #tpu.memory_space<vmem>>, vector<32x512xbf16>
    %cst_175 = arith.constant dense<0.000000e+00> : vector<16x512xf32>
    %476 = tpu.matmul %473, %475, %cst_175 {dimension_numbers = #tpu.dot_dimension_numbers<[1], [0], [0], [1], [0, 0, 1, 1], [], []>} : vector<16x32xbf16>, vector<32x512xbf16>, vector<16x512xf32> -> vector<16x512xf32>
    %c0_176 = arith.constant 0 : index
    %c0_177 = arith.constant 0 : index
    %477 = vector.load %arg22[%c0_176, %c0_177] : memref<1x2048xf32, #tpu.memory_space<vmem>>, vector<1x512xf32>
    %478 = vector.broadcast %477 : vector<1x512xf32> to vector<16x512xf32>
    %479 = arith.addf %476, %478 : vector<16x512xf32>
    %cst_178 = arith.constant 0.000000e+00 : f32
    %480 = vector.broadcast %cst_178 : f32 to vector<16x512xf32>
    %481 = arith.maximumf %479, %480 : vector<16x512xf32>
    %482 = arith.truncf %481 : vector<16x512xf32> to vector<16x512xbf16>
    %c0_179 = arith.constant 0 : index
    %c0_180 = arith.constant 0 : index
    %483 = vector.load %arg23[%c0_179, %c0_180] : memref<2048x32xbf16, #tpu.memory_space<vmem>>, vector<512x32xbf16>
    %cst_181 = arith.constant dense<0.000000e+00> : vector<16x32xf32>
    %484 = tpu.matmul %482, %483, %cst_181 {dimension_numbers = #tpu.dot_dimension_numbers<[1], [0], [0], [1], [0, 0, 1, 1], [], []>} : vector<16x512xbf16>, vector<512x32xbf16>, vector<16x32xf32> -> vector<16x32xf32>
    %485 = arith.addf %474, %484 : vector<16x32xf32>
    %c0_182 = arith.constant 0 : index
    %c512_183 = arith.constant 512 : index
    %486 = vector.load %arg21[%c0_182, %c512_183] : memref<32x2048xbf16, #tpu.memory_space<vmem>>, vector<32x512xbf16>
    %cst_184 = arith.constant dense<0.000000e+00> : vector<16x512xf32>
    %487 = tpu.matmul %473, %486, %cst_184 {dimension_numbers = #tpu.dot_dimension_numbers<[1], [0], [0], [1], [0, 0, 1, 1], [], []>} : vector<16x32xbf16>, vector<32x512xbf16>, vector<16x512xf32> -> vector<16x512xf32>
    %c0_185 = arith.constant 0 : index
    %c512_186 = arith.constant 512 : index
    %488 = vector.load %arg22[%c0_185, %c512_186] : memref<1x2048xf32, #tpu.memory_space<vmem>>, vector<1x512xf32>
    %489 = vector.broadcast %488 : vector<1x512xf32> to vector<16x512xf32>
    %490 = arith.addf %487, %489 : vector<16x512xf32>
    %cst_187 = arith.constant 0.000000e+00 : f32
    %491 = vector.broadcast %cst_187 : f32 to vector<16x512xf32>
    %492 = arith.maximumf %490, %491 : vector<16x512xf32>
    %493 = arith.truncf %492 : vector<16x512xf32> to vector<16x512xbf16>
    %c512_188 = arith.constant 512 : index
    %c0_189 = arith.constant 0 : index
    %494 = vector.load %arg23[%c512_188, %c0_189] : memref<2048x32xbf16, #tpu.memory_space<vmem>>, vector<512x32xbf16>
    %cst_190 = arith.constant dense<0.000000e+00> : vector<16x32xf32>
    %495 = tpu.matmul %493, %494, %cst_190 {dimension_numbers = #tpu.dot_dimension_numbers<[1], [0], [0], [1], [0, 0, 1, 1], [], []>} : vector<16x512xbf16>, vector<512x32xbf16>, vector<16x32xf32> -> vector<16x32xf32>
    %496 = arith.addf %485, %495 : vector<16x32xf32>
    %c0_191 = arith.constant 0 : index
    %c1024_192 = arith.constant 1024 : index
    %497 = vector.load %arg21[%c0_191, %c1024_192] : memref<32x2048xbf16, #tpu.memory_space<vmem>>, vector<32x512xbf16>
    %cst_193 = arith.constant dense<0.000000e+00> : vector<16x512xf32>
    %498 = tpu.matmul %473, %497, %cst_193 {dimension_numbers = #tpu.dot_dimension_numbers<[1], [0], [0], [1], [0, 0, 1, 1], [], []>} : vector<16x32xbf16>, vector<32x512xbf16>, vector<16x512xf32> -> vector<16x512xf32>
    %c0_194 = arith.constant 0 : index
    %c1024_195 = arith.constant 1024 : index
    %499 = vector.load %arg22[%c0_194, %c1024_195] : memref<1x2048xf32, #tpu.memory_space<vmem>>, vector<1x512xf32>
    %500 = vector.broadcast %499 : vector<1x512xf32> to vector<16x512xf32>
    %501 = arith.addf %498, %500 : vector<16x512xf32>
    %cst_196 = arith.constant 0.000000e+00 : f32
    %502 = vector.broadcast %cst_196 : f32 to vector<16x512xf32>
    %503 = arith.maximumf %501, %502 : vector<16x512xf32>
    %504 = arith.truncf %503 : vector<16x512xf32> to vector<16x512xbf16>
    %c1024_197 = arith.constant 1024 : index
    %c0_198 = arith.constant 0 : index
    %505 = vector.load %arg23[%c1024_197, %c0_198] : memref<2048x32xbf16, #tpu.memory_space<vmem>>, vector<512x32xbf16>
    %cst_199 = arith.constant dense<0.000000e+00> : vector<16x32xf32>
    %506 = tpu.matmul %504, %505, %cst_199 {dimension_numbers = #tpu.dot_dimension_numbers<[1], [0], [0], [1], [0, 0, 1, 1], [], []>} : vector<16x512xbf16>, vector<512x32xbf16>, vector<16x32xf32> -> vector<16x32xf32>
    %507 = arith.addf %496, %506 : vector<16x32xf32>
    %c0_200 = arith.constant 0 : index
    %c1536_201 = arith.constant 1536 : index
    %508 = vector.load %arg21[%c0_200, %c1536_201] : memref<32x2048xbf16, #tpu.memory_space<vmem>>, vector<32x512xbf16>
    %cst_202 = arith.constant dense<0.000000e+00> : vector<16x512xf32>
    %509 = tpu.matmul %473, %508, %cst_202 {dimension_numbers = #tpu.dot_dimension_numbers<[1], [0], [0], [1], [0, 0, 1, 1], [], []>} : vector<16x32xbf16>, vector<32x512xbf16>, vector<16x512xf32> -> vector<16x512xf32>
    %c0_203 = arith.constant 0 : index
    %c1536_204 = arith.constant 1536 : index
    %510 = vector.load %arg22[%c0_203, %c1536_204] : memref<1x2048xf32, #tpu.memory_space<vmem>>, vector<1x512xf32>
    %511 = vector.broadcast %510 : vector<1x512xf32> to vector<16x512xf32>
    %512 = arith.addf %509, %511 : vector<16x512xf32>
    %cst_205 = arith.constant 0.000000e+00 : f32
    %513 = vector.broadcast %cst_205 : f32 to vector<16x512xf32>
    %514 = arith.maximumf %512, %513 : vector<16x512xf32>
    %515 = arith.truncf %514 : vector<16x512xf32> to vector<16x512xbf16>
    %c1536_206 = arith.constant 1536 : index
    %c0_207 = arith.constant 0 : index
    %516 = vector.load %arg23[%c1536_206, %c0_207] : memref<2048x32xbf16, #tpu.memory_space<vmem>>, vector<512x32xbf16>
    %cst_208 = arith.constant dense<0.000000e+00> : vector<16x32xf32>
    %517 = tpu.matmul %515, %516, %cst_208 {dimension_numbers = #tpu.dot_dimension_numbers<[1], [0], [0], [1], [0, 0, 1, 1], [], []>} : vector<16x512xbf16>, vector<512x32xbf16>, vector<16x32xf32> -> vector<16x32xf32>
    %518 = arith.addf %507, %517 : vector<16x32xf32>
    %c0_209 = arith.constant 0 : index
    %c0_210 = arith.constant 0 : index
    %519 = vector.load %arg24[%c0_209, %c0_210] : memref<1x32xf32, #tpu.memory_space<vmem>>, vector<1x32xf32>
    %520 = vector.broadcast %519 : vector<1x32xf32> to vector<16x32xf32>
    %521 = arith.addf %518, %520 : vector<16x32xf32>
    %522 = arith.addf %472, %521 : vector<16x32xf32>
    %cst_211 = arith.constant dense<0.000000e+00> : vector<16xf32>
    %523 = vector.multi_reduction <add>, %522, %cst_211 [1] : vector<16x32xf32> to vector<16xf32>
    %524 = vector.shape_cast %523 : vector<16xf32> to vector<16x1xf32>
    %cst_212 = arith.constant 3.200000e+01 : f32
    %525 = vector.broadcast %cst_212 : f32 to vector<16x1xf32>
    %526 = arith.divf %524, %525 : vector<16x1xf32>
    %527 = vector.broadcast %526 : vector<16x1xf32> to vector<16x32xf32>
    %528 = arith.subf %522, %527 : vector<16x32xf32>
    %529 = arith.mulf %528, %528 : vector<16x32xf32>
    %cst_213 = arith.constant dense<0.000000e+00> : vector<16xf32>
    %530 = vector.multi_reduction <add>, %529, %cst_213 [1] : vector<16x32xf32> to vector<16xf32>
    %531 = vector.shape_cast %530 : vector<16xf32> to vector<16x1xf32>
    %cst_214 = arith.constant 3.200000e+01 : f32
    %532 = vector.broadcast %cst_214 : f32 to vector<16x1xf32>
    %533 = arith.divf %531, %532 : vector<16x1xf32>
    %534 = vector.broadcast %526 : vector<16x1xf32> to vector<16x32xf32>
    %535 = arith.subf %522, %534 : vector<16x32xf32>
    %cst_215 = arith.constant 9.99999974E-6 : f32
    %536 = vector.broadcast %cst_215 : f32 to vector<16x1xf32>
    %537 = arith.addf %533, %536 : vector<16x1xf32>
    %538 = math.rsqrt %537 : vector<16x1xf32>
    %539 = vector.broadcast %538 : vector<16x1xf32> to vector<16x32xf32>
    %540 = arith.mulf %535, %539 : vector<16x32xf32>
    %c0_216 = arith.constant 0 : index
    %c0_217 = arith.constant 0 : index
    %541 = vector.load %arg25[%c0_216, %c0_217] : memref<1x32xf32, #tpu.memory_space<vmem>>, vector<1x32xf32>
    %542 = vector.broadcast %541 : vector<1x32xf32> to vector<16x32xf32>
    %543 = arith.mulf %540, %542 : vector<16x32xf32>
    %c0_218 = arith.constant 0 : index
    %c0_219 = arith.constant 0 : index
    %544 = vector.load %arg26[%c0_218, %c0_219] : memref<1x32xf32, #tpu.memory_space<vmem>>, vector<1x32xf32>
    %545 = vector.broadcast %544 : vector<1x32xf32> to vector<16x32xf32>
    %546 = arith.addf %543, %545 : vector<16x32xf32>
    %547 = vector.extract_strided_slice %546 {offsets = [7, 0], sizes = [1, 32], strides = [1, 1]} : vector<16x32xf32> to vector<1x32xf32>
    %548 = vector.extract_strided_slice %546 {offsets = [15, 0], sizes = [1, 32], strides = [1, 1]} : vector<16x32xf32> to vector<1x32xf32>
    %549 = tpu.concatenate %547, %548 in 0 : vector<1x32xf32>, vector<1x32xf32> -> vector<2x32xf32>
    %550 = arith.truncf %549 : vector<2x32xf32> to vector<2x32xbf16>
    %c0_220 = arith.constant 0 : index
    %c0_221 = arith.constant 0 : index
    %551 = vector.load %arg27[%c0_220, %c0_221] : memref<32x4xbf16, #tpu.memory_space<vmem>>, vector<32x4xbf16>
    %cst_222 = arith.constant dense<0.000000e+00> : vector<2x4xf32>
    %552 = tpu.matmul %550, %551, %cst_222 {dimension_numbers = #tpu.dot_dimension_numbers<[1], [0], [0], [1], [0, 0, 1, 1], [], []>} : vector<2x32xbf16>, vector<32x4xbf16>, vector<2x4xf32> -> vector<2x4xf32>
    %c0_223 = arith.constant 0 : index
    %c0_224 = arith.constant 0 : index
    %553 = vector.load %arg28[%c0_223, %c0_224] : memref<1x4xf32, #tpu.memory_space<vmem>>, vector<1x4xf32>
    %554 = vector.broadcast %553 : vector<1x4xf32> to vector<2x4xf32>
    %555 = arith.addf %552, %554 : vector<2x4xf32>
    %c0_225 = arith.constant 0 : index
    %c0_226 = arith.constant 0 : index
    %556 = vector.load %arg29[%c0_225, %c0_226] : memref<2x4xf32, #tpu.memory_space<vmem>>, vector<2x4xf32>
    tpu.vector_store %arg29[%c0_225, %c0_226], %555 {strides = array<i32>} : memref<2x4xf32, #tpu.memory_space<vmem>>, vector<2x4xf32>,
    return
  }
}

</mosaic_0001>

<bundles_post_ra>
// kernel: transformer_forward.1
= control target key start
LH: loop header
LB: loop body
LE: loop exit
PB: predicated region body
PF: predicated region fallthrough
CT: control target
= control target key end

     0   :  { %s9702_s6 = smov 1   ;;  %s9703_s10 = smov 2   ;;  %s10896_s0 = inlined_call_operand.smem [shape: u32[30], index: -1, kind: input, shape index: {}] }
   0x1   :  { %s9754_s5 = sld [smem:[%s10896_s0]]   ;;  %s9704_s14 = smov 3  }
   0x2   :  { %s9759_s9 = sld [smem:[%s10896_s0 + %s9702_s6]]   ;;  %s9705_s18 = smov 4  }
   0x3   :  { %s9764_s13 = sld [smem:[%s10896_s0 + %s9703_s10]]   ;;  %s9706_s22 = smov 5  }
   0x4   :  { %s9769_s17 = sld [smem:[%s10896_s0 + %s9704_s14]]   ;;  %s9707_s26 = smov 6  }
   0x5   :  { %s9774_s21 = sld [smem:[%s10896_s0 + %s9705_s18]]   ;;  %s9708_s30 = smov 7  }
   0x6   :  { %s9779_s25 = sld [smem:[%s10896_s0 + %s9706_s22]]   ;;  %s9709_s4 = smov 8  }
   0x7   :  { %s9784_s29 = sld [smem:[%s10896_s0 + %s9707_s26]]   ;;  %s9710_s10 = smov 9  }
   0x8   :  { %s9789_s3 = sld [smem:[%s10896_s0 + %s9708_s30]]   ;;  %s9711_s15 = smov 10  }
   0x9   :  { %s9794_s8 = sld [smem:[%s10896_s0 + %s9709_s4]]   ;;  %s9712_s20 = smov 11  }
   0xa   :  { %s9799_s14 = sld [smem:[%s10896_s0 + %s9710_s10]]   ;;  %s9713_s26 = smov 12  }
   0xb   :  { %s9804_s19 = sld [smem:[%s10896_s0 + %s9711_s15]]   ;;  %s9714_s1 = smov 13  }
   0xc   :  { %s9809_s24 = sld [smem:[%s10896_s0 + %s9712_s20]]   ;;  %s9715_s7 = smov 14  }
   0xd   :  { %s9814_s30 = sld [smem:[%s10896_s0 + %s9713_s26]]   ;;  %s9716_s15 = smov 15  }
   0xe   :  { %s9819_s6 = sld [smem:[%s10896_s0 + %s9714_s1]]   ;;  %s9717_s22 = smov 16  }
   0xf   :  { %s9824_s12 = sld [smem:[%s10896_s0 + %s9715_s7]]   ;;  %s9718_s28 = smov 17  }
  0x10   :  { %s9829_s20 = sld [smem:[%s10896_s0 + %s9716_s15]]   ;;  %s9719_s7 = smov 18  }
  0x11   :  { %s9834_s27 = sld [smem:[%s10896_s0 + %s9717_s22]]   ;;  %s9720_s15 = smov 19  }
  0x12   :  { %s9839_s4 = sld [smem:[%s10896_s0 + %s9718_s28]]   ;;  %s9721_s22 = smov 20  }
  0x13   :  { %s9722_s28 = smov 21  }
  0x14   :  { %10901 = sst [smem:[#allocation5_spill]] %s9819_s6 }
  0x15   :  { %10902 = sst [smem:[#allocation6_spill]] %s9824_s12 }
  0x16   :  { %s9844_s12 = sld [smem:[%s10896_s0 + %s9719_s7]]   ;;  %s9723_s7 = smov 22  }
  0x17   :  { %10903 = sst [smem:[#allocation7_spill]] %s9834_s27 }
  0x18   :  { %10904 = sst [smem:[#allocation8_spill]] %s9839_s4 }
  0x19   :  { %s9849_s6 = sld [smem:[%s10896_s0 + %s9720_s15]]   ;;  %s9724_s15 = smov 23  }
  0x1a   :  { %s9854_s27 = sld [smem:[%s10896_s0 + %s9721_s22]]   ;;  %s9725_s22 = smov 24  }
  0x1b   :  { %s9859_s4 = sld [smem:[%s10896_s0 + %s9722_s28]]   ;;  %s9726_s28 = smov 25  }
  0x1c   :  { %10905 = sst [smem:[#allocation9_spill]] %s9844_s12 }
  0x1d   :  { %s9864_s12 = sld [smem:[%s10896_s0 + %s9723_s7]]   ;;  %s9727_s7 = smov 26  }
  0x1f   :  { %10906 = sst [smem:[#allocation10_spill]] %s9849_s6 }
  0x20   :  { %10907 = sst [smem:[#allocation11_spill]] %s9854_s27 }
  0x21   :  { %10908 = sst [smem:[#allocation12_spill]] %s9859_s4 }
  0x22   :  { %s9869_s6 = sld [smem:[%s10896_s0 + %s9724_s15]]   ;;  %s9728_s15 = smov 27  }
  0x23   :  { %10909 = sst [smem:[#allocation13_spill]] %s9864_s12 }
  0x24   :  { %s9874_s27 = sld [smem:[%s10896_s0 + %s9725_s22]]   ;;  %s9729_s22 = smov 28  }
  0x25   :  { %s9879_s4 = sld [smem:[%s10896_s0 + %s9726_s28]]   ;;  %s9730_s28 = smov 29  }
  0x26   :  { %s9884_s12 = sld [smem:[%s10896_s0 + %s9727_s7]]  }
  0x28   :  { %10910 = sst [smem:[#allocation14_spill]] %s9869_s6 }
  0x29   :  { %s9889_s6 = sld [smem:[%s10896_s0 + %s9728_s15]]  }
  0x2a   :  { %10911 = sst [smem:[#allocation15_spill]] %s9874_s27 }
  0x2b   :  { %10912 = sst [smem:[#allocation16_spill]] %s9879_s4 }
  0x2c   :  { %s9894_s27 = sld [smem:[%s10896_s0 + %s9729_s22]]  }
  0x2d   :  { %s9899_s4 = sld [smem:[%s10896_s0 + %s9730_s28]]  }
  0x2e   :  { %v9335_v0 = vld [vmem:[%s9759_s9] sm:$0xff]   ;;  %v9731_v1 = vmov 0.0   ;;  %v125_v3 = vld [vmem:[%s9754_s5 + $0x8] sm:$0xff]  ;;  %vm142_vm0 = vcmask 130048   ;;  %vm9732_vm1 = vmmov 0  }
  0x2f   :  { %9005 = vmatprep.subr.bf16.mxu0 %v9731_v1  ;;  %v124_v2 = vld [vmem:[%s9754_s5] sm:$0xff]  ;;  %9011 = vmatprep.subr.bf16.mxu1 %v9731_v1  ;;  %v9337_v6 = vld [vmem:[%s9769_s17 + $0x8] sm:$0xff]  }
  0x30   :  { %9006 = vmatpush3.bf16.msra.mxu0 %v9335_v0  ;;  %9007 = vmatprep.mubr.msk.bf16.mxu0 %vm9732_vm1, %v9731_v1  ;;  %v126_v4 = vpack.c.bf16 %v125_v3, %v124_v2  ;;  %v9336_v5 = vld [vmem:[%s9769_s17] sm:$0xff]  }
  0x31   :  { %9015 = vmatprep.mubr.msk.bf16.mxu1 %vm9732_vm1, %v9731_v1  ;;  %9019 = vmatprep.subr.mxu0 %v9731_v1 }
  0x32   :  { %9012 = vmatpush3.bf16.msra.mxu1 %v9336_v5 }
  0x33   :  { %9008 = vmatmul.mubr.msk.bf16.vlgmr.msra.gmra.mrb[0].mxu0 %vm142_vm0, %v126_v4  ;;  %9013 = vmatprep.subr.bf16.mxu1 %v9731_v1 }
  0x34   :  { %9021 = vmatprep.mubr.msk.f32.mxu0 %vm9732_vm1, %v9731_v1 }
  0x36   :  { %9014 = vmatpush3.bf16.msra.mxu1 %v9337_v6 }
  0x37   :  { %9029 = vmatprep.subr.mxu1 %v9731_v1 }
  0x38   :  { %64 = vsyncpa [#allocation3], 0  ;;  %v8119_v7 = vld [vmem:[%s9764_s13] ss:$0 sm:$0xff]  ;;  %vm211_vm2 = vcmask 261120   ;;  %s9733_s0 = smov 96  }
  0x39   :  { %v8122_v15 = vld [vmem:[%s9774_s21] ss:$0 sm:$0xff]  ;;  %s9734_s5 = smov 120   ;;  %s9735_s9 = smov 88   ;;  %vm265_vm3 = vcmask 64512   ;;  %vm598_vm4 = vcmask 1043456  }
  0x3a   :  { %s9736_s13 = smov 56   ;;  %s9737_s17 = smov 64   ;;  %v259_v42 = vld [vmem:[%s9779_s25 + $0x4] sm:$0xf]  ;;  %v258_v52 = vld [vmem:[%s9779_s25] sm:$0xf] }
  0x3b   :  { %s9738_s21 = smov 80   ;;  %s9739_s7 = smov 112   ;;  %v9966_v43 = vsel %vm598_vm4, %v259_v42, 0  ;;  %v9980_v53 = vsel %vm598_vm4, %v258_v52, 0  ;;  %vm8005_vm5 = vcmask 1040384   ;;  %vm8074_vm6 = vcmask 25600  }
  0x3c   :  { %s9740_s10 = smov 72   ;;  %s9741_s11 = smov 104  }
  0x3d   :  { %s9742_s15 = smov 48   ;;  %s9743_s16 = smov 40  }
  0x3e   :  { %s10922_s18 = sld [smem:[#allocation13_spill]]  ;;  %s10923_s22 = sld [smem:[#allocation15_spill]] }
  0x3f   :  { %s10924_s23 = sld [smem:[#allocation16_spill]] }
 0x106   :  { %v180_v8 = vpop.f32.mrb[0].mxu0 }
 0x107   :  { %v9009_v9 = vpop.f32.mrb[1].mxu0  ;;  %v9918_v11 = vadd.f32 %v8119_v7, %v180_v8 }
 0x108   :  { %v183_v10 = vpop.f32.mrb[2].mxu0 }
 0x109   :  { %v9920_v12 = vadd.f32 %v8119_v7, %v183_v10  ;;  %v9010_v13 = vpop.f32.mrb[3].mxu0 }
 0x10b   :  { %v187_v14 = vpack.c.bf16 %v9920_v12, %v9918_v11 }
 0x10d   :  { %9016 = vmatmul.mubr.msk.bf16.vlgmr.msra.gmra.mrb[0].mxu1 %vm211_vm2, %v187_v14 }
 0x10e   :  { %9031 = vmatprep.mubr.msk.f32.mxu1 %vm9732_vm1, %v9731_v1 }
 0x1e0   :  { %v249_v16 = vpop.f32.mrb[0].mxu1 }
 0x1e1   :  { %v9928_v17 = vadd.f32 %v8122_v15, %v249_v16  ;;  %v9017_v18 = vpop.f32.mrb[1].mxu1 }
 0x1e2   :  { %v252_v19 = vpop.f32.mrb[2].mxu1 }
 0x1e3   :  { %v9930_v20 = vadd.f32 %v8122_v15, %v252_v19  ;;  %263 = vrot.lane.b32.xlu0 %v9928_v17, %s9733_s0  ;;  %v9018_v21 = vpop.f32.mrb[3].mxu1  ;;  %v9935_v22 = vmul.f32 0.35355338, %v9928_v17 }
 0x1e5   :  { %429 = vrot.lane.b32.xlu1 %v9935_v22, %s9734_s5 }
 0x1e7   :  { %431 = vrot.lane.b32.xlu0 %v9928_v17, %s9735_s9 }
 0x255   :  { %v264_v23 = vpop.permute.xlu0 %263 }
 0x256   :  { %9020 = vmatpush3.xpose.msk.msra.mxu0 %vm265_vm3, %v264_v23 }
 0x257   :  { %9024 = vmatprep.subr.mxu0 %v9731_v1  ;;  %v430_v25 = vpop.permute.xlu1 %429 }
 0x259   :  { %v432_v24 = vpop.permute.xlu0 %431  ;;  %9022 = vmatmul.mubr.msk.f32.vlgmr.msra.gmra.mrb[4].mxu0 %vm265_vm3, %v9935_v22 }
 0x25a   :  { %9030 = vmatpush3.xpose.msk.msra.mxu1 %vm265_vm3, %v432_v24  ;;  %9026 = vmatprep.mubr.msk.f32.mxu0 %vm9732_vm1, %v9731_v1 }
 0x25b   :  { %9039 = vmatprep.subr.bf16.mxu1 %v9731_v1 }
 0x25d   :  { %9032 = vmatmul.mubr.msk.f32.vlgmr.msra.gmra.mrb[4].mxu1 %vm265_vm3, %v430_v25 }
 0x25e   :  { %9041 = vmatprep.mubr.msk.bf16.mxu1 %vm9732_vm1, %v9731_v1  ;;  %9040 = vmatpush3.bf16.msra.mxu1 %v9966_v43 }
 0x25f   :  { %9051 = vmatprep.subr.mxu1 %v9731_v1 }
 0x32c   :  { %v337_v26 = vpop.f32.mrb[4].mxu0 }
 0x32d   :  { %v9023_v27 = vpop.f32.mrb[5].mxu0  ;;  %v341_v28 = vsel %vm265_vm3, %v337_v26, -inf }
 0x32e   :  { %342 = vmax.xlane.f32.xlu1 %v341_v28 }
 0x330   :  { %v503_v29 = vpop.f32.mrb[4].mxu1 }
 0x331   :  { %v9033_v30 = vpop.f32.mrb[5].mxu1  ;;  %v507_v31 = vsel %vm265_vm3, %v503_v29, -inf }
 0x332   :  { %508 = vmax.xlane.f32.xlu0 %v507_v31 }
 0x3bb   :  { %v343_v32 = vpop.xlane.xlu1 %342 }
 0x3bc   :  { %v344_v33 = vsub.f32 %v337_v26, %v343_v32  ;;  %v260_v26 = vld [vmem:[%s9779_s25 + $0x8] sm:$0xf] }
 0x3bd   :  { %v10016_v27 = vsel %vm598_vm4, %v260_v26, 0 }
 0x3be   :  { %v345_v34 = vmul.f32 1.442695, %v344_v33 }
 0x3bf   :  { %v509_v35 = vpop.xlane.xlu0 %508 }
 0x3c0   :  { %9598 = vpow2.f32 %v345_v34  ;;  %v510_v36 = vsub.f32 %v503_v29, %v509_v35 }
 0x3c2   :  { %v511_v37 = vmul.f32 1.442695, %v510_v36 }
 0x3c4   :  { %9600 = vpow2.f32 %v511_v37 }
 0x3ca   :  { %v9599_v38 = vpop.eup %9598 }
 0x3cb   :  { %v347_v39 = vsel %vm265_vm3, %v9599_v38, 0.0 }
 0x3cc   :  { %348 = vadd.xlane.f32.xlu0 %v347_v39 }
 0x3ce   :  { %v9601_v40 = vpop.eup %9600 }
 0x3cf   :  { %v513_v41 = vsel %vm265_vm3, %v9601_v40, 0.0 }
 0x3d0   :  { %514 = vadd.xlane.f32.xlu1 %v513_v41 }
 0x3e1   :  { %518 = vrot.lane.b32.xlu1 %v9928_v17, %s9736_s13 }
 0x3e2   :  { %352 = vrot.lane.b32.xlu0 %v9928_v17, %s9737_s17 }
 0x3e5   :  { %690 = vrot.lane.b32.xlu1 %v9928_v17, %s9738_s21 }
 0x3e6   :  { %688 = vrot.lane.b32.xlu0 %v9935_v22, %s9739_s7 }
 0x459   :  { %v349_v44 = vpop.xlane.xlu0 %348 }
 0x45a   :  { %9602 = vrcp.f32 %v349_v44 }
 0x45d   :  { %v353_v45 = vpop.permute.xlu0 %352  ;;  %v515_v46 = vpop.xlane.xlu1 %514 }
 0x45e   :  { %9604 = vrcp.f32 %v515_v46  ;;  %9025 = vmatpush3.msra.mxu0 %v353_v45 }
 0x45f   :  { %9034 = vmatprep.subr.mxu0 %v9731_v1 }
 0x461   :  { %v519_v49 = vpop.permute.xlu1 %518  ;;  %v689_v61 = vpop.permute.xlu0 %688 }
 0x464   :  { %v9603_v47 = vpop.eup %9602 }
 0x465   :  { %v351_v48 = vmul.f32 %v9603_v47, %v9599_v38  ;;  %v691_v60 = vpop.permute.xlu1 %690 }
 0x467   :  { %9027 = vmatmul.mubr.msk.f32.vlgmr.msra.gmra.mrb[6].mxu0 %vm265_vm3, %v351_v48 }
 0x468   :  { %v9605_v50 = vpop.eup %9604  ;;  %9035 = vmatpush3.msra.mxu0 %v519_v49  ;;  %9036 = vmatprep.mubr.msk.f32.mxu0 %vm9732_vm1, %v9731_v1 }
 0x469   :  { %v517_v51 = vmul.f32 %v9605_v50, %v9601_v40  ;;  %9045 = vmatprep.subr.bf16.mxu0 %v9731_v1  ;;  %v261_v40 = vld [vmem:[%s9779_s25 + $0xc] sm:$0xf]  ;;  %s10913_s25 = sld [smem:[#allocation5_spill]] }
 0x46a   :  { %v10039_v41 = vsel %vm598_vm4, %v261_v40, 0 }
 0x46b   :  { %9037 = vmatmul.mubr.msk.f32.vlgmr.msra.gmra.mrb[8].mxu0 %vm265_vm3, %v517_v51 }
 0x46c   :  { %9047 = vmatprep.mubr.msk.bf16.mxu0 %vm9732_vm1, %v9731_v1  ;;  %9046 = vmatpush3.bf16.msra.mxu0 %v9980_v53 }
 0x46d   :  { %9056 = vmatprep.subr.mxu0 %v9731_v1 }
 0x53a   :  { %v424_v54 = vpop.f32.mrb[6].mxu0 }
 0x53b   :  { %v428_v55 = vpack.c.bf16 %v424_v54, %v424_v54  ;;  %v9028_v56 = vpop.f32.mrb[7].mxu0 }
 0x53d   :  { %9048 = vmatmul.mubr.msk.bf16.vlgmr.msra.gmra.mrb[12].mxu0 %vm265_vm3, %v428_v55 }
 0x53e   :  { %v590_v57 = vpop.f32.mrb[8].mxu0  ;;  %9058 = vmatprep.mubr.msk.f32.mxu0 %vm9732_vm1, %v9731_v1 }
 0x53f   :  { %v594_v58 = vpack.c.bf16 %v590_v57, %v590_v57  ;;  %v9038_v59 = vpop.f32.mrb[9].mxu0 }
 0x541   :  { %9042 = vmatmul.mubr.msk.bf16.vlgmr.msra.gmra.mrb[8].mxu1 %vm265_vm3, %v594_v58 }
 0x542   :  { %9052 = vmatpush3.xpose.msk.msra.mxu1 %vm265_vm3, %v691_v60  ;;  %9053 = vmatprep.mubr.msk.f32.mxu1 %vm9732_vm1, %v9731_v1 }
 0x543   :  { %9061 = vmatprep.subr.bf16.mxu1 %v9731_v1 }
 0x549   :  { %9054 = vmatmul.mubr.msk.f32.vlgmr.msra.gmra.mrb[6].mxu1 %vm265_vm3, %v689_v61 }
 0x54a   :  { %9063 = vmatprep.mubr.msk.bf16.mxu1 %vm9732_vm1, %v9731_v1  ;;  %9062 = vmatpush3.bf16.msra.mxu1 %v10016_v27 }
 0x54b   :  { %9077 = vmatprep.subr.bf16.mxu1 %v9731_v1 }
 0x610   :  { %v682_v62 = vpop.f32.mrb[12].mxu0 }
 0x611   :  { %v9049_v63 = vpop.f32.mrb[13].mxu0 }
 0x612   :  { %v685_v0 = vpop.f32.mrb[14].mxu0 }
 0x613   :  { %v9050_v2 = vpop.f32.mrb[15].mxu0 }
 0x614   :  { %v636_v3 = vpop.f32.mrb[8].mxu1 }
 0x615   :  { %v9995_v4 = vadd.f32 %v682_v62, %v636_v3  ;;  %v9043_v5 = vpop.f32.mrb[9].mxu1 }
 0x616   :  { %v639_v6 = vpop.f32.mrb[10].mxu1 }
 0x617   :  { %v9044_v7 = vpop.f32.mrb[11].mxu1 }
 0x61c   :  { %v762_v8 = vpop.f32.mrb[6].mxu1 }
 0x61d   :  { %v9055_v9 = vpop.f32.mrb[7].mxu1  ;;  %v766_v10 = vsel %vm265_vm3, %v762_v8, -inf }
 0x61e   :  { %767 = vmax.xlane.f32.xlu1 %v766_v10 }
 0x62f   :  { %903 = vrot.lane.b32.xlu1 %v9928_v17, %s9740_s10 }
 0x633   :  { %901 = vrot.lane.b32.xlu1 %v9935_v22, %s9741_s11 }
 0x6ab   :  { %v768_v13 = vpop.xlane.xlu1 %767 }
 0x6ac   :  { %v769_v14 = vsub.f32 %v762_v8, %v768_v13 }
 0x6ae   :  { %v770_v15 = vmul.f32 1.442695, %v769_v14 }
 0x6af   :  { %v904_v23 = vpop.permute.xlu1 %903 }
 0x6b0   :  { %9606 = vpow2.f32 %v770_v15 }
 0x6b3   :  { %v902_v25 = vpop.permute.xlu1 %901 }
 0x6ba   :  { %v9607_v16 = vpop.eup %9606 }
 0x6bb   :  { %v772_v18 = vsel %vm265_vm3, %v9607_v16, 0.0 }
 0x6bc   :  { %773 = vadd.xlane.f32.xlu0 %v772_v18 }
 0x6d2   :  { %777 = vrot.lane.b32.xlu0 %v9928_v17, %s9742_s15 }
 0x749   :  { %v774_v19 = vpop.xlane.xlu0 %773 }
 0x74a   :  { %9608 = vrcp.f32 %v774_v19 }
 0x74d   :  { %v778_v21 = vpop.permute.xlu0 %777 }
 0x74e   :  { %9057 = vmatpush3.msra.mxu0 %v778_v21 }
 0x74f   :  { %9067 = vmatprep.subr.mxu0 %v9731_v1 }
 0x754   :  { %v9609_v22 = vpop.eup %9608 }
 0x755   :  { %v776_v24 = vmul.f32 %v9609_v22, %v9607_v16 }
 0x757   :  { %9059 = vmatmul.mubr.msk.f32.vlgmr.msra.gmra.mrb[10].mxu0 %vm265_vm3, %v776_v24 }
 0x758   :  { %9068 = vmatpush3.xpose.msk.msra.mxu0 %vm265_vm3, %v904_v23  ;;  %9069 = vmatprep.mubr.msk.f32.mxu0 %vm9732_vm1, %v9731_v1 }
 0x759   :  { %9072 = vmatprep.subr.mxu0 %v9731_v1 }
 0x75b   :  { %9070 = vmatmul.mubr.msk.f32.vlgmr.msra.gmra.mrb[16].mxu0 %vm265_vm3, %v902_v25 }
 0x75c   :  { %9074 = vmatprep.mubr.msk.f32.mxu0 %vm9732_vm1, %v9731_v1 }
 0x82a   :  { %v849_v28 = vpop.f32.mrb[10].mxu0 }
 0x82b   :  { %v853_v29 = vpack.c.bf16 %v849_v28, %v849_v28  ;;  %v9060_v30 = vpop.f32.mrb[11].mxu0 }
 0x82d   :  { %9064 = vmatmul.mubr.msk.bf16.vlgmr.msra.gmra.mrb[12].mxu1 %vm265_vm3, %v853_v29 }
 0x82e   :  { %v975_v31 = vpop.f32.mrb[16].mxu0  ;;  %9079 = vmatprep.mubr.msk.bf16.mxu1 %vm9732_vm1, %v9731_v1  ;;  %9078 = vmatpush3.bf16.msra.mxu1 %v10039_v41 }
 0x82f   :  { %v9071_v32 = vpop.f32.mrb[17].mxu0  ;;  %v979_v33 = vsel %vm265_vm3, %v975_v31, -inf  ;;  %9093 = vmatprep.subr.mxu1 %v9731_v1 }
 0x830   :  { %980 = vmax.xlane.f32.xlu0 %v979_v33 }
 0x846   :  { %990 = vrot.lane.b32.xlu0 %v9928_v17, %s9743_s16  ;;  %v10033_v17 = vmul.f32 0.35355338, %v9930_v20 }
 0x84a   :  { %1282 = vrot.lane.b32.xlu0 %v9930_v20, %s9735_s9 }
 0x8bd   :  { %v981_v34 = vpop.xlane.xlu0 %980 }
 0x8be   :  { %v982_v35 = vsub.f32 %v975_v31, %v981_v34 }
 0x8c0   :  { %v983_v36 = vmul.f32 1.442695, %v982_v35 }
 0x8c1   :  { %v991_v37 = vpop.permute.xlu0 %990 }
 0x8c2   :  { %9610 = vpow2.f32 %v983_v36  ;;  %9073 = vmatpush3.msra.mxu0 %v991_v37 }
 0x8c3   :  { %9083 = vmatprep.subr.mxu0 %v9731_v1 }
 0x8c5   :  { %v1283_v56 = vpop.permute.xlu0 %1282 }
 0x8cc   :  { %v9611_v38 = vpop.eup %9610 }
 0x8cd   :  { %v985_v39 = vsel %vm265_vm3, %v9611_v38, 0.0 }
 0x8ce   :  { %986 = vadd.xlane.f32.xlu1 %v985_v39 }
 0x8df   :  { %1115 = vrot.lane.b32.xlu1 %v9930_v20, %s9733_s0 }
 0x8e3   :  { %1280 = vrot.lane.b32.xlu1 %v10033_v17, %s9734_s5 }
 0x900   :  { %v894_v42 = vpop.f32.mrb[12].mxu1 }
 0x901   :  { %v900_v44 = vadd.f32 %v894_v42, %v9995_v4  ;;  %v9065_v45 = vpop.f32.mrb[13].mxu1 }
 0x902   :  { %v897_v46 = vpop.f32.mrb[14].mxu1 }
 0x903   :  { %v9066_v47 = vpop.f32.mrb[15].mxu1 }
 0x95b   :  { %v987_v48 = vpop.xlane.xlu1 %986 }
 0x95c   :  { %9612 = vrcp.f32 %v987_v48 }
 0x95f   :  { %v1116_v51 = vpop.permute.xlu1 %1115 }
 0x963   :  { %v1281_v60 = vpop.permute.xlu1 %1280 }
 0x966   :  { %v9613_v49 = vpop.eup %9612 }
 0x967   :  { %v989_v50 = vmul.f32 %v9613_v49, %v9611_v38 }
 0x969   :  { %9075 = vmatmul.mubr.msk.f32.vlgmr.msra.gmra.mrb[18].mxu0 %vm265_vm3, %v989_v50 }
 0x96a   :  { %9084 = vmatpush3.xpose.msk.msra.mxu0 %vm265_vm3, %v1116_v51  ;;  %9085 = vmatprep.mubr.msk.f32.mxu0 %vm9732_vm1, %v9731_v1 }
 0x96b   :  { %9088 = vmatprep.subr.mxu0 %v9731_v1 }
 0x96d   :  { %9086 = vmatmul.mubr.msk.f32.vlgmr.msra.gmra.mrb[20].mxu0 %vm265_vm3, %v10033_v17 }
 0x96e   :  { %9090 = vmatprep.mubr.msk.f32.mxu0 %vm9732_vm1, %v9731_v1 }
 0xa3c   :  { %v1062_v52 = vpop.f32.mrb[18].mxu0 }
 0xa3d   :  { %v1066_v54 = vpack.c.bf16 %v1062_v52, %v1062_v52  ;;  %v9076_v55 = vpop.f32.mrb[19].mxu0 }
 0xa3f   :  { %9080 = vmatmul.mubr.msk.bf16.vlgmr.msra.gmra.mrb[16].mxu1 %vm265_vm3, %v1066_v54 }
 0xa40   :  { %9094 = vmatpush3.xpose.msk.msra.mxu1 %vm265_vm3, %v1283_v56  ;;  %v1188_v57 = vpop.f32.mrb[20].mxu0  ;;  %9095 = vmatprep.mubr.msk.f32.mxu1 %vm9732_vm1, %v9731_v1 }
 0xa41   :  { %v9087_v58 = vpop.f32.mrb[21].mxu0  ;;  %v1192_v59 = vsel %vm265_vm3, %v1188_v57, -inf  ;;  %9103 = vmatprep.subr.bf16.mxu1 %v9731_v1 }
 0xa42   :  { %1193 = vmax.xlane.f32.xlu0 %v1192_v59  ;;  %v8158_v59 = vld [vmem:[%s9784_s29] ss:$0 sm:$0xff]  ;;  %s10914_s29 = sld [smem:[#allocation6_spill]] }
 0xa47   :  { %9096 = vmatmul.mubr.msk.f32.vlgmr.msra.gmra.mrb[20].mxu1 %vm265_vm3, %v1281_v60 }
 0xa48   :  { %9104 = vmatpush3.bf16.msra.mxu1 %v9966_v43  ;;  %9105 = vmatprep.mubr.msk.bf16.mxu1 %vm9732_vm1, %v9731_v1 }
 0xa49   :  { %9115 = vmatprep.subr.mxu1 %v9731_v1 }
 0xacf   :  { %v1194_v61 = vpop.xlane.xlu0 %1193 }
 0xad0   :  { %v1195_v62 = vsub.f32 %v1188_v57, %v1194_v61 }
 0xad2   :  { %v1196_v63 = vmul.f32 1.442695, %v1195_v62 }
 0xad4   :  { %9614 = vpow2.f32 %v1196_v63 }
 0xade   :  { %v9615_v0 = vpop.eup %9614 }
 0xadf   :  { %v1198_v2 = vsel %vm265_vm3, %v9615_v0, 0.0 }
 0xae0   :  { %1199 = vadd.xlane.f32.xlu0 %v1198_v2 }
 0xb12   :  { %v1107_v3 = vpop.f32.mrb[16].mxu1 }
 0xb13   :  { %v10065_v4 = vadd.f32 %v1107_v3, %v900_v44  ;;  %v9081_v5 = vpop.f32.mrb[17].mxu1 }
 0xb14   :  { %v1110_v6 = vpop.f32.mrb[18].mxu1 }
 0xb15   :  { %v9082_v7 = vpop.f32.mrb[19].mxu1  ;;  %v1959_v61 = vadd.f32 %v8158_v59, %v10065_v4 }
 0xb17   :  { %v1961_v5 = vadd.f32 %v1959_v61, %v9918_v11 }
 0xb19   :  { %v1963_v6 = vsel %vm211_vm2, %v1961_v5, 0.0 }
 0xb1a   :  { %v1354_v43 = vpop.f32.mrb[20].mxu1 }
 0xb1b   :  { %v9097_v8 = vpop.f32.mrb[21].mxu1  ;;  %v1358_v9 = vsel %vm265_vm3, %v1354_v43, -inf }
 0xb1c   :  { %1359 = vmax.xlane.f32.xlu1 %v1358_v9 }
 0xb2d   :  { %1203 = vrot.lane.b32.xlu1 %v9930_v20, %s9737_s17 }
 0xb31   :  { %1534 = vrot.lane.b32.xlu1 %v9930_v20, %s9738_s21 }
 0xb35   :  { %1532 = vrot.lane.b32.xlu1 %v10033_v17, %s9739_s7 }
 0xb6d   :  { %v1200_v10 = vpop.xlane.xlu0 %1199 }
 0xb6e   :  { %9616 = vrcp.f32 %v1200_v10 }
 0xb78   :  { %v9617_v14 = vpop.eup %9616 }
 0xb79   :  { %v1202_v18 = vmul.f32 %v9617_v14, %v9615_v0 }
 0xba9   :  { %v1360_v13 = vpop.xlane.xlu1 %1359 }
 0xbaa   :  { %v1361_v15 = vsub.f32 %v1354_v43, %v1360_v13 }
 0xbac   :  { %v1362_v16 = vmul.f32 1.442695, %v1361_v15 }
 0xbad   :  { %v1204_v19 = vpop.permute.xlu1 %1203 }
 0xbae   :  { %9618 = vpow2.f32 %v1362_v16  ;;  %9089 = vmatpush3.msra.mxu0 %v1204_v19 }
 0xbaf   :  { %9091 = vmatmul.mubr.msk.f32.vlgmr.msra.gmra.mrb[22].mxu0 %vm265_vm3, %v1202_v18  ;;  %9098 = vmatprep.subr.mxu0 %v9731_v1 }
 0xbb0   :  { %9100 = vmatprep.mubr.msk.f32.mxu0 %vm9732_vm1, %v9731_v1 }
 0xbb1   :  { %v1535_v34 = vpop.permute.xlu1 %1534 }
 0xbb8   :  { %v9619_v21 = vpop.eup %9618 }
 0xbb9   :  { %v1364_v22 = vsel %vm265_vm3, %v9619_v21, 0.0 }
 0xbba   :  { %1365 = vadd.xlane.f32.xlu0 %v1364_v22 }
 0xbd0   :  { %1369 = vrot.lane.b32.xlu0 %v9930_v20, %s9736_s13 }
 0xc47   :  { %v1366_v23 = vpop.xlane.xlu0 %1365 }
 0xc48   :  { %9620 = vrcp.f32 %v1366_v23 }
 0xc4b   :  { %v1370_v24 = vpop.permute.xlu0 %1369 }
 0xc4c   :  { %9099 = vmatpush3.msra.mxu0 %v1370_v24 }
 0xc4d   :  { %9109 = vmatprep.subr.bf16.mxu0 %v9731_v1 }
 0xc52   :  { %v9621_v25 = vpop.eup %9620 }
 0xc53   :  { %v1368_v26 = vmul.f32 %v9621_v25, %v9619_v21 }
 0xc55   :  { %9101 = vmatmul.mubr.msk.f32.vlgmr.msra.gmra.mrb[24].mxu0 %vm265_vm3, %v1368_v26 }
 0xc56   :  { %9110 = vmatpush3.bf16.msra.mxu0 %v9980_v53  ;;  %9111 = vmatprep.mubr.msk.bf16.mxu0 %vm9732_vm1, %v9731_v1  ;;  %v1533_v53 = vpop.permute.xlu1 %1532 }
 0xc57   :  { %9120 = vmatprep.subr.mxu0 %v9731_v1 }
 0xc82   :  { %v1275_v28 = vpop.f32.mrb[22].mxu0 }
 0xc83   :  { %v1279_v29 = vpack.c.bf16 %v1275_v28, %v1275_v28  ;;  %v9092_v30 = vpop.f32.mrb[23].mxu0 }
 0xc85   :  { %9112 = vmatmul.mubr.msk.bf16.vlgmr.msra.gmra.mrb[28].mxu0 %vm265_vm3, %v1279_v29 }
 0xc86   :  { %9122 = vmatprep.mubr.msk.f32.mxu0 %vm9732_vm1, %v9731_v1 }
 0xd28   :  { %v1441_v31 = vpop.f32.mrb[24].mxu0 }
 0xd29   :  { %v1445_v32 = vpack.c.bf16 %v1441_v31, %v1441_v31  ;;  %v9102_v33 = vpop.f32.mrb[25].mxu0 }
 0xd2b   :  { %9106 = vmatmul.mubr.msk.bf16.vlgmr.msra.gmra.mrb[24].mxu1 %vm265_vm3, %v1445_v32 }
 0xd2c   :  { %9116 = vmatpush3.xpose.msk.msra.mxu1 %vm265_vm3, %v1535_v34  ;;  %9117 = vmatprep.mubr.msk.f32.mxu1 %vm9732_vm1, %v9731_v1 }
 0xd2d   :  { %9125 = vmatprep.subr.bf16.mxu1 %v9731_v1 }
 0xd33   :  { %9118 = vmatmul.mubr.msk.f32.vlgmr.msra.gmra.mrb[22].mxu1 %vm265_vm3, %v1533_v53 }
 0xd34   :  { %9126 = vmatpush3.bf16.msra.mxu1 %v10016_v27  ;;  %9127 = vmatprep.mubr.msk.bf16.mxu1 %vm9732_vm1, %v9731_v1 }
 0xd35   :  { %9141 = vmatprep.subr.bf16.mxu1 %v9731_v1 }
 0xd58   :  { %v1526_v35 = vpop.f32.mrb[28].mxu0 }
 0xd59   :  { %v9113_v36 = vpop.f32.mrb[29].mxu0 }
 0xd5a   :  { %v1529_v37 = vpop.f32.mrb[30].mxu0 }
 0xd5b   :  { %v9114_v38 = vpop.f32.mrb[31].mxu0 }
 0xdfe   :  { %v1483_v39 = vpop.f32.mrb[24].mxu1 }
 0xdff   :  { %v1527_v40 = vadd.f32 %v1526_v35, %v1483_v39  ;;  %v9107_v42 = vpop.f32.mrb[25].mxu1 }
 0xe00   :  { %v1486_v44 = vpop.f32.mrb[26].mxu1  ;;  %v2009_v42 = vld [vmem:[%s9799_s14] sm:$0xff] }
 0xe01   :  { %v9108_v45 = vpop.f32.mrb[27].mxu1  ;;  %v2010_v44 = vld [vmem:[%s9799_s14 + $0x8] sm:$0xff] }
 0xe06   :  { %v1606_v46 = vpop.f32.mrb[22].mxu1 }
 0xe07   :  { %v9119_v47 = vpop.f32.mrb[23].mxu1  ;;  %v1610_v48 = vsel %vm265_vm3, %v1606_v46, -inf }
 0xe08   :  { %1611 = vmax.xlane.f32.xlu0 %v1610_v48 }
 0xe1e   :  { %1621 = vrot.lane.b32.xlu0 %v9930_v20, %s9742_s15 }
 0xe22   :  { %1742 = vrot.lane.b32.xlu0 %v10033_v17, %s9741_s11 }
 0xe95   :  { %v1612_v27 = vpop.xlane.xlu0 %1611 }
 0xe96   :  { %v1613_v49 = vsub.f32 %v1606_v46, %v1612_v27  ;;  %v2012_v46 = vld [vmem:[%s9799_s14 + $0x48] sm:$0xff] }
 0xe97   :  { %v8163_v48 = vcombine.low %v2010_v44, %v2012_v46  ;;  %v8164_v27 = vcombine.high %v2010_v44, %v2012_v46  ;;  %v9353_v44 = vld [vmem:[%s9809_s24 + $0x198] sm:$0xff]   ;;  %v9355_v46 = vld [vmem:[%s9809_s24 + $0x1e0] sm:$0xff]  }
 0xe98   :  { %v1614_v50 = vmul.f32 1.442695, %v1613_v49  ;;  %v2013_v49 = vld [vmem:[%s9799_s14 + $0x80] sm:$0xff] }
 0xe99   :  { %v1622_v51 = vpop.permute.xlu0 %1621 }
 0xe9a   :  { %9622 = vpow2.f32 %v1614_v50  ;;  %9121 = vmatpush3.msra.mxu0 %v1622_v51  ;;  %v2015_v50 = vld [vmem:[%s9799_s14 + $0xc0] sm:$0xff]  ;;  %v2014_v51 = vld [vmem:[%s9799_s14 + $0x88] sm:$0xff] }
 0xe9b   :  { %9131 = vmatprep.subr.mxu0 %v9731_v1 }
 0xe9d   :  { %v1743_v58 = vpop.permute.xlu0 %1742 }
 0xea4   :  { %v9623_v52 = vpop.eup %9622 }
 0xea5   :  { %v1616_v54 = vsel %vm265_vm3, %v9623_v52, 0.0 }
 0xea6   :  { %1617 = vadd.xlane.f32.xlu1 %v1616_v54  ;;  %v2016_v54 = vld [vmem:[%s9799_s14 + $0xc8] sm:$0xff] }
 0xeb7   :  { %1744 = vrot.lane.b32.xlu1 %v9930_v20, %s9740_s10 }
 0xf33   :  { %v1618_v55 = vpop.xlane.xlu1 %1617 }
 0xf34   :  { %9624 = vrcp.f32 %v1618_v55  ;;  %v8165_v55 = vcombine.low %v2013_v49, %v2015_v50 }
 0xf37   :  { %v1745_v57 = vpop.permute.xlu1 %1744 }
 0xf3e   :  { %v9625_v56 = vpop.eup %9624 }
 0xf3f   :  { %v1620_v17 = vmul.f32 %v9625_v56, %v9623_v52  ;;  %v8166_v52 = vcombine.high %v2013_v49, %v2015_v50  ;;  %v8167_v56 = vcombine.low %v2014_v51, %v2016_v54  ;;  %v9359_v49 = vld [vmem:[%s9809_s24 + $0x1e8] sm:$0xff]  }
 0xf40   :  { %v9360_v50 = vld [vmem:[%s9809_s24 + $0x128] sm:$0xff]  }
 0xf41   :  { %9123 = vmatmul.mubr.msk.f32.vlgmr.msra.gmra.mrb[26].mxu0 %vm265_vm3, %v1620_v17  ;;  %v8168_v17 = vcombine.high %v2014_v51, %v2016_v54  ;;  %v9361_v51 = vld [vmem:[%s9809_s24 + $0x1a8] sm:$0xff]   ;;  %v9363_v54 = vld [vmem:[%s9809_s24 + $0x1f0] sm:$0xff]  }
 0xf42   :  { %9132 = vmatpush3.xpose.msk.msra.mxu0 %vm265_vm3, %v1745_v57  ;;  %9133 = vmatprep.mubr.msk.f32.mxu0 %vm9732_vm1, %v9731_v1  ;;  %v2244_v57 = vld [vmem:[%s9799_s14 + $0x10] sm:$0xff] }
 0xf43   :  { %9136 = vmatprep.subr.mxu0 %v9731_v1 }
 0xf45   :  { %9134 = vmatmul.mubr.msk.f32.vlgmr.msra.gmra.mrb[32].mxu0 %vm265_vm3, %v1743_v58  ;;  %v2246_v58 = vld [vmem:[%s9799_s14 + $0x50] sm:$0xff] }
 0xf46   :  { %9138 = vmatprep.mubr.msk.f32.mxu0 %vm9732_vm1, %v9731_v1  ;;  %v8172_v61 = vcombine.high %v2244_v57, %v2246_v58 }
0x1014   :  { %v1693_v60 = vpop.f32.mrb[26].mxu0 }
0x1015   :  { %v1697_v62 = vpack.c.bf16 %v1693_v60, %v1693_v60  ;;  %v9124_v63 = vpop.f32.mrb[27].mxu0  ;;  %v9744_v60 = vmov 0  }
0x1016   :  { %v8171_v63 = vcombine.low %v2244_v57, %v2246_v58  ;;  %v9367_v57 = vld [vmem:[%s9809_s24 + $0x1f8] sm:$0xff]  }
0x1017   :  { %9128 = vmatmul.mubr.msk.bf16.vlgmr.msra.gmra.mrb[28].mxu1 %vm265_vm3, %v1697_v62  ;;  %v2247_v62 = vld [vmem:[%s9799_s14 + $0x58] sm:$0xff] }
0x1018   :  { %v1816_v0 = vpop.f32.mrb[32].mxu0  ;;  %9142 = vmatpush3.bf16.msra.mxu1 %v10039_v41  ;;  %9143 = vmatprep.mubr.msk.bf16.mxu1 %vm9732_vm1, %v9731_v1  ;;  %v9368_v58 = vld [vmem:[%s9809_s24 + $0x138] sm:$0xff]  }
0x1019   :  { %v9135_v2 = vpop.f32.mrb[33].mxu0  ;;  %v1820_v3 = vsel %vm265_vm3, %v1816_v0, -inf  ;;  %2125 = vmatprep.subr.bf16.mxu1 %v8164_v27  ;;  %v9358_v27 = vld [vmem:[%s9809_s24 + $0x168] sm:$0xff]  }
0x101a   :  { %1821 = vmax.xlane.f32.xlu1 %v1820_v3 }
0x101e   :  { %1964 = vadd.xlane.f32.xlu1 %v1963_v6 }
0x10a7   :  { %v1822_v4 = vpop.xlane.xlu1 %1821 }
0x10a8   :  { %v1823_v7 = vsub.f32 %v1816_v0, %v1822_v4 }
0x10aa   :  { %v1824_v43 = vmul.f32 1.442695, %v1823_v7 }
0x10ab   :  { %v1965_v24 = vpop.xlane.xlu1 %1964 }
0x10ac   :  { %9626 = vpow2.f32 %v1824_v43 }
0x10b6   :  { %v9627_v8 = vpop.eup %9626 }
0x10b7   :  { %v1826_v9 = vsel %vm265_vm3, %v9627_v8, 0.0 }
0x10b8   :  { %1827 = vadd.xlane.f32.xlu0 %v1826_v9 }
0x10ce   :  { %1831 = vrot.lane.b32.xlu0 %v9930_v20, %s9743_s16  ;;  %v1970_v20 = vmul.f32 0.03125, %v1965_v24 }
0x10d0   :  { %v1972_v30 = vsub.f32 %v1961_v5, %v1970_v20 }
0x10d2   :  { %v1974_v53 = vmul.f32 %v1972_v30, %v1972_v30 }
0x10d4   :  { %v1976_v35 = vsel %vm211_vm2, %v1974_v53, 0.0  ;;  %v9344_v53 = vld [vmem:[%s9809_s24 + $0x108] sm:$0xff]  }
0x10ea   :  { %v1735_v41 = vpop.f32.mrb[28].mxu1 }
0x10eb   :  { %v1741_v10 = vadd.f32 %v1735_v41, %v1527_v40  ;;  %v9129_v13 = vpop.f32.mrb[29].mxu1  ;;  %v8159_v41 = vld [vmem:[%s9789_s3] ss:$0 sm:$0xff]  ;;  %s10915_s3 = sld [smem:[#allocation7_spill]] }
0x10ec   :  { %v1738_v14 = vpop.f32.mrb[30].mxu1 }
0x10ed   :  { %v9130_v11 = vpop.f32.mrb[31].mxu1 }
0x10ee   :  { %v8160_v11 = vld [vmem:[%s9794_s8] ss:$0 sm:$0xff]  ;;  %s10916_s8 = sld [smem:[#allocation8_spill]] }
0x1145   :  { %v1828_v15 = vpop.xlane.xlu0 %1827 }
0x1146   :  { %9628 = vrcp.f32 %v1828_v15 }
0x1149   :  { %v1832_v16 = vpop.permute.xlu0 %1831 }
0x114a   :  { %9137 = vmatpush3.msra.mxu0 %v1832_v16  ;;  %v2248_v16 = vld [vmem:[%s9799_s14 + $0x90] sm:$0xff] }
0x1150   :  { %v9629_v18 = vpop.eup %9628 }
0x1151   :  { %v1830_v19 = vmul.f32 %v9629_v18, %v9627_v8  ;;  %v2250_v18 = vld [vmem:[%s9799_s14 + $0xd0] sm:$0xff] }
0x1152   :  { %v8176_v20 = vcombine.high %v2248_v16, %v2250_v18 }
0x1153   :  { %9139 = vmatmul.mubr.msk.f32.vlgmr.msra.gmra.mrb[34].mxu0 %vm265_vm3, %v1830_v19  ;;  %v2249_v19 = vld [vmem:[%s9799_s14 + $0x98] sm:$0xff] }
0x1154   :  { %2114 = vmatprep.mubr.bf16.mxu0 %v9744_v60 }
0x1226   :  { %v1903_v21 = vpop.f32.mrb[34].mxu0 }
0x1227   :  { %v1907_v22 = vpack.c.bf16 %v1903_v21, %v1903_v21  ;;  %v9140_v23 = vpop.f32.mrb[35].mxu0  ;;  %v2251_v21 = vld [vmem:[%s9799_s14 + $0xd8] sm:$0xff] }
0x1229   :  { %9144 = vmatmul.mubr.msk.bf16.vlgmr.msra.gmra.mrb[32].mxu1 %vm265_vm3, %v1907_v22 }
0x122a   :  { %2126 = vmatpush1.bf16.msra.mxu1 %v8163_v48  ;;  %2157 = vmatprep.mubr.bf16.mxu1 %v9744_v60  ;;  %v9357_v48 = vld [vmem:[%s9809_s24 + $0x1a0] sm:$0xff]  }
0x122b   :  { %2127 = vmatprep.subr.bf16.mxu1 %v8168_v17  ;;  %v9366_v17 = vld [vmem:[%s9809_s24 + $0x178] sm:$0xff]  }
0x122e   :  { %2128 = vmatpush1.bf16.msra.mxu1 %v8167_v56  ;;  %v9365_v56 = vld [vmem:[%s9809_s24 + $0x1b0] sm:$0xff]  }
0x12fc   :  { %v1945_v25 = vpop.f32.mrb[32].mxu1 }
0x12fd   :  { %v1951_v26 = vadd.f32 %v1945_v25, %v1741_v10  ;;  %v9145_v28 = vpop.f32.mrb[33].mxu1  ;;  %v8178_v25 = vcombine.high %v2249_v19, %v2251_v21 }
0x12fe   :  { %v1948_v29 = vpop.f32.mrb[34].mxu1  ;;  %v8177_v28 = vcombine.low %v2249_v19, %v2251_v21 }
0x12ff   :  { %v1960_v31 = vadd.f32 %v8158_v59, %v1951_v26  ;;  %v9146_v32 = vpop.f32.mrb[35].mxu1  ;;  %v2245_v59 = vld [vmem:[%s9799_s14 + $0x18] sm:$0xff]  ;;  %v8175_v26 = vcombine.low %v2248_v16, %v2250_v18  ;;  %v9338_v29 = vld [vmem:[%s9809_s24 + $0x140] sm:$0xff]  }
0x1300   :  { %v8173_v0 = vcombine.low %v2245_v59, %v2247_v62  ;;  %v8174_v2 = vcombine.high %v2245_v59, %v2247_v62  ;;  %v9341_v32 = vld [vmem:[%s9809_s24 + $0x180] sm:$0xff]   ;;  %v9369_v59 = vld [vmem:[%s9809_s24 + $0x1b8] sm:$0xff]  }
0x1301   :  { %v1962_v33 = vadd.f32 %v1960_v31, %v9920_v12  ;;  %v2011_v12 = vld [vmem:[%s9799_s14 + $0x40] sm:$0xff] }
0x1302   :  { %v8162_v45 = vcombine.high %v2009_v42, %v2011_v12  ;;  %v8161_v47 = vcombine.low %v2009_v42, %v2011_v12  ;;  %2357 = vmatprep.subr.bf16.mxu1 %v8174_v2  ;;  %v9340_v31 = vld [vmem:[%s9809_s24 + $0x100] sm:$0xff]   ;;  %v9351_v42 = vld [vmem:[%s9809_s24 + $0x1d8] sm:$0xff]  }
0x1303   :  { %v1966_v34 = vsel %vm211_vm2, %v1962_v33, 0.0  ;;  %v9352_v12 = vld [vmem:[%s9809_s24 + $0x118] sm:$0xff]   ;;  %v9371_v62 = vld [vmem:[%s9809_s24 + $0xc0] sm:$0xff]  }
0x1304   :  { %1967 = vadd.xlane.f32.xlu1 %v1966_v34  ;;  %2082 = vmatprep.subr.bf16.mxu0 %v8162_v45  ;;  %v9343_v34 = vld [vmem:[%s9809_s24 + $0x1c8] sm:$0xff]   ;;  %v9354_v45 = vld [vmem:[%s9809_s24 + $0x160] sm:$0xff]  }
0x1305   :  { %2083 = vmatpush1.bf16.msra.mxu0 %v8161_v47  ;;  %v9356_v47 = vld [vmem:[%s9809_s24 + $0x120] sm:$0xff]  }
0x1306   :  { %2084 = vmatprep.subr.bf16.mxu0 %v8166_v52  ;;  %v9362_v52 = vld [vmem:[%s9809_s24 + $0x170] sm:$0xff]  }
0x1308   :  { %1977 = vadd.xlane.f32.xlu1 %v1976_v35  ;;  %v9345_v35 = vld [vmem:[%s9809_s24 + $0x188] sm:$0xff]  }
0x1309   :  { %2085 = vmatpush1.bf16.msra.mxu0 %v8165_v55  ;;  %v9364_v55 = vld [vmem:[%s9809_s24 + $0x130] sm:$0xff]  }
0x130a   :  { %2314 = vmatprep.subr.bf16.mxu0 %v8172_v61  ;;  %v9370_v61 = vld [vmem:[%s9809_s24 + $0x40] sm:$0xff]  }
0x1391   :  { %v1968_v36 = vpop.xlane.xlu1 %1967 }
0x1392   :  { %v1971_v37 = vmul.f32 0.03125, %v1968_v36  ;;  %v9346_v36 = vld [vmem:[%s9809_s24 + $0x150] sm:$0xff]  }
0x1394   :  { %v1973_v38 = vsub.f32 %v1962_v33, %v1971_v37  ;;  %v9342_v33 = vld [vmem:[%s9809_s24 + $0x148] sm:$0xff]   ;;  %v9347_v37 = vld [vmem:[%s9809_s24 + $0x1d0] sm:$0xff]  }
0x1395   :  { %v1978_v3 = vpop.xlane.xlu1 %1977 }
0x1396   :  { %v1975_v39 = vmul.f32 %v1973_v38, %v1973_v38  ;;  %v1982_v5 = vmul.f32 0.03125, %v1978_v3 }
0x1398   :  { %v1979_v40 = vsel %vm211_vm2, %v1975_v39, 0.0  ;;  %v1984_v6 = vadd.f32 1e-05, %v1982_v5  ;;  %v9349_v39 = vld [vmem:[%s9809_s24 + $0x190] sm:$0xff]   ;;  %v2017_v5 = vld [vmem:[%s9804_s19] sm:$0xf] }
0x1399   :  { %1980 = vadd.xlane.f32.xlu1 %v1979_v40  ;;  %v9350_v40 = vld [vmem:[%s9809_s24 + $0x158] sm:$0xff]  }
0x139a   :  { %9630 = vrsqrt.f32 %v1984_v6 }
0x13a4   :  { %v9631_v8 = vpop.eup %9630 }
0x13a5   :  { %v1988_v9 = vmul.f32 %v9631_v8, %v1972_v30  ;;  %v9339_v30 = vld [vmem:[%s9809_s24 + $0x1c0] sm:$0xff]  }
0x13a7   :  { %v1997_v13 = vmul.f32 %v8159_v41, %v1988_v9 }
0x13a9   :  { %v10155_v22 = vadd.f32 %v8160_v11, %v1997_v13  ;;  %v2252_v13 = vld [vmem:[%s9804_s19 + $0x4] sm:$0xf] }
0x1426   :  { %v1981_v4 = vpop.xlane.xlu1 %1980 }
0x1427   :  { %v1983_v7 = vmul.f32 0.03125, %v1981_v4 }
0x1429   :  { %v1985_v43 = vadd.f32 1e-05, %v1983_v7 }
0x142b   :  { %9632 = vrsqrt.f32 %v1985_v43 }
0x1435   :  { %v9633_v10 = vpop.eup %9632 }
0x1436   :  { %v1989_v14 = vmul.f32 %v9633_v10, %v1973_v38  ;;  %v9348_v38 = vld [vmem:[%s9809_s24 + $0x110] sm:$0xff]  }
0x1438   :  { %v1998_v15 = vmul.f32 %v8159_v41, %v1989_v14 }
0x143a   :  { %v10157_v23 = vadd.f32 %v8160_v11, %v1998_v15 }
0x143c   :  { %v10161_v24 = vpack.c.bf16 %v10157_v23, %v10155_v22 }
0x143e   :  { %8169 = vmatmul.mubr.msk.bf16.vlgmr.msra.gmra.mrb[36].mxu0 %vm211_vm2, %v10161_v24  ;;  %8170 = vmatmul.mubr.msk.bf16.vlgmr.msra.gmra.mrb[36].mxu1 %vm211_vm2, %v10161_v24 }
0x143f   :  { %2315 = vmatpush1.bf16.msra.mxu0 %v8171_v63  ;;  %2358 = vmatpush1.bf16.msra.mxu1 %v8173_v0  ;;  %v2019_v63 = vlaneseq }
0x1440   :  { %2316 = vmatprep.subr.bf16.mxu0 %v8176_v20  ;;  %2359 = vmatprep.subr.bf16.mxu1 %v8178_v25 }
0x1441   :  { %2346 = vmatprep.mubr.bf16.mxu0 %v9744_v60  ;;  %2389 = vmatprep.mubr.bf16.mxu1 %v9744_v60  ;;  %v2020_v0 = vshrl.u32 %v2019_v63, 7 }
0x1443   :  { %2317 = vmatpush1.bf16.msra.mxu0 %v8175_v26  ;;  %2360 = vmatpush1.bf16.msra.mxu1 %v8177_v28  ;;  %v10207_v2 = vsub.s32 0, %v2020_v0  ;;  %v10209_v3 = vsub.s32 2, %v2020_v0  ;;  %v10212_v6 = vsub.s32 1, %v2020_v0  ;;  %v10214_v4 = vsub.s32 3, %v2020_v0 }
0x1444   :  { %8599 = vmatprep.subr.bf16.mxu0 %v9338_v29  ;;  %8621 = vmatprep.subr.bf16.mxu1 %v9339_v30 }
0x1445   :  { %v2022_v7 = vrot.slane %v2017_v5, %v10207_v2  ;;  %v2030_v43 = vrot.slane %v2017_v5, %v10209_v3  ;;  %v2026_v8 = vrot.slane %v2017_v5, %v10212_v6  ;;  %v2034_v9 = vrot.slane %v2017_v5, %v10214_v4 }
0x1446   :  { %8179 = vmatmul.mubr.msk.bf16.vlgmr.msra.gmra.mrb[40].mxu0 %vm211_vm2, %v10161_v24  ;;  %8180 = vmatmul.mubr.msk.bf16.vlgmr.msra.gmra.mrb[40].mxu1 %vm211_vm2, %v10161_v24  ;;  %v2257_v30 = vrot.slane %v2252_v13, %v10207_v2 }
0x1447   :  { %8600 = vmatpush3.bf16.msra.mxu0 %v9340_v31  ;;  %8622 = vmatpush3.bf16.msra.mxu1 %v9341_v32  ;;  %v2265_v31 = vrot.slane %v2252_v13, %v10209_v3 }
0x1448   :  { %8601 = vmatprep.subr.bf16.mxu0 %v9342_v33  ;;  %8623 = vmatprep.subr.bf16.mxu1 %v9343_v34  ;;  %v2261_v34 = vrot.slane %v2252_v13, %v10212_v6 }
0x144b   :  { %8602 = vmatpush3.bf16.msra.mxu0 %v9344_v53  ;;  %8624 = vmatpush3.bf16.msra.mxu1 %v9345_v35  ;;  %v2269_v53 = vrot.slane %v2252_v13, %v10214_v4 }
0x144c   :  { %8603 = vmatprep.subr.bf16.mxu0 %v9346_v36  ;;  %8625 = vmatprep.subr.bf16.mxu1 %v9347_v37 }
0x144f   :  { %8604 = vmatpush3.bf16.msra.mxu0 %v9348_v38  ;;  %8626 = vmatpush3.bf16.msra.mxu1 %v9349_v39 }
0x1450   :  { %8605 = vmatprep.subr.bf16.mxu0 %v9350_v40  ;;  %8627 = vmatprep.subr.bf16.mxu1 %v9351_v42 }
0x1453   :  { %8606 = vmatpush3.bf16.msra.mxu0 %v9352_v12  ;;  %8628 = vmatpush3.bf16.msra.mxu1 %v9353_v44 }
0x1454   :  { %8607 = vmatprep.subr.bf16.mxu0 %v9354_v45  ;;  %8629 = vmatprep.subr.bf16.mxu1 %v9355_v46 }
0x1457   :  { %8608 = vmatpush3.bf16.msra.mxu0 %v9356_v47  ;;  %8630 = vmatpush3.bf16.msra.mxu1 %v9357_v48 }
0x1458   :  { %8609 = vmatprep.subr.bf16.mxu0 %v9358_v27  ;;  %8631 = vmatprep.subr.bf16.mxu1 %v9359_v49 }
0x145b   :  { %8610 = vmatpush3.bf16.msra.mxu0 %v9360_v50  ;;  %8632 = vmatpush3.bf16.msra.mxu1 %v9361_v51 }
0x145c   :  { %8611 = vmatprep.subr.bf16.mxu0 %v9362_v52  ;;  %8633 = vmatprep.subr.bf16.mxu1 %v9363_v54 }
0x145f   :  { %8612 = vmatpush3.bf16.msra.mxu0 %v9364_v55  ;;  %8634 = vmatpush3.bf16.msra.mxu1 %v9365_v56 }
0x1460   :  { %8613 = vmatprep.subr.bf16.mxu0 %v9366_v17  ;;  %8635 = vmatprep.subr.bf16.mxu1 %v9367_v57 }
0x1463   :  { %8614 = vmatpush3.bf16.msra.mxu0 %v9368_v58  ;;  %8636 = vmatpush3.bf16.msra.mxu1 %v9369_v59 }
0x1464   :  { %8643 = vmatprep.subr.bf16.mxu0 %v9370_v61  ;;  %8665 = vmatprep.subr.bf16.mxu1 %v9371_v62 }
0x1511   :  { %v2116_v41 = vpop.f32.mrb[36].mxu0  ;;  %v2159_v10 = vpop.f32.mrb[36].mxu1 }
0x1512   :  { %v2117_v14 = vadd.f32 %v2116_v41, %v2022_v7  ;;  %v2160_v11 = vadd.f32 %v2159_v10, %v2030_v43  ;;  %v2118_v15 = vpop.f32.mrb[37].mxu0  ;;  %v2161_v16 = vpop.f32.mrb[37].mxu1 }
0x1513   :  { %v2119_v18 = vadd.f32 %v2118_v15, %v2026_v8  ;;  %v2162_v19 = vadd.f32 %v2161_v16, %v2034_v9  ;;  %v2120_v21 = vpop.f32.mrb[38].mxu0  ;;  %v2163_v20 = vpop.f32.mrb[38].mxu1  ;;  %v9372_v16 = vld [vmem:[%s9809_s24] sm:$0xff]  }
0x1514   :  { %v2121_v25 = vadd.f32 %v2120_v21, %v2022_v7  ;;  %v2164_v26 = vadd.f32 %v2163_v20, %v2030_v43  ;;  %v2122_v28 = vpop.f32.mrb[39].mxu0  ;;  %v2165_v29 = vpop.f32.mrb[39].mxu1  ;;  %v2168_v35 = vmax.f32 %v2117_v14, 0.0  ;;  %v2170_v36 = vmax.f32 %v2160_v11, 0.0  ;;  %v9375_v21 = vld [vmem:[%s9809_s24 + $0xc8] sm:$0xff]  }
0x1515   :  { %v2123_v32 = vadd.f32 %v2122_v28, %v2026_v8  ;;  %v2166_v33 = vadd.f32 %v2165_v29, %v2034_v9  ;;  %v2169_v39 = vmax.f32 %v2119_v18, 0.0  ;;  %v2171_v40 = vmax.f32 %v2162_v19, 0.0  ;;  %v9373_v18 = vld [vmem:[%s9809_s24 + $0x80] sm:$0xff]   ;;  %v9374_v19 = vld [vmem:[%s9809_s24 + $0x48] sm:$0xff]   ;;  %v9379_v28 = vld [vmem:[%s9809_s24 + $0xd0] sm:$0xff]  }
0x1516   :  { %v2172_v37 = vmax.f32 %v2121_v25, 0.0  ;;  %v2174_v38 = vmax.f32 %v2164_v26, 0.0  ;;  %v9376_v20 = vld [vmem:[%s9809_s24 + $0x8] sm:$0xff]   ;;  %v9378_v26 = vld [vmem:[%s9809_s24 + $0x50] sm:$0xff]  }
0x1517   :  { %v2173_v42 = vmax.f32 %v2123_v32, 0.0  ;;  %v2175_v12 = vmax.f32 %v2166_v33, 0.0  ;;  %v9377_v25 = vld [vmem:[%s9809_s24 + $0x88] sm:$0xff]   ;;  %v9380_v29 = vld [vmem:[%s9809_s24 + $0x10] sm:$0xff]   ;;  %v9383_v32 = vld [vmem:[%s9809_s24 + $0xd8] sm:$0xff]  }
0x1518   :  { %v10225_v44 = vpack.c.bf16 %v2172_v37, %v2168_v35  ;;  %v10227_v45 = vpack.c.bf16 %v2174_v38, %v2170_v36  ;;  %v9384_v33 = vld [vmem:[%s9809_s24 + $0x18] sm:$0xff]   ;;  %v9387_v35 = vld [vmem:[%s9809_s24 + $0xe0] sm:$0xff]   ;;  %v9390_v38 = vld [vmem:[%s9809_s24 + $0x68] sm:$0xff]  }
0x1519   :  { %v2177_v46 = vpack.c.bf16 %v2173_v42, %v2169_v39  ;;  %v2179_v47 = vpack.c.bf16 %v2175_v12, %v2171_v40  ;;  %v2348_v48 = vpop.f32.mrb[40].mxu0  ;;  %v2391_v27 = vpop.f32.mrb[40].mxu1  ;;  %v9388_v36 = vld [vmem:[%s9809_s24 + $0x20] sm:$0xff]   ;;  %v9391_v39 = vld [vmem:[%s9809_s24 + $0xe8] sm:$0xff]   ;;  %v9394_v12 = vld [vmem:[%s9809_s24 + $0x70] sm:$0xff]  }
0x151a   :  { %v2349_v49 = vadd.f32 %v2348_v48, %v2257_v30  ;;  %v2392_v50 = vadd.f32 %v2391_v27, %v2265_v31  ;;  %v2350_v51 = vpop.f32.mrb[41].mxu0  ;;  %v2393_v52 = vpop.f32.mrb[41].mxu1  ;;  %v9389_v37 = vld [vmem:[%s9809_s24 + $0xa0] sm:$0xff]   ;;  %v9392_v40 = vld [vmem:[%s9809_s24 + $0x28] sm:$0xff]   ;;  %v9397_v48 = vld [vmem:[%s9809_s24 + $0xb0] sm:$0xff]  }
0x151b   :  { %v2351_v54 = vadd.f32 %v2350_v51, %v2261_v34  ;;  %v2394_v55 = vadd.f32 %v2393_v52, %v2269_v53  ;;  %v2352_v56 = vpop.f32.mrb[42].mxu0  ;;  %v2395_v17 = vpop.f32.mrb[42].mxu1  ;;  %v9393_v42 = vld [vmem:[%s9809_s24 + $0xa8] sm:$0xff]   ;;  %v9398_v27 = vld [vmem:[%s9809_s24 + $0x78] sm:$0xff]   ;;  %v3026_v51 = vld [vmem:[%s9799_s14 + $0x60] sm:$0xff] }
0x151c   :  { %v2353_v57 = vadd.f32 %v2352_v56, %v2257_v30  ;;  %v2396_v58 = vadd.f32 %v2395_v17, %v2265_v31  ;;  %v2354_v59 = vpop.f32.mrb[43].mxu0  ;;  %v2397_v61 = vpop.f32.mrb[43].mxu1  ;;  %v2400_v0 = vmax.f32 %v2349_v49, 0.0  ;;  %v2402_v5 = vmax.f32 %v2392_v50, 0.0  ;;  %v9381_v30 = vld [vmem:[%s9809_s24 + $0x90] sm:$0xff]   ;;  %v9382_v31 = vld [vmem:[%s9809_s24 + $0x58] sm:$0xff]  }
0x151d   :  { %v2355_v62 = vadd.f32 %v2354_v59, %v2261_v34  ;;  %v2398_v63 = vadd.f32 %v2397_v61, %v2269_v53  ;;  %v2401_v8 = vmax.f32 %v2351_v54, 0.0  ;;  %v2403_v9 = vmax.f32 %v2394_v55, 0.0  ;;  %v9385_v34 = vld [vmem:[%s9809_s24 + $0x98] sm:$0xff]   ;;  %v9386_v53 = vld [vmem:[%s9809_s24 + $0x60] sm:$0xff]   ;;  %v3025_v52 = vld [vmem:[%s9799_s14 + $0x28] sm:$0xff] }
0x151e   :  { %v2404_v7 = vmax.f32 %v2353_v57, 0.0  ;;  %v2406_v43 = vmax.f32 %v2396_v58, 0.0  ;;  %v9399_v49 = vld [vmem:[%s9809_s24 + $0xf8] sm:$0xff]   ;;  %v3024_v50 = vld [vmem:[%s9799_s14 + $0x20] sm:$0xff]  ;;  %v3027_v54 = vld [vmem:[%s9799_s14 + $0x68] sm:$0xff] }
0x151f   :  { %v2405_v41 = vmax.f32 %v2355_v62, 0.0  ;;  %v2407_v10 = vmax.f32 %v2398_v63, 0.0  ;;  %v9400_v55 = vld [vmem:[%s9809_s24 + $0x38] sm:$0xff]   ;;  %v8246_v17 = vcombine.high %v3024_v50, %v3026_v51  ;;  %v8248_v57 = vcombine.high %v3025_v52, %v3027_v54  ;;  %v3028_v58 = vld [vmem:[%s9799_s14 + $0xa0] sm:$0xff]  ;;  %v3029_v61 = vld [vmem:[%s9799_s14 + $0xa8] sm:$0xff] }
0x1520   :  { %v2408_v13 = vpack.c.bf16 %v2404_v7, %v2400_v0  ;;  %v2410_v14 = vpack.c.bf16 %v2406_v43, %v2402_v5  ;;  %v9401_v56 = vld [vmem:[%s9809_s24 + $0xb8] sm:$0xff]   ;;  %v3030_v59 = vld [vmem:[%s9799_s14 + $0xe0] sm:$0xff]  ;;  %v3031_v62 = vld [vmem:[%s9799_s14 + $0xe8] sm:$0xff]  ;;  %v8245_v63 = vcombine.low %v3024_v50, %v3026_v51  ;;  %v8247_v0 = vcombine.low %v3025_v52, %v3027_v54 }
0x1521   :  { %v2409_v11 = vpack.c.bf16 %v2405_v41, %v2401_v8  ;;  %v2411_v15 = vpack.c.bf16 %v2407_v10, %v2403_v9  ;;  %v8250_v5 = vcombine.high %v3028_v58, %v3030_v59  ;;  %v8252_v7 = vcombine.high %v3029_v61, %v3031_v62  ;;  %v9404_v9 = vld [vmem:[%s9809_s24 + $0x200] sm:$0xff]   ;;  %v9406_v10 = vld [vmem:[%s9809_s24 + $0x248] sm:$0xff]  }
0x1522   :  { %v8249_v43 = vcombine.low %v3028_v58, %v3030_v59  ;;  %v8251_v8 = vcombine.low %v3029_v61, %v3031_v62  ;;  %v9405_v41 = vld [vmem:[%s9809_s24 + $0x280] sm:$0xff]  }
0x1523   :  { %2700 = vmatprep.mubr.bf16.mxu0 %v2409_v11  ;;  %2741 = vmatprep.mubr.bf16.mxu1 %v2411_v15  ;;  %v9409_v11 = vld [vmem:[%s9809_s24 + $0x288] sm:$0xff]   ;;  %v9410_v15 = vld [vmem:[%s9809_s24 + $0x250] sm:$0xff]  }
0x1524   :  { %2701 = vmatmul.mubr.bf16.vlgmr.msra.gmra.mrb[44].mxu0 %v2408_v13  ;;  %2742 = vmatmul.mubr.bf16.vlgmr.msra.gmra.mrb[44].mxu1 %v2410_v14  ;;  %v9407_v13 = vld [vmem:[%s9809_s24 + $0x2c8] sm:$0xff]  }
0x1525   :  { %8644 = vmatpush3.bf16.msra.mxu0 %v9372_v16  ;;  %8666 = vmatpush3.bf16.msra.mxu1 %v9373_v18  ;;  %v9408_v14 = vld [vmem:[%s9809_s24 + $0x208] sm:$0xff]   ;;  %v9411_v16 = vld [vmem:[%s9809_s24 + $0x2d0] sm:$0xff]  }
0x1526   :  { %2974 = vmatprep.mubr.bf16.mxu0 %v2177_v46  ;;  %3015 = vmatprep.mubr.bf16.mxu1 %v2179_v47  ;;  %v9395_v46 = vld [vmem:[%s9809_s24 + $0xf0] sm:$0xff]  }
0x1527   :  { %8645 = vmatprep.subr.bf16.mxu0 %v9374_v19  ;;  %8667 = vmatprep.subr.bf16.mxu1 %v9375_v21  ;;  %v9396_v47 = vld [vmem:[%s9809_s24 + $0x30] sm:$0xff]   ;;  %v9414_v21 = vld [vmem:[%s9809_s24 + $0x258] sm:$0xff]  }
0x1528   :  { %v9412_v18 = vld [vmem:[%s9809_s24 + $0x210] sm:$0xff]  }
0x1529   :  { %8646 = vmatpush3.bf16.msra.mxu0 %v9376_v20  ;;  %8668 = vmatpush3.bf16.msra.mxu1 %v9377_v25  ;;  %v9413_v19 = vld [vmem:[%s9809_s24 + $0x290] sm:$0xff]   ;;  %v9415_v20 = vld [vmem:[%s9809_s24 + $0x2d8] sm:$0xff]  }
0x152a   :  { %8647 = vmatprep.subr.bf16.mxu0 %v9378_v26  ;;  %8669 = vmatprep.subr.bf16.mxu1 %v9379_v28  ;;  %v9416_v25 = vld [vmem:[%s9809_s24 + $0x218] sm:$0xff]   ;;  %v9418_v28 = vld [vmem:[%s9809_s24 + $0x260] sm:$0xff]  }
0x152b   :  { %v9417_v26 = vld [vmem:[%s9809_s24 + $0x298] sm:$0xff]  }
0x152d   :  { %8648 = vmatpush3.bf16.msra.mxu0 %v9380_v29  ;;  %8670 = vmatpush3.bf16.msra.mxu1 %v9381_v30  ;;  %v9419_v29 = vld [vmem:[%s9809_s24 + $0x2e0] sm:$0xff]  }
0x152e   :  { %8649 = vmatprep.subr.bf16.mxu0 %v9382_v31  ;;  %8671 = vmatprep.subr.bf16.mxu1 %v9383_v32  ;;  %v9420_v30 = vld [vmem:[%s9809_s24 + $0x220] sm:$0xff]   ;;  %v9422_v32 = vld [vmem:[%s9809_s24 + $0x268] sm:$0xff]  }
0x152f   :  { %v9421_v31 = vld [vmem:[%s9809_s24 + $0x2a0] sm:$0xff]  }
0x1531   :  { %8650 = vmatpush3.bf16.msra.mxu0 %v9384_v33  ;;  %8672 = vmatpush3.bf16.msra.mxu1 %v9385_v34  ;;  %v9423_v33 = vld [vmem:[%s9809_s24 + $0x2e8] sm:$0xff]  }
0x1532   :  { %8651 = vmatprep.subr.bf16.mxu0 %v9386_v53  ;;  %8673 = vmatprep.subr.bf16.mxu1 %v9387_v35  ;;  %v9424_v34 = vld [vmem:[%s9809_s24 + $0x228] sm:$0xff]   ;;  %v9426_v35 = vld [vmem:[%s9809_s24 + $0x270] sm:$0xff]  }
0x1533   :  { %v9425_v53 = vld [vmem:[%s9809_s24 + $0x2a8] sm:$0xff]  }
0x1535   :  { %8652 = vmatpush3.bf16.msra.mxu0 %v9388_v36  ;;  %8674 = vmatpush3.bf16.msra.mxu1 %v9389_v37  ;;  %v9427_v36 = vld [vmem:[%s9809_s24 + $0x2f0] sm:$0xff]  }
0x1536   :  { %8653 = vmatprep.subr.bf16.mxu0 %v9390_v38  ;;  %8675 = vmatprep.subr.bf16.mxu1 %v9391_v39  ;;  %v9428_v37 = vld [vmem:[%s9809_s24 + $0x230] sm:$0xff]   ;;  %v9430_v39 = vld [vmem:[%s9809_s24 + $0x278] sm:$0xff]  }
0x1537   :  { %v9429_v38 = vld [vmem:[%s9809_s24 + $0x2b0] sm:$0xff]  }
0x1539   :  { %8654 = vmatpush3.bf16.msra.mxu0 %v9392_v40  ;;  %8676 = vmatpush3.bf16.msra.mxu1 %v9393_v42  ;;  %v9431_v40 = vld [vmem:[%s9809_s24 + $0x2f8] sm:$0xff]  }
0x153a   :  { %8655 = vmatprep.subr.bf16.mxu0 %v9394_v12  ;;  %8677 = vmatprep.subr.bf16.mxu1 %v9395_v46  ;;  %v9432_v42 = vld [vmem:[%s9809_s24 + $0x238] sm:$0xff]   ;;  %v10308_v46 = vld [vmem:[%s9799_s14 + $0x30] sm:$0xff] }
0x153b   :  { %v9433_v12 = vld [vmem:[%s9809_s24 + $0x2b8] sm:$0xff]  }
0x153d   :  { %8656 = vmatpush3.bf16.msra.mxu0 %v9396_v47  ;;  %8678 = vmatpush3.bf16.msra.mxu1 %v9397_v48  ;;  %v10311_v47 = vld [vmem:[%s9799_s14 + $0x70] sm:$0xff]  ;;  %v10314_v48 = vld [vmem:[%s9799_s14 + $0x38] sm:$0xff] }
0x153e   :  { %8657 = vmatprep.subr.bf16.mxu0 %v9398_v27  ;;  %8679 = vmatprep.subr.bf16.mxu1 %v9399_v49  ;;  %v8288_v27 = vcombine.high %v10308_v46, %v10311_v47  ;;  %v10319_v49 = vld [vmem:[%s9799_s14 + $0x78] sm:$0xff]  ;;  %v8287_v50 = vcombine.low %v10308_v46, %v10311_v47  ;;  %v9436_v46 = vld [vmem:[%s9809_s24 + $0x300] sm:$0xff]  }
0x153f   :  { %v8289_v51 = vcombine.low %v10314_v48, %v10319_v49  ;;  %v8290_v52 = vcombine.high %v10314_v48, %v10319_v49  ;;  %v9437_v47 = vld [vmem:[%s9809_s24 + $0x380] sm:$0xff]   ;;  %v9438_v48 = vld [vmem:[%s9809_s24 + $0x348] sm:$0xff]  }
0x1540   :  { %v9439_v49 = vld [vmem:[%s9809_s24 + $0x3c8] sm:$0xff]  }
0x1541   :  { %8658 = vmatpush3.bf16.msra.mxu0 %v9400_v55  ;;  %8680 = vmatpush3.bf16.msra.mxu1 %v9401_v56 }
0x1542   :  { %3094 = vmatprep.subr.bf16.mxu0 %v8246_v17  ;;  %3137 = vmatprep.subr.bf16.mxu1 %v8248_v57 }
0x1544   :  { %2975 = vmatmul.mubr.bf16.vlgmr.msra.gmra.mrb[48].mxu0 %v10225_v44  ;;  %3016 = vmatmul.mubr.bf16.vlgmr.msra.gmra.mrb[48].mxu1 %v10227_v45  ;;  %v9402_v44 = vld [vmem:[%s9809_s24 + $0x240] sm:$0xff]  }
0x1545   :  { %3095 = vmatpush1.bf16.msra.mxu0 %v8245_v63  ;;  %3138 = vmatpush1.bf16.msra.mxu1 %v8247_v0  ;;  %v9403_v45 = vld [vmem:[%s9809_s24 + $0x2c0] sm:$0xff]  }
0x1546   :  { %3096 = vmatprep.subr.bf16.mxu0 %v8250_v5  ;;  %3139 = vmatprep.subr.bf16.mxu1 %v8252_v7 }
0x1547   :  { %3126 = vmatprep.mubr.bf16.mxu0 %v9744_v60  ;;  %3169 = vmatprep.mubr.bf16.mxu1 %v9744_v60 }
0x1549   :  { %3097 = vmatpush1.bf16.msra.mxu0 %v8249_v43  ;;  %3140 = vmatpush1.bf16.msra.mxu1 %v8251_v8 }
0x154a   :  { %8687 = vmatprep.subr.bf16.mxu0 %v9402_v44  ;;  %8709 = vmatprep.subr.bf16.mxu1 %v9403_v45 }
0x154c   :  { %8253 = vmatmul.mubr.msk.bf16.vlgmr.msra.gmra.mrb[52].mxu0 %vm211_vm2, %v10161_v24  ;;  %8254 = vmatmul.mubr.msk.bf16.vlgmr.msra.gmra.mrb[52].mxu1 %vm211_vm2, %v10161_v24 }
0x154d   :  { %8688 = vmatpush3.bf16.msra.mxu0 %v9404_v9  ;;  %8710 = vmatpush3.bf16.msra.mxu1 %v9405_v41 }
0x154e   :  { %8689 = vmatprep.subr.bf16.mxu0 %v9406_v10  ;;  %8711 = vmatprep.subr.bf16.mxu1 %v9407_v13 }
0x1551   :  { %8690 = vmatpush3.bf16.msra.mxu0 %v9408_v14  ;;  %8712 = vmatpush3.bf16.msra.mxu1 %v9409_v11  ;;  %v3032_v11 = vld [vmem:[%s9804_s19 + $0x8] sm:$0xf] }
0x1552   :  { %8691 = vmatprep.subr.bf16.mxu0 %v9410_v15  ;;  %8713 = vmatprep.subr.bf16.mxu1 %v9411_v16 }
0x1555   :  { %8692 = vmatpush3.bf16.msra.mxu0 %v9412_v18  ;;  %8714 = vmatpush3.bf16.msra.mxu1 %v9413_v19 }
0x1556   :  { %8693 = vmatprep.subr.bf16.mxu0 %v9414_v21  ;;  %8715 = vmatprep.subr.bf16.mxu1 %v9415_v20  ;;  %v3037_v20 = vrot.slane %v3032_v11, %v10207_v2 }
0x1559   :  { %8694 = vmatpush3.bf16.msra.mxu0 %v9416_v25  ;;  %8716 = vmatpush3.bf16.msra.mxu1 %v9417_v26  ;;  %v3045_v25 = vrot.slane %v3032_v11, %v10209_v3 }
0x155a   :  { %8695 = vmatprep.subr.bf16.mxu0 %v9418_v28  ;;  %8717 = vmatprep.subr.bf16.mxu1 %v9419_v29  ;;  %v3041_v29 = vrot.slane %v3032_v11, %v10212_v6 }
0x155d   :  { %8696 = vmatpush3.bf16.msra.mxu0 %v9420_v30  ;;  %8718 = vmatpush3.bf16.msra.mxu1 %v9421_v31  ;;  %v3049_v30 = vrot.slane %v3032_v11, %v10214_v4  ;;  %v9434_v11 = vld [vmem:[%s9809_s24 + $0x340] sm:$0xff]  }
0x155e   :  { %8697 = vmatprep.subr.bf16.mxu0 %v9422_v32  ;;  %8719 = vmatprep.subr.bf16.mxu1 %v9423_v33 }
0x1561   :  { %8698 = vmatpush3.bf16.msra.mxu0 %v9424_v34  ;;  %8720 = vmatpush3.bf16.msra.mxu1 %v9425_v53 }
0x1562   :  { %8699 = vmatprep.subr.bf16.mxu0 %v9426_v35  ;;  %8721 = vmatprep.subr.bf16.mxu1 %v9427_v36 }
0x1565   :  { %8700 = vmatpush3.bf16.msra.mxu0 %v9428_v37  ;;  %8722 = vmatpush3.bf16.msra.mxu1 %v9429_v38 }
0x1566   :  { %8701 = vmatprep.subr.bf16.mxu0 %v9430_v39  ;;  %8723 = vmatprep.subr.bf16.mxu1 %v9431_v40 }
0x1569   :  { %8702 = vmatpush3.bf16.msra.mxu0 %v9432_v42  ;;  %8724 = vmatpush3.bf16.msra.mxu1 %v9433_v12 }
0x156a   :  { %3602 = vmatprep.subr.bf16.mxu0 %v8288_v27  ;;  %3645 = vmatprep.subr.bf16.mxu1 %v8290_v52 }
0x15f7   :  { %v8615_v54 = vpop.f32.mrb[44].mxu0  ;;  %v8637_v55 = vpop.f32.mrb[44].mxu1 }
0x15f8   :  { %v8616_v56 = vpop.f32.mrb[45].mxu0  ;;  %v8638_v17 = vpop.f32.mrb[45].mxu1 }
0x15f9   :  { %v8617_v57 = vadd.f32 %v8616_v56, %v8615_v54  ;;  %v8639_v58 = vadd.f32 %v8638_v17, %v8637_v55  ;;  %v8618_v59 = vpop.f32.mrb[46].mxu0  ;;  %v8640_v61 = vpop.f32.mrb[46].mxu1 }
0x15fa   :  { %v8619_v62 = vpop.f32.mrb[47].mxu0  ;;  %v8641_v63 = vpop.f32.mrb[47].mxu1 }
0x15fb   :  { %v2744_v0 = vadd.f32 %v8639_v58, %v8617_v57  ;;  %v8620_v5 = vadd.f32 %v8619_v62, %v8618_v59  ;;  %v8642_v7 = vadd.f32 %v8641_v63, %v8640_v61  ;;  %v3536_v59 = vld [vmem:[%s9799_s14 + $0xb0] sm:$0xff] }
0x15fc   :  { %v3538_v61 = vld [vmem:[%s9799_s14 + $0xf0] sm:$0xff] }
0x15fd   :  { %v2747_v43 = vadd.f32 %v8642_v7, %v8620_v5  ;;  %v3537_v7 = vld [vmem:[%s9799_s14 + $0xb8] sm:$0xff] }
0x1617   :  { %v8659_v8 = vpop.f32.mrb[48].mxu0  ;;  %v8681_v44 = vpop.f32.mrb[48].mxu1 }
0x1618   :  { %v8660_v45 = vpop.f32.mrb[49].mxu0  ;;  %v8682_v9 = vpop.f32.mrb[49].mxu1 }
0x1619   :  { %v8661_v41 = vadd.f32 %v8660_v45, %v8659_v8  ;;  %v8683_v10 = vadd.f32 %v8682_v9, %v8681_v44  ;;  %v8662_v13 = vpop.f32.mrb[50].mxu0  ;;  %v8684_v14 = vpop.f32.mrb[50].mxu1 }
0x161a   :  { %v8663_v15 = vpop.f32.mrb[51].mxu0  ;;  %v8685_v16 = vpop.f32.mrb[51].mxu1 }
0x161b   :  { %v2977_v18 = vadd.f32 %v8661_v41, %v2744_v0  ;;  %v8664_v19 = vadd.f32 %v8663_v15, %v8662_v13  ;;  %v8686_v21 = vadd.f32 %v8685_v16, %v8684_v14  ;;  %v8292_v41 = vcombine.high %v3536_v59, %v3538_v61  ;;  %v9435_v15 = vld [vmem:[%s9809_s24 + $0x3c0] sm:$0xff]   ;;  %v9442_v16 = vld [vmem:[%s9809_s24 + $0x350] sm:$0xff]  }
0x161c   :  { %v8291_v13 = vcombine.low %v3536_v59, %v3538_v61 }
0x161d   :  { %v10330_v26 = vadd.f32 %v8683_v10, %v2977_v18  ;;  %v2980_v28 = vadd.f32 %v8664_v19, %v2747_v43  ;;  %v3539_v43 = vld [vmem:[%s9799_s14 + $0xf8] sm:$0xff]  ;;  %v9443_v18 = vld [vmem:[%s9809_s24 + $0x3d0] sm:$0xff]   ;;  %s10917_s14 = sld [smem:[#allocation9_spill]] }
0x161e   :  { %v8294_v10 = vcombine.high %v3537_v7, %v3539_v43  ;;  %v8293_v14 = vcombine.low %v3537_v7, %v3539_v43  ;;  %v9444_v19 = vld [vmem:[%s9809_s24 + $0x310] sm:$0xff]  }
0x161f   :  { %v10334_v31 = vadd.f32 %v8686_v21, %v2980_v28  ;;  %v3128_v32 = vpop.f32.mrb[52].mxu0  ;;  %v3171_v33 = vpop.f32.mrb[52].mxu1  ;;  %v9445_v21 = vld [vmem:[%s9809_s24 + $0x390] sm:$0xff]   ;;  %v9449_v28 = vld [vmem:[%s9809_s24 + $0x398] sm:$0xff]  }
0x1620   :  { %v3129_v34 = vadd.f32 %v3128_v32, %v3037_v20  ;;  %v3172_v53 = vadd.f32 %v3171_v33, %v3045_v25  ;;  %v3130_v35 = vpop.f32.mrb[53].mxu0  ;;  %v3173_v36 = vpop.f32.mrb[53].mxu1  ;;  %v9452_v32 = vld [vmem:[%s9809_s24 + $0x320] sm:$0xff]  }
0x1621   :  { %v3131_v37 = vadd.f32 %v3130_v35, %v3041_v29  ;;  %v3174_v38 = vadd.f32 %v3173_v36, %v3049_v30  ;;  %v3132_v39 = vpop.f32.mrb[54].mxu0  ;;  %v3175_v40 = vpop.f32.mrb[54].mxu1  ;;  %v9453_v33 = vld [vmem:[%s9809_s24 + $0x3a0] sm:$0xff]   ;;  %v9456_v35 = vld [vmem:[%s9809_s24 + $0x328] sm:$0xff]  }
0x1622   :  { %v3133_v42 = vadd.f32 %v3132_v39, %v3037_v20  ;;  %v3176_v12 = vadd.f32 %v3175_v40, %v3045_v25  ;;  %v3134_v27 = vpop.f32.mrb[55].mxu0  ;;  %v3177_v52 = vpop.f32.mrb[55].mxu1  ;;  %v3180_v56 = vmax.f32 %v3129_v34, 0.0  ;;  %v3182_v17 = vmax.f32 %v3172_v53, 0.0  ;;  %v9447_v20 = vld [vmem:[%s9809_s24 + $0x3d8] sm:$0xff]   ;;  %v9454_v34 = vld [vmem:[%s9809_s24 + $0x368] sm:$0xff]  }
0x1623   :  { %v3135_v54 = vadd.f32 %v3134_v27, %v3041_v29  ;;  %v3178_v55 = vadd.f32 %v3177_v52, %v3049_v30  ;;  %v3181_v62 = vmax.f32 %v3131_v37, 0.0  ;;  %v3183_v63 = vmax.f32 %v3174_v38, 0.0  ;;  %v9448_v25 = vld [vmem:[%s9809_s24 + $0x318] sm:$0xff]   ;;  %v9450_v29 = vld [vmem:[%s9809_s24 + $0x360] sm:$0xff]   ;;  %v9455_v53 = vld [vmem:[%s9809_s24 + $0x3e8] sm:$0xff]  }
0x1624   :  { %v3184_v57 = vmax.f32 %v3133_v42, 0.0  ;;  %v3186_v58 = vmax.f32 %v3176_v12, 0.0  ;;  %v9451_v30 = vld [vmem:[%s9809_s24 + $0x3e0] sm:$0xff]   ;;  %v9457_v36 = vld [vmem:[%s9809_s24 + $0x3a8] sm:$0xff]   ;;  %v9458_v37 = vld [vmem:[%s9809_s24 + $0x370] sm:$0xff]  }
0x1625   :  { %v3185_v0 = vmax.f32 %v3135_v54, 0.0  ;;  %v3187_v5 = vmax.f32 %v3178_v55, 0.0  ;;  %v9459_v38 = vld [vmem:[%s9809_s24 + $0x3f0] sm:$0xff]   ;;  %v9462_v42 = vld [vmem:[%s9809_s24 + $0x378] sm:$0xff]  }
0x1626   :  { %v3188_v8 = vpack.c.bf16 %v3184_v57, %v3180_v56  ;;  %v3190_v44 = vpack.c.bf16 %v3186_v58, %v3182_v17  ;;  %v9460_v39 = vld [vmem:[%s9809_s24 + $0x330] sm:$0xff]   ;;  %v9463_v12 = vld [vmem:[%s9809_s24 + $0x3f8] sm:$0xff]  }
0x1627   :  { %v3189_v45 = vpack.c.bf16 %v3185_v0, %v3181_v62  ;;  %v3191_v9 = vpack.c.bf16 %v3187_v5, %v3183_v63  ;;  %v9461_v40 = vld [vmem:[%s9809_s24 + $0x3b0] sm:$0xff]   ;;  %v9464_v27 = vld [vmem:[%s9809_s24 + $0x338] sm:$0xff]   ;;  %v3540_v62 = vld [vmem:[%s9804_s19 + $0xc] sm:$0xf]  ;;  %s10918_s19 = sld [smem:[#allocation12_spill]] }
0x1628   :  { %v9465_v52 = vld [vmem:[%s9809_s24 + $0x3b8] sm:$0xff]  }
0x1629   :  { %3480 = vmatprep.mubr.bf16.mxu0 %v3189_v45  ;;  %3521 = vmatprep.mubr.bf16.mxu1 %v3191_v9 }
0x162a   :  { %3481 = vmatmul.mubr.bf16.vlgmr.msra.gmra.mrb[56].mxu0 %v3188_v8  ;;  %3522 = vmatmul.mubr.bf16.vlgmr.msra.gmra.mrb[56].mxu1 %v3190_v44  ;;  %v3545_v8 = vrot.slane %v3540_v62, %v10207_v2  ;;  %v3553_v44 = vrot.slane %v3540_v62, %v10209_v3 }
0x162b   :  { %3603 = vmatpush1.bf16.msra.mxu0 %v8287_v50  ;;  %3646 = vmatpush1.bf16.msra.mxu1 %v8289_v51  ;;  %v9440_v50 = vld [vmem:[%s9809_s24 + $0x308] sm:$0xff]  }
0x162c   :  { %3604 = vmatprep.subr.bf16.mxu0 %v8292_v41  ;;  %3647 = vmatprep.subr.bf16.mxu1 %v8294_v10  ;;  %v9441_v51 = vld [vmem:[%s9809_s24 + $0x388] sm:$0xff]   ;;  %v3549_v41 = vrot.slane %v3540_v62, %v10212_v6  ;;  %v3557_v10 = vrot.slane %v3540_v62, %v10214_v4 }
0x162d   :  { %3634 = vmatprep.mubr.bf16.mxu0 %v9744_v60  ;;  %3677 = vmatprep.mubr.bf16.mxu1 %v9744_v60 }
0x162f   :  { %3605 = vmatpush1.bf16.msra.mxu0 %v8291_v13  ;;  %3648 = vmatpush1.bf16.msra.mxu1 %v8293_v14 }
0x1630   :  { %8731 = vmatprep.subr.bf16.mxu0 %v9434_v11  ;;  %8753 = vmatprep.subr.bf16.mxu1 %v9435_v15 }
0x1632   :  { %8295 = vmatmul.mubr.msk.bf16.vlgmr.msra.gmra.mrb[60].mxu0 %vm211_vm2, %v10161_v24  ;;  %8296 = vmatmul.mubr.msk.bf16.vlgmr.msra.gmra.mrb[60].mxu1 %vm211_vm2, %v10161_v24  ;;  %v9446_v24 = vld [vmem:[%s9809_s24 + $0x358] sm:$0xff]   ;;  %s10919_s24 = sld [smem:[#allocation10_spill]] }
0x1633   :  { %8732 = vmatpush3.bf16.msra.mxu0 %v9436_v46  ;;  %8754 = vmatpush3.bf16.msra.mxu1 %v9437_v47 }
0x1634   :  { %8733 = vmatprep.subr.bf16.mxu0 %v9438_v48  ;;  %8755 = vmatprep.subr.bf16.mxu1 %v9439_v49 }
0x1637   :  { %8734 = vmatpush3.bf16.msra.mxu0 %v9440_v50  ;;  %8756 = vmatpush3.bf16.msra.mxu1 %v9441_v51 }
0x1638   :  { %8735 = vmatprep.subr.bf16.mxu0 %v9442_v16  ;;  %8757 = vmatprep.subr.bf16.mxu1 %v9443_v18 }
0x163b   :  { %8736 = vmatpush3.bf16.msra.mxu0 %v9444_v19  ;;  %8758 = vmatpush3.bf16.msra.mxu1 %v9445_v21 }
0x163c   :  { %8737 = vmatprep.subr.bf16.mxu0 %v9446_v24  ;;  %8759 = vmatprep.subr.bf16.mxu1 %v9447_v20 }
0x163f   :  { %8738 = vmatpush3.bf16.msra.mxu0 %v9448_v25  ;;  %8760 = vmatpush3.bf16.msra.mxu1 %v9449_v28 }
0x1640   :  { %8739 = vmatprep.subr.bf16.mxu0 %v9450_v29  ;;  %8761 = vmatprep.subr.bf16.mxu1 %v9451_v30 }
0x1643   :  { %8740 = vmatpush3.bf16.msra.mxu0 %v9452_v32  ;;  %8762 = vmatpush3.bf16.msra.mxu1 %v9453_v33 }
0x1644   :  { %8741 = vmatprep.subr.bf16.mxu0 %v9454_v34  ;;  %8763 = vmatprep.subr.bf16.mxu1 %v9455_v53 }
0x1647   :  { %8742 = vmatpush3.bf16.msra.mxu0 %v9456_v35  ;;  %8764 = vmatpush3.bf16.msra.mxu1 %v9457_v36 }
0x1648   :  { %8743 = vmatprep.subr.bf16.mxu0 %v9458_v37  ;;  %8765 = vmatprep.subr.bf16.mxu1 %v9459_v38 }
0x164b   :  { %8744 = vmatpush3.bf16.msra.mxu0 %v9460_v39  ;;  %8766 = vmatpush3.bf16.msra.mxu1 %v9461_v40 }
0x164c   :  { %8745 = vmatprep.subr.bf16.mxu0 %v9462_v42  ;;  %8767 = vmatprep.subr.bf16.mxu1 %v9463_v12 }
0x164f   :  { %8746 = vmatpush3.bf16.msra.mxu0 %v9464_v27  ;;  %8768 = vmatpush3.bf16.msra.mxu1 %v9465_v52 }
0x1650   :  { %9147 = vmatprep.subr.bf16.mxu0 %v9731_v1  ;;  %9155 = vmatprep.subr.mxu1 %v9731_v1 }
0x16fd   :  { %v8703_v54 = vpop.f32.mrb[56].mxu0  ;;  %v8725_v55 = vpop.f32.mrb[56].mxu1 }
0x16fe   :  { %v8704_v56 = vpop.f32.mrb[57].mxu0  ;;  %v8726_v17 = vpop.f32.mrb[57].mxu1 }
0x16ff   :  { %v8705_v57 = vadd.f32 %v8704_v56, %v8703_v54  ;;  %v8727_v58 = vadd.f32 %v8726_v17, %v8725_v55  ;;  %v8706_v59 = vpop.f32.mrb[58].mxu0  ;;  %v8728_v61 = vpop.f32.mrb[58].mxu1 }
0x1700   :  { %v8707_v63 = vpop.f32.mrb[59].mxu0  ;;  %v8729_v0 = vpop.f32.mrb[59].mxu1 }
0x1701   :  { %v3524_v5 = vadd.f32 %v8727_v58, %v8705_v57  ;;  %v8708_v7 = vadd.f32 %v8707_v63, %v8706_v59  ;;  %v8730_v43 = vadd.f32 %v8729_v0, %v8728_v61  ;;  %v8329_v59 = vld [vmem:[%s9814_s30] ss:$0 sm:$0xff]  ;;  %s10920_s30 = sld [smem:[#allocation11_spill]] }
0x1703   :  { %v3530_v45 = vadd.f32 %v3524_v5, %v10330_v26  ;;  %v3527_v9 = vadd.f32 %v8730_v43, %v8708_v7 }
0x1705   :  { %v3531_v13 = vadd.f32 %v3527_v9, %v10334_v31  ;;  %v3636_v14 = vpop.f32.mrb[60].mxu0  ;;  %v3679_v11 = vpop.f32.mrb[60].mxu1 }
0x1706   :  { %v3637_v15 = vadd.f32 %v3636_v14, %v3545_v8  ;;  %v3680_v46 = vadd.f32 %v3679_v11, %v3553_v44  ;;  %v3638_v47 = vpop.f32.mrb[61].mxu0  ;;  %v3681_v48 = vpop.f32.mrb[61].mxu1 }
0x1707   :  { %v3639_v49 = vadd.f32 %v3638_v47, %v3549_v41  ;;  %v3682_v50 = vadd.f32 %v3681_v48, %v3557_v10  ;;  %v3640_v51 = vpop.f32.mrb[62].mxu0  ;;  %v3683_v16 = vpop.f32.mrb[62].mxu1  ;;  %v9467_v47 = vld [vmem:[%s9829_s20 + $0x8] sm:$0xff]  }
0x1708   :  { %v3641_v18 = vadd.f32 %v3640_v51, %v3545_v8  ;;  %v3684_v19 = vadd.f32 %v3683_v16, %v3553_v44  ;;  %v3642_v26 = vpop.f32.mrb[63].mxu0  ;;  %v3685_v21 = vpop.f32.mrb[63].mxu1  ;;  %v3688_v25 = vmax.f32 %v3637_v15, 0.0  ;;  %v3690_v28 = vmax.f32 %v3680_v46, 0.0 }
0x1709   :  { %v3643_v24 = vadd.f32 %v3642_v26, %v3549_v41  ;;  %v3686_v20 = vadd.f32 %v3685_v21, %v3557_v10  ;;  %v3689_v30 = vmax.f32 %v3639_v49, 0.0  ;;  %v3691_v32 = vmax.f32 %v3682_v50, 0.0  ;;  %v8330_v21 = vld [vmem:[%s10913_s25] ss:$0 sm:$0xff] }
0x170a   :  { %v3692_v29 = vmax.f32 %v3641_v18, 0.0  ;;  %v3694_v31 = vmax.f32 %v3684_v19, 0.0 }
0x170b   :  { %v3693_v33 = vmax.f32 %v3643_v24, 0.0  ;;  %v3695_v34 = vmax.f32 %v3686_v20, 0.0 }
0x170c   :  { %v3696_v53 = vpack.c.bf16 %v3692_v29, %v3688_v25  ;;  %v3698_v35 = vpack.c.bf16 %v3694_v31, %v3690_v28  ;;  %v8331_v28 = vld [vmem:[%s10914_s29] ss:$0 sm:$0xff] }
0x170d   :  { %v3697_v36 = vpack.c.bf16 %v3693_v33, %v3689_v30  ;;  %v3699_v37 = vpack.c.bf16 %v3695_v34, %v3691_v32  ;;  %v8332_v33 = vld [vmem:[%s10915_s3] ss:$0 sm:$0xff] }
0x170f   :  { %3988 = vmatprep.mubr.bf16.mxu0 %v3697_v36  ;;  %4029 = vmatprep.mubr.bf16.mxu1 %v3699_v37 }
0x1710   :  { %3989 = vmatmul.mubr.bf16.vlgmr.msra.gmra.mrb[64].mxu0 %v3696_v53  ;;  %4030 = vmatmul.mubr.bf16.vlgmr.msra.gmra.mrb[64].mxu1 %v3698_v35 }
0x1711   :  { %9151 = vmatprep.mubr.msk.bf16.mxu0 %vm9732_vm1, %v9731_v1  ;;  %9157 = vmatprep.mubr.msk.f32.mxu1 %vm9732_vm1, %v9731_v1 }
0x17e3   :  { %v8747_v38 = vpop.f32.mrb[64].mxu0  ;;  %v8769_v39 = vpop.f32.mrb[64].mxu1 }
0x17e4   :  { %v8748_v40 = vpop.f32.mrb[65].mxu0  ;;  %v8770_v42 = vpop.f32.mrb[65].mxu1 }
0x17e5   :  { %v8749_v12 = vadd.f32 %v8748_v40, %v8747_v38  ;;  %v8771_v27 = vadd.f32 %v8770_v42, %v8769_v39  ;;  %v8750_v52 = vpop.f32.mrb[66].mxu0  ;;  %v8772_v54 = vpop.f32.mrb[66].mxu1 }
0x17e6   :  { %v8751_v55 = vpop.f32.mrb[67].mxu0  ;;  %v8773_v56 = vpop.f32.mrb[67].mxu1 }
0x17e7   :  { %v4032_v17 = vadd.f32 %v8771_v27, %v8749_v12  ;;  %v8752_v57 = vadd.f32 %v8751_v55, %v8750_v52  ;;  %v8774_v58 = vadd.f32 %v8773_v56, %v8772_v54 }
0x17e9   :  { %v4038_v61 = vadd.f32 %v4032_v17, %v3530_v45  ;;  %v4035_v62 = vadd.f32 %v8774_v58, %v8752_v57 }
0x17eb   :  { %v4039_v63 = vadd.f32 %v4035_v62, %v3531_v13  ;;  %v4047_v0 = vadd.f32 %v8329_v59, %v4038_v61 }
0x17ed   :  { %v4049_v5 = vadd.f32 %v4047_v0, %v10155_v22  ;;  %v4048_v7 = vadd.f32 %v8329_v59, %v4039_v63 }
0x17ef   :  { %v4051_v43 = vsel %vm211_vm2, %v4049_v5, 0.0  ;;  %v4050_v8 = vadd.f32 %v4048_v7, %v10157_v23  ;;  %v9466_v23 = vld [vmem:[%s9829_s20] sm:$0xff]   ;;  %s10921_s20 = sld [smem:[#allocation14_spill]] }
0x17f0   :  { %4052 = vadd.xlane.f32.xlu1 %v4051_v43  ;;  %9148 = vmatpush3.bf16.msra.mxu0 %v9466_v23 }
0x17f1   :  { %v4054_v44 = vsel %vm211_vm2, %v4050_v8, 0.0  ;;  %9149 = vmatprep.subr.bf16.mxu0 %v9731_v1 }
0x17f4   :  { %4055 = vadd.xlane.f32.xlu1 %v4054_v44  ;;  %9150 = vmatpush3.bf16.msra.mxu0 %v9467_v47  ;;  %v4166_v44 = vld [vmem:[%s10916_s8 + $0x4] sm:$0xf] }
0x17f5   :  { %9165 = vmatprep.subr.mxu0 %v9731_v1 }
0x187d   :  { %v4053_v9 = vpop.xlane.xlu1 %4052 }
0x187e   :  { %v4057_v41 = vmul.f32 0.03125, %v4053_v9  ;;  %v10459_v9 = vsel %vm598_vm4, %v4166_v44, 0 }
0x1880   :  { %v4059_v10 = vsub.f32 %v4049_v5, %v4057_v41 }
0x1881   :  { %v4056_v45 = vpop.xlane.xlu1 %4055 }
0x1882   :  { %v4058_v14 = vmul.f32 0.03125, %v4056_v45  ;;  %v4061_v13 = vmul.f32 %v4059_v10, %v4059_v10 }
0x1884   :  { %v4060_v11 = vsub.f32 %v4050_v8, %v4058_v14  ;;  %v4063_v22 = vsel %vm211_vm2, %v4061_v13, 0.0 }
0x1885   :  { %4064 = vadd.xlane.f32.xlu0 %v4063_v22 }
0x1886   :  { %v4062_v15 = vmul.f32 %v4060_v11, %v4060_v11 }
0x1888   :  { %v4066_v46 = vsel %vm211_vm2, %v4062_v15, 0.0  ;;  %v4165_v15 = vld [vmem:[%s10916_s8] sm:$0xf] }
0x1889   :  { %4067 = vadd.xlane.f32.xlu1 %v4066_v46  ;;  %v10472_v46 = vsel %vm598_vm4, %v4165_v15, 0 }
0x1912   :  { %v4065_v48 = vpop.xlane.xlu0 %4064 }
0x1913   :  { %v4069_v49 = vmul.f32 0.03125, %v4065_v48 }
0x1915   :  { %v4071_v50 = vadd.f32 1e-05, %v4069_v49 }
0x1916   :  { %v4068_v51 = vpop.xlane.xlu1 %4067 }
0x1917   :  { %9634 = vrsqrt.f32 %v4071_v50  ;;  %v4070_v16 = vmul.f32 0.03125, %v4068_v51 }
0x1919   :  { %v4072_v18 = vadd.f32 1e-05, %v4070_v16 }
0x191b   :  { %9636 = vrsqrt.f32 %v4072_v18 }
0x1921   :  { %v9635_v19 = vpop.eup %9634 }
0x1922   :  { %v4075_v26 = vmul.f32 %v9635_v19, %v4059_v10 }
0x1924   :  { %v4084_v20 = vmul.f32 %v8330_v21, %v4075_v26 }
0x1925   :  { %v9637_v24 = vpop.eup %9636 }
0x1926   :  { %v4076_v25 = vmul.f32 %v9637_v24, %v4060_v11  ;;  %v10410_v31 = vadd.f32 %v8331_v28, %v4084_v20 }
0x1928   :  { %v4085_v29 = vmul.f32 %v8330_v21, %v4076_v25 }
0x192a   :  { %v10412_v30 = vadd.f32 %v8331_v28, %v4085_v29 }
0x192c   :  { %v4095_v32 = vpack.c.bf16 %v10412_v30, %v10410_v31 }
0x192e   :  { %9152 = vmatmul.mubr.msk.bf16.vlgmr.msra.gmra.mrb[68].mxu0 %vm211_vm2, %v4095_v32 }
0x192f   :  { %9167 = vmatprep.mubr.msk.f32.mxu0 %vm9732_vm1, %v9731_v1 }
0x1a01   :  { %v4156_v34 = vpop.f32.mrb[68].mxu0 }
0x1a02   :  { %v10420_v53 = vadd.f32 %v8332_v33, %v4156_v34  ;;  %v9153_v35 = vpop.f32.mrb[69].mxu0 }
0x1a03   :  { %v4159_v36 = vpop.f32.mrb[70].mxu0 }
0x1a04   :  { %v10422_v37 = vadd.f32 %v8332_v33, %v4159_v36  ;;  %4170 = vrot.lane.b32.xlu1 %v10420_v53, %s9733_s0  ;;  %v9154_v38 = vpop.f32.mrb[71].mxu0  ;;  %v10429_v39 = vmul.f32 0.35355338, %v10420_v53 }
0x1a08   :  { %4337 = vrot.lane.b32.xlu1 %v10420_v53, %s9735_s9 }
0x1a0c   :  { %4335 = vrot.lane.b32.xlu1 %v10429_v39, %s9734_s5 }
0x1a76   :  { %v4171_v40 = vpop.permute.xlu1 %4170 }
0x1a77   :  { %9156 = vmatpush3.xpose.msk.msra.mxu1 %vm265_vm3, %v4171_v40 }
0x1a78   :  { %9160 = vmatprep.subr.mxu1 %v9731_v1 }
0x1a7a   :  { %v4338_v42 = vpop.permute.xlu1 %4337  ;;  %9158 = vmatmul.mubr.msk.f32.vlgmr.msra.gmra.mrb[68].mxu1 %vm265_vm3, %v10429_v39 }
0x1a7b   :  { %9166 = vmatpush3.xpose.msk.msra.mxu0 %vm265_vm3, %v4338_v42  ;;  %9162 = vmatprep.mubr.msk.f32.mxu1 %vm9732_vm1, %v9731_v1 }
0x1a7c   :  { %9175 = vmatprep.subr.bf16.mxu0 %v9731_v1 }
0x1a7e   :  { %v4336_v12 = vpop.permute.xlu1 %4335 }
0x1a7f   :  { %9168 = vmatmul.mubr.msk.f32.vlgmr.msra.gmra.mrb[72].mxu0 %vm265_vm3, %v4336_v12 }
0x1a80   :  { %9177 = vmatprep.mubr.msk.bf16.mxu0 %vm9732_vm1, %v9731_v1  ;;  %9176 = vmatpush3.bf16.msra.mxu0 %v10459_v9 }
0x1a81   :  { %9187 = vmatprep.subr.mxu0 %v9731_v1 }
0x1b4d   :  { %v4243_v27 = vpop.f32.mrb[68].mxu1 }
0x1b4e   :  { %v9159_v52 = vpop.f32.mrb[69].mxu1  ;;  %v4247_v54 = vsel %vm265_vm3, %v4243_v27, -inf }
0x1b4f   :  { %4248 = vmax.xlane.f32.xlu0 %v4247_v54 }
0x1b52   :  { %v4409_v55 = vpop.f32.mrb[72].mxu0 }
0x1b53   :  { %v9169_v56 = vpop.f32.mrb[73].mxu0  ;;  %v4413_v17 = vsel %vm265_vm3, %v4409_v55, -inf }
0x1b54   :  { %4414 = vmax.xlane.f32.xlu1 %v4413_v17  ;;  %v4167_v17 = vld [vmem:[%s10916_s8 + $0x8] sm:$0xf] }
0x1b65   :  { %4258 = vrot.lane.b32.xlu0 %v10420_v53, %s9737_s17  ;;  %4595 = vrot.lane.b32.xlu1 %v10420_v53, %s9738_s21 }
0x1bdc   :  { %v4249_v57 = vpop.xlane.xlu0 %4248 }
0x1bdd   :  { %v4250_v58 = vsub.f32 %v4243_v27, %v4249_v57  ;;  %v10508_v57 = vsel %vm598_vm4, %v4167_v17, 0 }
0x1bdf   :  { %v4251_v59 = vmul.f32 1.442695, %v4250_v58 }
0x1be0   :  { %v4259_v61 = vpop.permute.xlu0 %4258 }
0x1be1   :  { %9638 = vpow2.f32 %v4251_v59  ;;  %9161 = vmatpush3.msra.mxu1 %v4259_v61  ;;  %v4415_v62 = vpop.xlane.xlu1 %4414 }
0x1be2   :  { %v4416_v63 = vsub.f32 %v4409_v55, %v4415_v62  ;;  %9170 = vmatprep.subr.mxu1 %v9731_v1 }
0x1be4   :  { %v4417_v0 = vmul.f32 1.442695, %v4416_v63 }
0x1be5   :  { %v4596_v16 = vpop.permute.xlu1 %4595 }
0x1be6   :  { %9640 = vpow2.f32 %v4417_v0 }
0x1beb   :  { %v9639_v5 = vpop.eup %9638 }
0x1bec   :  { %v4253_v7 = vsel %vm265_vm3, %v9639_v5, 0.0 }
0x1bed   :  { %4254 = vadd.xlane.f32.xlu0 %v4253_v7 }
0x1bf0   :  { %v9641_v43 = vpop.eup %9640 }
0x1bf1   :  { %v4419_v8 = vsel %vm265_vm3, %v9641_v43, 0.0 }
0x1bf2   :  { %4420 = vadd.xlane.f32.xlu0 %v4419_v8 }
0x1c08   :  { %4424 = vrot.lane.b32.xlu0 %v10420_v53, %s9736_s13 }
0x1c0c   :  { %4593 = vrot.lane.b32.xlu0 %v10429_v39, %s9739_s7 }
0x1c7a   :  { %v4255_v41 = vpop.xlane.xlu0 %4254 }
0x1c7b   :  { %9642 = vrcp.f32 %v4255_v41 }
0x1c7f   :  { %v4421_v10 = vpop.xlane.xlu0 %4420 }
0x1c80   :  { %9644 = vrcp.f32 %v4421_v10  ;;  %v4168_v10 = vld [vmem:[%s10916_s8 + $0xc] sm:$0xf] }
0x1c83   :  { %v4425_v13 = vpop.permute.xlu0 %4424 }
0x1c85   :  { %v9643_v45 = vpop.eup %9642 }
0x1c86   :  { %v4257_v14 = vmul.f32 %v9643_v45, %v9639_v5  ;;  %v10521_v5 = vmul.f32 0.35355338, %v10422_v37  ;;  %v10531_v45 = vsel %vm598_vm4, %v4168_v10, 0 }
0x1c87   :  { %v4594_v18 = vpop.permute.xlu0 %4593 }
0x1c88   :  { %9163 = vmatmul.mubr.msk.f32.vlgmr.msra.gmra.mrb[70].mxu1 %vm265_vm3, %v4257_v14 }
0x1c89   :  { %9171 = vmatpush3.msra.mxu1 %v4425_v13  ;;  %9172 = vmatprep.mubr.msk.f32.mxu1 %vm9732_vm1, %v9731_v1 }
0x1c8a   :  { %v9645_v11 = vpop.eup %9644  ;;  %9181 = vmatprep.subr.bf16.mxu1 %v9731_v1 }
0x1c8b   :  { %v4423_v22 = vmul.f32 %v9645_v11, %v9641_v43 }
0x1c8d   :  { %9173 = vmatmul.mubr.msk.f32.vlgmr.msra.gmra.mrb[72].mxu1 %vm265_vm3, %v4423_v22 }
0x1c8e   :  { %9183 = vmatprep.mubr.msk.bf16.mxu1 %vm9732_vm1, %v9731_v1  ;;  %9182 = vmatpush3.bf16.msra.mxu1 %v10472_v46 }
0x1c8f   :  { %9192 = vmatprep.subr.mxu1 %v9731_v1 }
0x1d5b   :  { %v4330_v23 = vpop.f32.mrb[70].mxu1 }
0x1d5c   :  { %v4334_v47 = vpack.c.bf16 %v4330_v23, %v4330_v23  ;;  %v9164_v48 = vpop.f32.mrb[71].mxu1 }
0x1d5e   :  { %9184 = vmatmul.mubr.msk.bf16.vlgmr.msra.gmra.mrb[76].mxu1 %vm265_vm3, %v4334_v47 }
0x1d5f   :  { %9194 = vmatprep.mubr.msk.f32.mxu1 %vm9732_vm1, %v9731_v1 }
0x1d60   :  { %v4496_v49 = vpop.f32.mrb[72].mxu1 }
0x1d61   :  { %v4500_v50 = vpack.c.bf16 %v4496_v49, %v4496_v49  ;;  %v9174_v51 = vpop.f32.mrb[73].mxu1 }
0x1d63   :  { %9178 = vmatmul.mubr.msk.bf16.vlgmr.msra.gmra.mrb[76].mxu0 %vm265_vm3, %v4500_v50 }
0x1d64   :  { %9188 = vmatpush3.xpose.msk.msra.mxu0 %vm265_vm3, %v4596_v16  ;;  %9189 = vmatprep.mubr.msk.f32.mxu0 %vm9732_vm1, %v9731_v1 }
0x1d65   :  { %9197 = vmatprep.subr.bf16.mxu0 %v9731_v1 }
0x1d6b   :  { %9190 = vmatmul.mubr.msk.f32.vlgmr.msra.gmra.mrb[74].mxu0 %vm265_vm3, %v4594_v18 }
0x1d6c   :  { %9199 = vmatprep.mubr.msk.bf16.mxu0 %vm9732_vm1, %v9731_v1  ;;  %9198 = vmatpush3.bf16.msra.mxu0 %v10508_v57 }
0x1d6d   :  { %9213 = vmatprep.subr.bf16.mxu0 %v9731_v1 }
0x1e31   :  { %v4587_v19 = vpop.f32.mrb[76].mxu1 }
0x1e32   :  { %v9185_v26 = vpop.f32.mrb[77].mxu1 }
0x1e33   :  { %v4590_v21 = vpop.f32.mrb[78].mxu1 }
0x1e34   :  { %v9186_v24 = vpop.f32.mrb[79].mxu1 }
0x1e36   :  { %v4541_v20 = vpop.f32.mrb[76].mxu0 }
0x1e37   :  { %v10487_v25 = vadd.f32 %v4587_v19, %v4541_v20  ;;  %v9179_v28 = vpop.f32.mrb[77].mxu0 }
0x1e38   :  { %v4544_v29 = vpop.f32.mrb[78].mxu0 }
0x1e39   :  { %v9180_v32 = vpop.f32.mrb[79].mxu0 }
0x1e3e   :  { %v4667_v33 = vpop.f32.mrb[74].mxu0 }
0x1e3f   :  { %v9191_v34 = vpop.f32.mrb[75].mxu0  ;;  %v4671_v35 = vsel %vm265_vm3, %v4667_v33, -inf }
0x1e40   :  { %4672 = vmax.xlane.f32.xlu0 %v4671_v35 }
0x1e56   :  { %4682 = vrot.lane.b32.xlu0 %v10420_v53, %s9742_s15 }
0x1e5a   :  { %4806 = vrot.lane.b32.xlu0 %v10429_v39, %s9741_s11 }
0x1ecd   :  { %v4673_v36 = vpop.xlane.xlu0 %4672 }
0x1ece   :  { %v4674_v38 = vsub.f32 %v4667_v33, %v4673_v36 }
0x1ed0   :  { %v4675_v40 = vmul.f32 1.442695, %v4674_v38 }
0x1ed1   :  { %v4683_v42 = vpop.permute.xlu0 %4682 }
0x1ed2   :  { %9646 = vpow2.f32 %v4675_v40  ;;  %9193 = vmatpush3.msra.mxu1 %v4683_v42 }
0x1ed3   :  { %9203 = vmatprep.subr.mxu1 %v9731_v1 }
0x1ed5   :  { %v4807_v56 = vpop.permute.xlu0 %4806 }
0x1edc   :  { %v9647_v12 = vpop.eup %9646 }
0x1edd   :  { %v4677_v27 = vsel %vm265_vm3, %v9647_v12, 0.0 }
0x1ede   :  { %4678 = vadd.xlane.f32.xlu1 %v4677_v27 }
0x1eef   :  { %4808 = vrot.lane.b32.xlu1 %v10420_v53, %s9740_s10 }
0x1f6b   :  { %v4679_v52 = vpop.xlane.xlu1 %4678 }
0x1f6c   :  { %9648 = vrcp.f32 %v4679_v52 }
0x1f6f   :  { %v4809_v55 = vpop.permute.xlu1 %4808 }
0x1f76   :  { %v9649_v54 = vpop.eup %9648 }
0x1f77   :  { %v4681_v39 = vmul.f32 %v9649_v54, %v9647_v12 }
0x1f79   :  { %9195 = vmatmul.mubr.msk.f32.vlgmr.msra.gmra.mrb[74].mxu1 %vm265_vm3, %v4681_v39 }
0x1f7a   :  { %9204 = vmatpush3.xpose.msk.msra.mxu1 %vm265_vm3, %v4809_v55  ;;  %9205 = vmatprep.mubr.msk.f32.mxu1 %vm9732_vm1, %v9731_v1 }
0x1f7b   :  { %9208 = vmatprep.subr.mxu1 %v9731_v1 }
0x1f7d   :  { %9206 = vmatmul.mubr.msk.f32.vlgmr.msra.gmra.mrb[80].mxu1 %vm265_vm3, %v4807_v56 }
0x1f7e   :  { %9210 = vmatprep.mubr.msk.f32.mxu1 %vm9732_vm1, %v9731_v1 }
0x204c   :  { %v4754_v58 = vpop.f32.mrb[74].mxu1 }
0x204d   :  { %v4758_v59 = vpack.c.bf16 %v4754_v58, %v4754_v58  ;;  %v9196_v61 = vpop.f32.mrb[75].mxu1 }
0x204f   :  { %9200 = vmatmul.mubr.msk.bf16.vlgmr.msra.gmra.mrb[80].mxu0 %vm265_vm3, %v4758_v59 }
0x2050   :  { %v4880_v62 = vpop.f32.mrb[80].mxu1  ;;  %9215 = vmatprep.mubr.msk.bf16.mxu0 %vm9732_vm1, %v9731_v1  ;;  %9214 = vmatpush3.bf16.msra.mxu0 %v10531_v45 }
0x2051   :  { %v9207_v63 = vpop.f32.mrb[81].mxu1  ;;  %v4884_v0 = vsel %vm265_vm3, %v4880_v62, -inf  ;;  %9229 = vmatprep.subr.mxu0 %v9731_v1 }
0x2052   :  { %4885 = vmax.xlane.f32.xlu0 %v4884_v0 }
0x2068   :  { %4895 = vrot.lane.b32.xlu0 %v10420_v53, %s9743_s16 }
0x206c   :  { %5187 = vrot.lane.b32.xlu0 %v10422_v37, %s9735_s9 }
0x2070   :  { %5185 = vrot.lane.b32.xlu0 %v10521_v5, %s9734_s5 }
0x20df   :  { %v4886_v7 = vpop.xlane.xlu0 %4885 }
0x20e0   :  { %v4887_v43 = vsub.f32 %v4880_v62, %v4886_v7 }
0x20e2   :  { %v4888_v8 = vmul.f32 1.442695, %v4887_v43 }
0x20e3   :  { %v4896_v44 = vpop.permute.xlu0 %4895 }
0x20e4   :  { %9650 = vpow2.f32 %v4888_v8  ;;  %9209 = vmatpush3.msra.mxu1 %v4896_v44 }
0x20e5   :  { %9219 = vmatprep.subr.mxu1 %v9731_v1 }
0x20e7   :  { %v5188_v18 = vpop.permute.xlu0 %5187 }
0x20eb   :  { %v5186_v24 = vpop.permute.xlu0 %5185 }
0x20ee   :  { %v9651_v41 = vpop.eup %9650 }
0x20ef   :  { %v4890_v53 = vsel %vm265_vm3, %v9651_v41, 0.0 }
0x20f0   :  { %4891 = vadd.xlane.f32.xlu1 %v4890_v53 }
0x2101   :  { %5020 = vrot.lane.b32.xlu1 %v10422_v37, %s9733_s0 }
0x2122   :  { %v4799_v14 = vpop.f32.mrb[80].mxu0 }
0x2123   :  { %v4805_v13 = vadd.f32 %v4799_v14, %v10487_v25  ;;  %v9201_v11 = vpop.f32.mrb[81].mxu0 }
0x2124   :  { %v4802_v22 = vpop.f32.mrb[82].mxu0 }
0x2125   :  { %v9202_v15 = vpop.f32.mrb[83].mxu0 }
0x217d   :  { %v4892_v23 = vpop.xlane.xlu1 %4891 }
0x217e   :  { %9652 = vrcp.f32 %v4892_v23 }
0x2181   :  { %v5021_v49 = vpop.permute.xlu1 %5020 }
0x2188   :  { %v9653_v47 = vpop.eup %9652 }
0x2189   :  { %v4894_v48 = vmul.f32 %v9653_v47, %v9651_v41 }
0x218b   :  { %9211 = vmatmul.mubr.msk.f32.vlgmr.msra.gmra.mrb[82].mxu1 %vm265_vm3, %v4894_v48 }
0x218c   :  { %9220 = vmatpush3.xpose.msk.msra.mxu1 %vm265_vm3, %v5021_v49  ;;  %9221 = vmatprep.mubr.msk.f32.mxu1 %vm9732_vm1, %v9731_v1 }
0x218d   :  { %9224 = vmatprep.subr.mxu1 %v9731_v1 }
0x218f   :  { %9222 = vmatmul.mubr.msk.f32.vlgmr.msra.gmra.mrb[84].mxu1 %vm265_vm3, %v10521_v5 }
0x2190   :  { %9226 = vmatprep.mubr.msk.f32.mxu1 %vm9732_vm1, %v9731_v1 }
0x225e   :  { %v4967_v50 = vpop.f32.mrb[82].mxu1 }
0x225f   :  { %v4971_v51 = vpack.c.bf16 %v4967_v50, %v4967_v50  ;;  %v9212_v16 = vpop.f32.mrb[83].mxu1 }
0x2261   :  { %9216 = vmatmul.mubr.msk.bf16.vlgmr.msra.gmra.mrb[84].mxu0 %vm265_vm3, %v4971_v51 }
0x2262   :  { %9230 = vmatpush3.xpose.msk.msra.mxu0 %vm265_vm3, %v5188_v18  ;;  %v5093_v19 = vpop.f32.mrb[84].mxu1  ;;  %9231 = vmatprep.mubr.msk.f32.mxu0 %vm9732_vm1, %v9731_v1 }
0x2263   :  { %v9223_v26 = vpop.f32.mrb[85].mxu1  ;;  %v5097_v21 = vsel %vm265_vm3, %v5093_v19, -inf  ;;  %9239 = vmatprep.subr.bf16.mxu0 %v9731_v1 }
0x2264   :  { %5098 = vmax.xlane.f32.xlu0 %v5097_v21 }
0x2269   :  { %9232 = vmatmul.mubr.msk.f32.vlgmr.msra.gmra.mrb[88].mxu0 %vm265_vm3, %v5186_v24 }
0x226a   :  { %9240 = vmatpush3.bf16.msra.mxu0 %v10459_v9  ;;  %9241 = vmatprep.mubr.msk.bf16.mxu0 %vm9732_vm1, %v9731_v1 }
0x226b   :  { %9251 = vmatprep.subr.mxu0 %v9731_v1 }
0x22f1   :  { %v5099_v20 = vpop.xlane.xlu0 %5098 }
0x22f2   :  { %v5100_v25 = vsub.f32 %v5093_v19, %v5099_v20 }
0x22f4   :  { %v5101_v28 = vmul.f32 1.442695, %v5100_v25 }
0x22f6   :  { %9654 = vpow2.f32 %v5101_v28 }
0x2300   :  { %v9655_v29 = vpop.eup %9654 }
0x2301   :  { %v5103_v32 = vsel %vm265_vm3, %v9655_v29, 0.0 }
0x2302   :  { %5104 = vadd.xlane.f32.xlu0 %v5103_v32 }
0x2334   :  { %v5012_v33 = vpop.f32.mrb[84].mxu0 }
0x2335   :  { %v10557_v34 = vadd.f32 %v5012_v33, %v4805_v13  ;;  %v9217_v35 = vpop.f32.mrb[85].mxu0 }
0x2336   :  { %v5015_v36 = vpop.f32.mrb[86].mxu0 }
0x2337   :  { %v9218_v38 = vpop.f32.mrb[87].mxu0 }
0x233c   :  { %v5259_v9 = vpop.f32.mrb[88].mxu0 }
0x233d   :  { %v9233_v40 = vpop.f32.mrb[89].mxu0  ;;  %v5263_v42 = vsel %vm265_vm3, %v5259_v9, -inf }
0x233e   :  { %5264 = vmax.xlane.f32.xlu1 %v5263_v42 }
0x234f   :  { %5108 = vrot.lane.b32.xlu1 %v10422_v37, %s9737_s17 }
0x2353   :  { %5439 = vrot.lane.b32.xlu1 %v10422_v37, %s9738_s21 }
0x2357   :  { %5437 = vrot.lane.b32.xlu1 %v10521_v5, %s9739_s7 }
0x238f   :  { %v5105_v12 = vpop.xlane.xlu0 %5104 }
0x2390   :  { %9656 = vrcp.f32 %v5105_v12 }
0x239a   :  { %v9657_v52 = vpop.eup %9656 }
0x239b   :  { %v5107_v55 = vmul.f32 %v9657_v52, %v9655_v29  ;;  %v8368_v29 = vld [vmem:[%s10917_s14] ss:$0 sm:$0xff] }
0x239c   :  { %v5864_v33 = vadd.f32 %v8368_v29, %v10557_v34 }
0x239e   :  { %v5866_v42 = vadd.f32 %v5864_v33, %v10410_v31 }
0x23a0   :  { %v5868_v12 = vsel %vm211_vm2, %v5866_v42, 0.0 }
0x23cb   :  { %v5265_v27 = vpop.xlane.xlu1 %5264 }
0x23cc   :  { %v5266_v54 = vsub.f32 %v5259_v9, %v5265_v27 }
0x23ce   :  { %v5267_v39 = vmul.f32 1.442695, %v5266_v54 }
0x23cf   :  { %v5109_v56 = vpop.permute.xlu1 %5108 }
0x23d0   :  { %9658 = vpow2.f32 %v5267_v39  ;;  %9225 = vmatpush3.msra.mxu1 %v5109_v56 }
0x23d1   :  { %9227 = vmatmul.mubr.msk.f32.vlgmr.msra.gmra.mrb[86].mxu1 %vm265_vm3, %v5107_v55  ;;  %9234 = vmatprep.subr.mxu1 %v9731_v1 }
0x23d2   :  { %9236 = vmatprep.mubr.msk.f32.mxu1 %vm9732_vm1, %v9731_v1 }
0x23d3   :  { %v5440_v53 = vpop.permute.xlu1 %5439 }
0x23da   :  { %v9659_v17 = vpop.eup %9658 }
0x23db   :  { %v5269_v58 = vsel %vm265_vm3, %v9659_v17, 0.0 }
0x23dc   :  { %5270 = vadd.xlane.f32.xlu0 %v5269_v58 }
0x23f2   :  { %5274 = vrot.lane.b32.xlu0 %v10422_v37, %s9736_s13 }
0x2469   :  { %v5271_v59 = vpop.xlane.xlu0 %5270 }
0x246a   :  { %9660 = vrcp.f32 %v5271_v59 }
0x246d   :  { %v5275_v61 = vpop.permute.xlu0 %5274 }
0x246e   :  { %9235 = vmatpush3.msra.mxu1 %v5275_v61 }
0x246f   :  { %9245 = vmatprep.subr.bf16.mxu1 %v9731_v1 }
0x2474   :  { %v9661_v62 = vpop.eup %9660 }
0x2475   :  { %v5273_v63 = vmul.f32 %v9661_v62, %v9659_v17 }
0x2477   :  { %9237 = vmatmul.mubr.msk.f32.vlgmr.msra.gmra.mrb[88].mxu1 %vm265_vm3, %v5273_v63 }
0x2478   :  { %9246 = vmatpush3.bf16.msra.mxu1 %v10472_v46  ;;  %9247 = vmatprep.mubr.msk.bf16.mxu1 %vm9732_vm1, %v9731_v1  ;;  %v5438_v46 = vpop.permute.xlu1 %5437 }
0x2479   :  { %9256 = vmatprep.subr.mxu1 %v9731_v1 }
0x24a4   :  { %v5180_v0 = vpop.f32.mrb[86].mxu1 }
0x24a5   :  { %v5184_v7 = vpack.c.bf16 %v5180_v0, %v5180_v0  ;;  %v9228_v43 = vpop.f32.mrb[87].mxu1 }
0x24a7   :  { %9248 = vmatmul.mubr.msk.bf16.vlgmr.msra.gmra.mrb[92].mxu1 %vm265_vm3, %v5184_v7 }
0x24a8   :  { %9258 = vmatprep.mubr.msk.f32.mxu1 %vm9732_vm1, %v9731_v1 }
0x254a   :  { %v5346_v8 = vpop.f32.mrb[88].mxu1 }
0x254b   :  { %v5350_v44 = vpack.c.bf16 %v5346_v8, %v5346_v8  ;;  %v9238_v41 = vpop.f32.mrb[89].mxu1 }
0x254d   :  { %9242 = vmatmul.mubr.msk.bf16.vlgmr.msra.gmra.mrb[92].mxu0 %vm265_vm3, %v5350_v44 }
0x254e   :  { %9252 = vmatpush3.xpose.msk.msra.mxu0 %vm265_vm3, %v5440_v53  ;;  %9253 = vmatprep.mubr.msk.f32.mxu0 %vm9732_vm1, %v9731_v1 }
0x254f   :  { %9261 = vmatprep.subr.bf16.mxu0 %v9731_v1 }
0x2555   :  { %9254 = vmatmul.mubr.msk.f32.vlgmr.msra.gmra.mrb[90].mxu0 %vm265_vm3, %v5438_v46 }
0x2556   :  { %9262 = vmatpush3.bf16.msra.mxu0 %v10508_v57  ;;  %9263 = vmatprep.mubr.msk.bf16.mxu0 %vm9732_vm1, %v9731_v1 }
0x2557   :  { %9277 = vmatprep.subr.bf16.mxu0 %v9731_v1 }
0x257a   :  { %v5431_v10 = vpop.f32.mrb[92].mxu1 }
0x257b   :  { %v9249_v14 = vpop.f32.mrb[93].mxu1 }
0x257c   :  { %v5434_v13 = vpop.f32.mrb[94].mxu1 }
0x257d   :  { %v9250_v11 = vpop.f32.mrb[95].mxu1 }
0x2620   :  { %v5388_v22 = vpop.f32.mrb[92].mxu0 }
0x2621   :  { %v5432_v15 = vadd.f32 %v5431_v10, %v5388_v22  ;;  %v9243_v23 = vpop.f32.mrb[93].mxu0 }
0x2622   :  { %v5391_v47 = vpop.f32.mrb[94].mxu0 }
0x2623   :  { %v9244_v48 = vpop.f32.mrb[95].mxu0 }
0x2628   :  { %v5511_v49 = vpop.f32.mrb[90].mxu0 }
0x2629   :  { %v9255_v50 = vpop.f32.mrb[91].mxu0  ;;  %v5515_v51 = vsel %vm265_vm3, %v5511_v49, -inf }
0x262a   :  { %5516 = vmax.xlane.f32.xlu0 %v5515_v51  ;;  %v5913_v51 = vld [vmem:[%s10918_s19] sm:$0xff] }
0x2640   :  { %5526 = vrot.lane.b32.xlu0 %v10422_v37, %s9742_s15 }
0x2644   :  { %5647 = vrot.lane.b32.xlu0 %v10521_v5, %s9741_s11 }
0x26b7   :  { %v5517_v57 = vpop.xlane.xlu0 %5516 }
0x26b8   :  { %v5518_v16 = vsub.f32 %v5511_v49, %v5517_v57  ;;  %v5914_v57 = vld [vmem:[%s10918_s19 + $0x8] sm:$0xff] }
0x26ba   :  { %v5519_v18 = vmul.f32 1.442695, %v5518_v16 }
0x26bb   :  { %v5527_v19 = vpop.permute.xlu0 %5526 }
0x26bc   :  { %9662 = vpow2.f32 %v5519_v18  ;;  %9257 = vmatpush3.msra.mxu1 %v5527_v19  ;;  %v5916_v18 = vld [vmem:[%s10918_s19 + $0x48] sm:$0xff] }
0x26bd   :  { %9267 = vmatprep.subr.mxu1 %v9731_v1 }
0x26bf   :  { %v5648_v28 = vpop.permute.xlu0 %5647 }
0x26c6   :  { %v9663_v26 = vpop.eup %9662 }
0x26c7   :  { %v5521_v21 = vsel %vm265_vm3, %v9663_v26, 0.0 }
0x26c8   :  { %5522 = vadd.xlane.f32.xlu1 %v5521_v21  ;;  %v8374_v21 = vcombine.high %v5914_v57, %v5916_v18 }
0x26d9   :  { %5649 = vrot.lane.b32.xlu1 %v10422_v37, %s9740_s10 }
0x2755   :  { %v5523_v24 = vpop.xlane.xlu1 %5522 }
0x2756   :  { %9664 = vrcp.f32 %v5523_v24  ;;  %v5917_v24 = vld [vmem:[%s10918_s19 + $0x80] sm:$0xff] }
0x2759   :  { %v5650_v25 = vpop.permute.xlu1 %5649 }
0x2760   :  { %v9665_v20 = vpop.eup %9664 }
0x2761   :  { %v5525_v5 = vmul.f32 %v9665_v20, %v9663_v26  ;;  %v8373_v26 = vcombine.low %v5914_v57, %v5916_v18  ;;  %v5919_v20 = vld [vmem:[%s10918_s19 + $0xc0] sm:$0xff]  ;;  %v9479_v57 = vld [vmem:[%s10921_s20 + $0x190] sm:$0xff]   ;;  %v9481_v18 = vld [vmem:[%s10921_s20 + $0x1d8] sm:$0xff]  }
0x2763   :  { %9259 = vmatmul.mubr.msk.f32.vlgmr.msra.gmra.mrb[90].mxu1 %vm265_vm3, %v5525_v5  ;;  %v5918_v5 = vld [vmem:[%s10918_s19 + $0x88] sm:$0xff] }
0x2764   :  { %9268 = vmatpush3.xpose.msk.msra.mxu1 %vm265_vm3, %v5650_v25  ;;  %9269 = vmatprep.mubr.msk.f32.mxu1 %vm9732_vm1, %v9731_v1  ;;  %v8376_v25 = vcombine.high %v5917_v24, %v5919_v20 }
0x2765   :  { %9272 = vmatprep.subr.mxu1 %v9731_v1 }
0x2767   :  { %9270 = vmatmul.mubr.msk.f32.vlgmr.msra.gmra.mrb[96].mxu1 %vm265_vm3, %v5648_v28  ;;  %v5920_v28 = vld [vmem:[%s10918_s19 + $0xc8] sm:$0xff] }
0x2768   :  { %9274 = vmatprep.mubr.msk.f32.mxu1 %vm9732_vm1, %v9731_v1  ;;  %v8378_v33 = vcombine.high %v5918_v5, %v5920_v28 }
0x2836   :  { %v5598_v32 = vpop.f32.mrb[90].mxu1 }
0x2837   :  { %v5602_v35 = vpack.c.bf16 %v5598_v32, %v5598_v32  ;;  %v9260_v36 = vpop.f32.mrb[91].mxu1  ;;  %v8377_v32 = vcombine.low %v5918_v5, %v5920_v28  ;;  %v9487_v5 = vld [vmem:[%s10921_s20 + $0x1a0] sm:$0xff]   ;;  %v9489_v28 = vld [vmem:[%s10921_s20 + $0x1e8] sm:$0xff]  }
0x2838   :  { %v6150_v36 = vld [vmem:[%s10918_s19 + $0x50] sm:$0xff] }
0x2839   :  { %9264 = vmatmul.mubr.msk.bf16.vlgmr.msra.gmra.mrb[96].mxu0 %vm265_vm3, %v5602_v35  ;;  %v6148_v35 = vld [vmem:[%s10918_s19 + $0x10] sm:$0xff] }
0x283a   :  { %v5721_v38 = vpop.f32.mrb[96].mxu1  ;;  %9278 = vmatpush3.bf16.msra.mxu0 %v10531_v45  ;;  %9279 = vmatprep.mubr.msk.bf16.mxu0 %vm9732_vm1, %v9731_v1 }
0x283b   :  { %v9271_v9 = vpop.f32.mrb[97].mxu1  ;;  %v5725_v40 = vsel %vm265_vm3, %v5721_v38, -inf  ;;  %6029 = vmatprep.subr.bf16.mxu0 %v8374_v21  ;;  %v9484_v21 = vld [vmem:[%s10921_s20 + $0x160] sm:$0xff]  }
0x283c   :  { %5726 = vmax.xlane.f32.xlu1 %v5725_v40  ;;  %v8382_v9 = vcombine.high %v6148_v35, %v6150_v36  ;;  %v6151_v40 = vld [vmem:[%s10918_s19 + $0x58] sm:$0xff] }
0x2840   :  { %5869 = vadd.xlane.f32.xlu1 %v5868_v12 }
0x28c9   :  { %v5727_v34 = vpop.xlane.xlu1 %5726 }
0x28ca   :  { %v5728_v27 = vsub.f32 %v5721_v38, %v5727_v34  ;;  %v6149_v38 = vld [vmem:[%s10918_s19 + $0x18] sm:$0xff] }
0x28cb   :  { %v8383_v12 = vcombine.low %v6149_v38, %v6151_v40  ;;  %v8384_v34 = vcombine.high %v6149_v38, %v6151_v40  ;;  %v9495_v38 = vld [vmem:[%s10921_s20 + $0x1b0] sm:$0xff]   ;;  %v9497_v40 = vld [vmem:[%s10921_s20 + $0x1f8] sm:$0xff]  }
0x28cc   :  { %v5729_v52 = vmul.f32 1.442695, %v5728_v27 }
0x28ce   :  { %9666 = vpow2.f32 %v5729_v52 }
0x28d8   :  { %v9667_v54 = vpop.eup %9666 }
0x28d9   :  { %v5731_v39 = vsel %vm265_vm3, %v9667_v54, 0.0 }
0x28da   :  { %5732 = vadd.xlane.f32.xlu0 %v5731_v39 }
0x28f0   :  { %5736 = vrot.lane.b32.xlu0 %v10422_v37, %s9743_s16  ;;  %v5870_v37 = vpop.xlane.xlu1 %5869 }
0x28f1   :  { %v5874_v43 = vmul.f32 0.03125, %v5870_v37  ;;  %v6153_v37 = vld [vmem:[%s10918_s19 + $0x98] sm:$0xff] }
0x28f3   :  { %v5876_v46 = vsub.f32 %v5866_v42, %v5874_v43  ;;  %v8381_v42 = vcombine.low %v6148_v35, %v6150_v36  ;;  %v6155_v43 = vld [vmem:[%s10918_s19 + $0xd8] sm:$0xff]  ;;  %v9493_v35 = vld [vmem:[%s10921_s20 + $0x1f0] sm:$0xff]  }
0x28f4   :  { %v9494_v36 = vld [vmem:[%s10921_s20 + $0x130] sm:$0xff]  }
0x28f5   :  { %v5878_v22 = vmul.f32 %v5876_v46, %v5876_v46 }
0x290c   :  { %v5640_v45 = vpop.f32.mrb[96].mxu0 }
0x290d   :  { %v5646_v55 = vadd.f32 %v5640_v45, %v5432_v15  ;;  %v9265_v56 = vpop.f32.mrb[97].mxu0  ;;  %v5880_v15 = vsel %vm211_vm2, %v5878_v22, 0.0  ;;  %v9470_v22 = vld [vmem:[%s10921_s20 + $0x100] sm:$0xff]  }
0x290e   :  { %v5643_v17 = vpop.f32.mrb[98].mxu0 }
0x290f   :  { %v9266_v31 = vpop.f32.mrb[99].mxu0 }
0x2910   :  { %v8369_v31 = vld [vmem:[%s10919_s24] ss:$0 sm:$0xff] }
0x2967   :  { %v5733_v58 = vpop.xlane.xlu0 %5732 }
0x2968   :  { %9668 = vrcp.f32 %v5733_v58 }
0x296b   :  { %v5737_v59 = vpop.permute.xlu0 %5736 }
0x296c   :  { %9273 = vmatpush3.msra.mxu1 %v5737_v59 }
0x2972   :  { %v9669_v61 = vpop.eup %9668 }
0x2973   :  { %v5735_v62 = vmul.f32 %v9669_v61, %v9667_v54 }
0x2975   :  { %9275 = vmatmul.mubr.msk.f32.vlgmr.msra.gmra.mrb[98].mxu1 %vm265_vm3, %v5735_v62  ;;  %v8370_v62 = vld [vmem:[%s10920_s30] ss:$0 sm:$0xff] }
0x2976   :  { %6018 = vmatprep.mubr.bf16.mxu1 %v9744_v60 }
0x2a48   :  { %v5808_v63 = vpop.f32.mrb[98].mxu1 }
0x2a49   :  { %v5812_v0 = vpack.c.bf16 %v5808_v63, %v5808_v63  ;;  %v9276_v7 = vpop.f32.mrb[99].mxu1 }
0x2a4a   :  { %v6154_v7 = vld [vmem:[%s10918_s19 + $0xd0] sm:$0xff] }
0x2a4b   :  { %9280 = vmatmul.mubr.msk.bf16.vlgmr.msra.gmra.mrb[100].mxu0 %vm265_vm3, %v5812_v0  ;;  %v6152_v0 = vld [vmem:[%s10918_s19 + $0x90] sm:$0xff] }
0x2a4c   :  { %6061 = vmatprep.mubr.bf16.mxu0 %v9744_v60  ;;  %6030 = vmatpush1.bf16.msra.mxu0 %v8373_v26  ;;  %v9483_v26 = vld [vmem:[%s10921_s20 + $0x198] sm:$0xff]  }
0x2a4d   :  { %6031 = vmatprep.subr.bf16.mxu0 %v8378_v33  ;;  %v9492_v33 = vld [vmem:[%s10921_s20 + $0x170] sm:$0xff]  }
0x2a50   :  { %6032 = vmatpush1.bf16.msra.mxu0 %v8377_v32  ;;  %v9491_v32 = vld [vmem:[%s10921_s20 + $0x1a8] sm:$0xff]  }
0x2a51   :  { %6261 = vmatprep.subr.bf16.mxu0 %v8384_v34  ;;  %v9500_v34 = vld [vmem:[%s10921_s20 + $0x40] sm:$0xff]  }
0x2b1e   :  { %v5850_v8 = vpop.f32.mrb[100].mxu0 }
0x2b1f   :  { %v5856_v44 = vadd.f32 %v5850_v8, %v5646_v55  ;;  %v9281_v41 = vpop.f32.mrb[101].mxu0 }
0x2b20   :  { %v5853_v53 = vpop.f32.mrb[102].mxu0 }
0x2b21   :  { %v5865_v10 = vadd.f32 %v8368_v29, %v5856_v44  ;;  %v9282_v14 = vpop.f32.mrb[103].mxu0  ;;  %v8375_v29 = vcombine.low %v5917_v24, %v5919_v20  ;;  %v8386_v53 = vcombine.high %v6152_v0, %v6154_v7  ;;  %v9485_v24 = vld [vmem:[%s10921_s20 + $0x1e0] sm:$0xff]  }
0x2b22   :  { %v8387_v14 = vcombine.low %v6153_v37, %v6155_v43  ;;  %v9486_v20 = vld [vmem:[%s10921_s20 + $0x120] sm:$0xff]  }
0x2b23   :  { %v5867_v13 = vadd.f32 %v5865_v10, %v10412_v30  ;;  %v5915_v30 = vld [vmem:[%s10918_s19 + $0x40] sm:$0xff]  ;;  %v8385_v10 = vcombine.low %v6152_v0, %v6154_v7 }
0x2b24   :  { %v8372_v16 = vcombine.high %v5913_v51, %v5915_v30  ;;  %v8371_v19 = vcombine.low %v5913_v51, %v5915_v30  ;;  %v9477_v51 = vld [vmem:[%s10921_s20 + $0x1d0] sm:$0xff]  }
0x2b25   :  { %v5871_v11 = vsel %vm211_vm2, %v5867_v13, 0.0  ;;  %v9478_v30 = vld [vmem:[%s10921_s20 + $0x110] sm:$0xff]  }
0x2b26   :  { %5872 = vadd.xlane.f32.xlu1 %v5871_v11  ;;  %5986 = vmatprep.subr.bf16.mxu1 %v8372_v16  ;;  %v9469_v11 = vld [vmem:[%s10921_s20 + $0x1c0] sm:$0xff]   ;;  %v9480_v16 = vld [vmem:[%s10921_s20 + $0x158] sm:$0xff]  }
0x2b27   :  { %5987 = vmatpush1.bf16.msra.mxu1 %v8371_v19  ;;  %v9482_v19 = vld [vmem:[%s10921_s20 + $0x118] sm:$0xff]  }
0x2b28   :  { %5988 = vmatprep.subr.bf16.mxu1 %v8376_v25  ;;  %v9488_v25 = vld [vmem:[%s10921_s20 + $0x168] sm:$0xff]  }
0x2b2a   :  { %5881 = vadd.xlane.f32.xlu1 %v5880_v15  ;;  %v9471_v15 = vld [vmem:[%s10921_s20 + $0x180] sm:$0xff]  }
0x2b2b   :  { %5989 = vmatpush1.bf16.msra.mxu1 %v8375_v29  ;;  %v9490_v29 = vld [vmem:[%s10921_s20 + $0x128] sm:$0xff]  }
0x2b2c   :  { %6218 = vmatprep.subr.bf16.mxu1 %v8382_v9  ;;  %v9496_v9 = vld [vmem:[%s10921_s20 + $0x178] sm:$0xff]  }
0x2bb3   :  { %v5873_v23 = vpop.xlane.xlu1 %5872 }
0x2bb4   :  { %v5875_v47 = vmul.f32 0.03125, %v5873_v23  ;;  %v9472_v23 = vld [vmem:[%s10921_s20 + $0x148] sm:$0xff]  }
0x2bb6   :  { %v5877_v48 = vsub.f32 %v5867_v13, %v5875_v47  ;;  %v9468_v13 = vld [vmem:[%s10921_s20 + $0x140] sm:$0xff]   ;;  %v9473_v47 = vld [vmem:[%s10921_s20 + $0x1c8] sm:$0xff]  }
0x2bb7   :  { %v5882_v27 = vpop.xlane.xlu1 %5881 }
0x2bb8   :  { %v5879_v49 = vmul.f32 %v5877_v48, %v5877_v48  ;;  %v5886_v52 = vmul.f32 0.03125, %v5882_v27  ;;  %v9501_v27 = vld [vmem:[%s10921_s20 + $0xc0] sm:$0xff]  }
0x2bba   :  { %v5883_v50 = vsel %vm211_vm2, %v5879_v49, 0.0  ;;  %v5888_v54 = vadd.f32 1e-05, %v5886_v52  ;;  %v9475_v49 = vld [vmem:[%s10921_s20 + $0x188] sm:$0xff]   ;;  %v5921_v52 = vld [vmem:[%s10922_s18] sm:$0xf] }
0x2bbb   :  { %5884 = vadd.xlane.f32.xlu1 %v5883_v50  ;;  %v9476_v50 = vld [vmem:[%s10921_s20 + $0x150] sm:$0xff]  }
0x2bbc   :  { %9670 = vrsqrt.f32 %v5888_v54  ;;  %v5926_v54 = vrot.slane %v5921_v52, %v10207_v2 }
0x2bc6   :  { %v9671_v56 = vpop.eup %9670 }
0x2bc7   :  { %v5892_v17 = vmul.f32 %v9671_v56, %v5876_v46  ;;  %v8388_v46 = vcombine.high %v6153_v37, %v6155_v43 }
0x2bc9   :  { %v5901_v59 = vmul.f32 %v8369_v31, %v5892_v17 }
0x2bcb   :  { %v10647_v8 = vadd.f32 %v8370_v62, %v5901_v59 }
0x2c48   :  { %v5885_v39 = vpop.xlane.xlu1 %5884 }
0x2c49   :  { %v5887_v45 = vmul.f32 0.03125, %v5885_v39  ;;  %v5934_v39 = vrot.slane %v5921_v52, %v10209_v3 }
0x2c4b   :  { %v5889_v55 = vadd.f32 1e-05, %v5887_v45  ;;  %v5930_v45 = vrot.slane %v5921_v52, %v10212_v6 }
0x2c4d   :  { %9672 = vrsqrt.f32 %v5889_v55  ;;  %v5938_v55 = vrot.slane %v5921_v52, %v10214_v4 }
0x2c57   :  { %v9673_v58 = vpop.eup %9672 }
0x2c58   :  { %v5893_v61 = vmul.f32 %v9673_v58, %v5877_v48  ;;  %v9474_v48 = vld [vmem:[%s10921_s20 + $0x108] sm:$0xff]  }
0x2c5a   :  { %v5902_v63 = vmul.f32 %v8369_v31, %v5893_v61  ;;  %v6156_v31 = vld [vmem:[%s10922_s18 + $0x4] sm:$0xf] }
0x2c5c   :  { %v10649_v44 = vadd.f32 %v8370_v62, %v5902_v63 }
0x2c5e   :  { %v10653_v41 = vpack.c.bf16 %v10649_v44, %v10647_v8 }
0x2c60   :  { %8379 = vmatmul.mubr.msk.bf16.vlgmr.msra.gmra.mrb[100].mxu1 %vm211_vm2, %v10653_v41  ;;  %8380 = vmatmul.mubr.msk.bf16.vlgmr.msra.gmra.mrb[104].mxu0 %vm211_vm2, %v10653_v41 }
0x2c61   :  { %6219 = vmatpush1.bf16.msra.mxu1 %v8381_v42  ;;  %6262 = vmatpush1.bf16.msra.mxu0 %v8383_v12  ;;  %v9498_v42 = vld [vmem:[%s10921_s20 + $0x138] sm:$0xff]  }
0x2c62   :  { %6220 = vmatprep.subr.bf16.mxu1 %v8386_v53  ;;  %6263 = vmatprep.subr.bf16.mxu0 %v8388_v46  ;;  %v9499_v12 = vld [vmem:[%s10921_s20 + $0x1b8] sm:$0xff]  }
0x2c63   :  { %6250 = vmatprep.mubr.bf16.mxu1 %v9744_v60  ;;  %6293 = vmatprep.mubr.bf16.mxu0 %v9744_v60 }
0x2c65   :  { %6221 = vmatpush1.bf16.msra.mxu1 %v8385_v10  ;;  %6264 = vmatpush1.bf16.msra.mxu0 %v8387_v14  ;;  %v6161_v14 = vrot.slane %v6156_v31, %v10207_v2 }
0x2c66   :  { %8826 = vmatprep.subr.bf16.mxu1 %v9468_v13  ;;  %8848 = vmatprep.subr.bf16.mxu0 %v9469_v11  ;;  %v6169_v13 = vrot.slane %v6156_v31, %v10209_v3 }
0x2c68   :  { %8389 = vmatmul.mubr.msk.bf16.vlgmr.msra.gmra.mrb[104].mxu1 %vm211_vm2, %v10653_v41  ;;  %8390 = vmatmul.mubr.msk.bf16.vlgmr.msra.gmra.mrb[108].mxu0 %vm211_vm2, %v10653_v41 }
0x2c69   :  { %8827 = vmatpush3.bf16.msra.mxu1 %v9470_v22  ;;  %8849 = vmatpush3.bf16.msra.mxu0 %v9471_v15  ;;  %v6165_v15 = vrot.slane %v6156_v31, %v10212_v6 }
0x2c6a   :  { %8828 = vmatprep.subr.bf16.mxu1 %v9472_v23  ;;  %8850 = vmatprep.subr.bf16.mxu0 %v9473_v47  ;;  %v6173_v23 = vrot.slane %v6156_v31, %v10214_v4 }
0x2c6d   :  { %8829 = vmatpush3.bf16.msra.mxu1 %v9474_v48  ;;  %8851 = vmatpush3.bf16.msra.mxu0 %v9475_v49 }
0x2c6e   :  { %8830 = vmatprep.subr.bf16.mxu1 %v9476_v50  ;;  %8852 = vmatprep.subr.bf16.mxu0 %v9477_v51 }
0x2c71   :  { %8831 = vmatpush3.bf16.msra.mxu1 %v9478_v30  ;;  %8853 = vmatpush3.bf16.msra.mxu0 %v9479_v57 }
0x2c72   :  { %8832 = vmatprep.subr.bf16.mxu1 %v9480_v16  ;;  %8854 = vmatprep.subr.bf16.mxu0 %v9481_v18 }
0x2c75   :  { %8833 = vmatpush3.bf16.msra.mxu1 %v9482_v19  ;;  %8855 = vmatpush3.bf16.msra.mxu0 %v9483_v26 }
0x2c76   :  { %8834 = vmatprep.subr.bf16.mxu1 %v9484_v21  ;;  %8856 = vmatprep.subr.bf16.mxu0 %v9485_v24 }
0x2c79   :  { %8835 = vmatpush3.bf16.msra.mxu1 %v9486_v20  ;;  %8857 = vmatpush3.bf16.msra.mxu0 %v9487_v5 }
0x2c7a   :  { %8836 = vmatprep.subr.bf16.mxu1 %v9488_v25  ;;  %8858 = vmatprep.subr.bf16.mxu0 %v9489_v28 }
0x2c7d   :  { %8837 = vmatpush3.bf16.msra.mxu1 %v9490_v29  ;;  %8859 = vmatpush3.bf16.msra.mxu0 %v9491_v32 }
0x2c7e   :  { %8838 = vmatprep.subr.bf16.mxu1 %v9492_v33  ;;  %8860 = vmatprep.subr.bf16.mxu0 %v9493_v35 }
0x2c81   :  { %8839 = vmatpush3.bf16.msra.mxu1 %v9494_v36  ;;  %8861 = vmatpush3.bf16.msra.mxu0 %v9495_v38 }
0x2c82   :  { %8840 = vmatprep.subr.bf16.mxu1 %v9496_v9  ;;  %8862 = vmatprep.subr.bf16.mxu0 %v9497_v40 }
0x2c85   :  { %8841 = vmatpush3.bf16.msra.mxu1 %v9498_v42  ;;  %8863 = vmatpush3.bf16.msra.mxu0 %v9499_v12 }
0x2c86   :  { %8870 = vmatprep.subr.bf16.mxu1 %v9500_v34  ;;  %8892 = vmatprep.subr.bf16.mxu0 %v9501_v27 }
0x2d33   :  { %v6020_v56 = vpop.f32.mrb[100].mxu1  ;;  %v6063_v17 = vpop.f32.mrb[104].mxu0 }
0x2d34   :  { %v6021_v58 = vadd.f32 %v6020_v56, %v5926_v54  ;;  %v6064_v59 = vadd.f32 %v6063_v17, %v5934_v39  ;;  %v6022_v61 = vpop.f32.mrb[101].mxu1  ;;  %v6065_v62 = vpop.f32.mrb[105].mxu0 }
0x2d35   :  { %v6023_v63 = vadd.f32 %v6022_v61, %v5930_v45  ;;  %v6066_v0 = vadd.f32 %v6065_v62, %v5938_v55  ;;  %v6024_v7 = vpop.f32.mrb[102].mxu1  ;;  %v6067_v37 = vpop.f32.mrb[106].mxu0  ;;  %v9502_v62 = vld [vmem:[%s10921_s20] sm:$0xff]  }
0x2d36   :  { %v6025_v43 = vadd.f32 %v6024_v7, %v5926_v54  ;;  %v6068_v53 = vadd.f32 %v6067_v37, %v5934_v39  ;;  %v6026_v46 = vpop.f32.mrb[103].mxu1  ;;  %v6069_v10 = vpop.f32.mrb[107].mxu0  ;;  %v6072_v47 = vmax.f32 %v6021_v58, 0.0  ;;  %v6074_v48 = vmax.f32 %v6064_v59, 0.0  ;;  %v9505_v7 = vld [vmem:[%s10921_s20 + $0xc8] sm:$0xff]  }
0x2d37   :  { %v6027_v11 = vadd.f32 %v6026_v46, %v5930_v45  ;;  %v6070_v22 = vadd.f32 %v6069_v10, %v5938_v55  ;;  %v6073_v51 = vmax.f32 %v6023_v63, 0.0  ;;  %v6075_v30 = vmax.f32 %v6066_v0, 0.0  ;;  %v9503_v63 = vld [vmem:[%s10921_s20 + $0x80] sm:$0xff]   ;;  %v9504_v0 = vld [vmem:[%s10921_s20 + $0x48] sm:$0xff]   ;;  %v9509_v46 = vld [vmem:[%s10921_s20 + $0xd0] sm:$0xff]  }
0x2d38   :  { %v6076_v49 = vmax.f32 %v6025_v43, 0.0  ;;  %v6078_v50 = vmax.f32 %v6068_v53, 0.0  ;;  %v9506_v37 = vld [vmem:[%s10921_s20 + $0x8] sm:$0xff]   ;;  %v9508_v53 = vld [vmem:[%s10921_s20 + $0x50] sm:$0xff]  }
0x2d39   :  { %v6077_v57 = vmax.f32 %v6027_v11, 0.0  ;;  %v6079_v16 = vmax.f32 %v6070_v22, 0.0  ;;  %v9507_v43 = vld [vmem:[%s10921_s20 + $0x88] sm:$0xff]   ;;  %v9510_v10 = vld [vmem:[%s10921_s20 + $0x10] sm:$0xff]   ;;  %v9513_v11 = vld [vmem:[%s10921_s20 + $0xd8] sm:$0xff]  }
0x2d3a   :  { %v10709_v18 = vpack.c.bf16 %v6076_v49, %v6072_v47  ;;  %v10711_v19 = vpack.c.bf16 %v6078_v50, %v6074_v48  ;;  %v9514_v22 = vld [vmem:[%s10921_s20 + $0x18] sm:$0xff]   ;;  %v9517_v47 = vld [vmem:[%s10921_s20 + $0xe0] sm:$0xff]   ;;  %v9520_v50 = vld [vmem:[%s10921_s20 + $0x68] sm:$0xff]  }
0x2d3b   :  { %v6081_v26 = vpack.c.bf16 %v6077_v57, %v6073_v51  ;;  %v6083_v21 = vpack.c.bf16 %v6079_v16, %v6075_v30  ;;  %v6252_v24 = vpop.f32.mrb[104].mxu1  ;;  %v6295_v20 = vpop.f32.mrb[108].mxu0  ;;  %v9518_v48 = vld [vmem:[%s10921_s20 + $0x20] sm:$0xff]   ;;  %v9521_v51 = vld [vmem:[%s10921_s20 + $0xe8] sm:$0xff]   ;;  %v9524_v16 = vld [vmem:[%s10921_s20 + $0x70] sm:$0xff]  }
0x2d3c   :  { %v6253_v5 = vadd.f32 %v6252_v24, %v6161_v14  ;;  %v6296_v25 = vadd.f32 %v6295_v20, %v6169_v13  ;;  %v6254_v28 = vpop.f32.mrb[105].mxu1  ;;  %v6297_v29 = vpop.f32.mrb[109].mxu0  ;;  %v9519_v49 = vld [vmem:[%s10921_s20 + $0xa0] sm:$0xff]   ;;  %v9522_v30 = vld [vmem:[%s10921_s20 + $0x28] sm:$0xff]   ;;  %v9527_v24 = vld [vmem:[%s10921_s20 + $0xb0] sm:$0xff]  }
0x2d3d   :  { %v6255_v32 = vadd.f32 %v6254_v28, %v6165_v15  ;;  %v6298_v33 = vadd.f32 %v6297_v29, %v6173_v23  ;;  %v6256_v35 = vpop.f32.mrb[106].mxu1  ;;  %v6299_v36 = vpop.f32.mrb[110].mxu0  ;;  %v9523_v57 = vld [vmem:[%s10921_s20 + $0xa8] sm:$0xff]   ;;  %v9528_v20 = vld [vmem:[%s10921_s20 + $0x78] sm:$0xff]   ;;  %v6930_v28 = vld [vmem:[%s10918_s19 + $0x60] sm:$0xff] }
0x2d3e   :  { %v6257_v38 = vadd.f32 %v6256_v35, %v6161_v14  ;;  %v6300_v9 = vadd.f32 %v6299_v36, %v6169_v13  ;;  %v6258_v40 = vpop.f32.mrb[107].mxu1  ;;  %v6301_v42 = vpop.f32.mrb[111].mxu0  ;;  %v6304_v27 = vmax.f32 %v6253_v5, 0.0  ;;  %v6306_v52 = vmax.f32 %v6296_v25, 0.0  ;;  %v9511_v14 = vld [vmem:[%s10921_s20 + $0x90] sm:$0xff]   ;;  %v9512_v13 = vld [vmem:[%s10921_s20 + $0x58] sm:$0xff]  }
0x2d3f   :  { %v6259_v12 = vadd.f32 %v6258_v40, %v6165_v15  ;;  %v6302_v34 = vadd.f32 %v6301_v42, %v6173_v23  ;;  %v6305_v45 = vmax.f32 %v6255_v32, 0.0  ;;  %v6307_v55 = vmax.f32 %v6298_v33, 0.0  ;;  %v9515_v15 = vld [vmem:[%s10921_s20 + $0x98] sm:$0xff]   ;;  %v9516_v23 = vld [vmem:[%s10921_s20 + $0x60] sm:$0xff]   ;;  %v6929_v29 = vld [vmem:[%s10918_s19 + $0x28] sm:$0xff] }
0x2d40   :  { %v6308_v54 = vmax.f32 %v6257_v38, 0.0  ;;  %v6310_v39 = vmax.f32 %v6300_v9, 0.0  ;;  %v9529_v5 = vld [vmem:[%s10921_s20 + $0xf8] sm:$0xff]   ;;  %v6928_v25 = vld [vmem:[%s10918_s19 + $0x20] sm:$0xff]  ;;  %v6931_v32 = vld [vmem:[%s10918_s19 + $0x68] sm:$0xff] }
0x2d41   :  { %v6309_v56 = vmax.f32 %v6259_v12, 0.0  ;;  %v6311_v17 = vmax.f32 %v6302_v34, 0.0  ;;  %v9530_v33 = vld [vmem:[%s10921_s20 + $0x38] sm:$0xff]   ;;  %v8456_v36 = vcombine.high %v6928_v25, %v6930_v28  ;;  %v8458_v38 = vcombine.high %v6929_v29, %v6931_v32  ;;  %v6932_v9 = vld [vmem:[%s10918_s19 + $0xa0] sm:$0xff]  ;;  %v6933_v42 = vld [vmem:[%s10918_s19 + $0xa8] sm:$0xff] }
0x2d42   :  { %v6312_v31 = vpack.c.bf16 %v6308_v54, %v6304_v27  ;;  %v6314_v58 = vpack.c.bf16 %v6310_v39, %v6306_v52  ;;  %v9531_v35 = vld [vmem:[%s10921_s20 + $0xb8] sm:$0xff]   ;;  %v6934_v40 = vld [vmem:[%s10918_s19 + $0xe0] sm:$0xff]  ;;  %v6935_v12 = vld [vmem:[%s10918_s19 + $0xe8] sm:$0xff]  ;;  %v8455_v34 = vcombine.low %v6928_v25, %v6930_v28  ;;  %v8457_v27 = vcombine.low %v6929_v29, %v6931_v32 }
0x2d43   :  { %v6313_v59 = vpack.c.bf16 %v6309_v56, %v6305_v45  ;;  %v6315_v61 = vpack.c.bf16 %v6311_v17, %v6307_v55  ;;  %v8460_v52 = vcombine.high %v6932_v9, %v6934_v40  ;;  %v8462_v54 = vcombine.high %v6933_v42, %v6935_v12  ;;  %v9534_v55 = vld [vmem:[%s10921_s20 + $0x200] sm:$0xff]   ;;  %v9536_v17 = vld [vmem:[%s10921_s20 + $0x248] sm:$0xff]  }
0x2d44   :  { %v8459_v39 = vcombine.low %v6932_v9, %v6934_v40  ;;  %v8461_v45 = vcombine.low %v6933_v42, %v6935_v12  ;;  %v9535_v56 = vld [vmem:[%s10921_s20 + $0x280] sm:$0xff]  }
0x2d45   :  { %6604 = vmatprep.mubr.bf16.mxu1 %v6313_v59  ;;  %6645 = vmatprep.mubr.bf16.mxu0 %v6315_v61  ;;  %v9539_v59 = vld [vmem:[%s10921_s20 + $0x288] sm:$0xff]   ;;  %v9540_v61 = vld [vmem:[%s10921_s20 + $0x250] sm:$0xff]  }
0x2d46   :  { %6605 = vmatmul.mubr.bf16.vlgmr.msra.gmra.mrb[108].mxu1 %v6312_v31  ;;  %6646 = vmatmul.mubr.bf16.vlgmr.msra.gmra.mrb[112].mxu0 %v6314_v58  ;;  %v9537_v31 = vld [vmem:[%s10921_s20 + $0x2c8] sm:$0xff]  }
0x2d47   :  { %8871 = vmatpush3.bf16.msra.mxu1 %v9502_v62  ;;  %8893 = vmatpush3.bf16.msra.mxu0 %v9503_v63  ;;  %v9538_v58 = vld [vmem:[%s10921_s20 + $0x208] sm:$0xff]   ;;  %v9541_v62 = vld [vmem:[%s10921_s20 + $0x2d0] sm:$0xff]  }
0x2d48   :  { %6878 = vmatprep.mubr.bf16.mxu1 %v6081_v26  ;;  %6919 = vmatprep.mubr.bf16.mxu0 %v6083_v21  ;;  %v9525_v26 = vld [vmem:[%s10921_s20 + $0xf0] sm:$0xff]  }
0x2d49   :  { %8872 = vmatprep.subr.bf16.mxu1 %v9504_v0  ;;  %8894 = vmatprep.subr.bf16.mxu0 %v9505_v7  ;;  %v9526_v21 = vld [vmem:[%s10921_s20 + $0x30] sm:$0xff]   ;;  %v9544_v7 = vld [vmem:[%s10921_s20 + $0x258] sm:$0xff]  }
0x2d4a   :  { %v9542_v63 = vld [vmem:[%s10921_s20 + $0x210] sm:$0xff]  }
0x2d4b   :  { %8873 = vmatpush3.bf16.msra.mxu1 %v9506_v37  ;;  %8895 = vmatpush3.bf16.msra.mxu0 %v9507_v43  ;;  %v9543_v0 = vld [vmem:[%s10921_s20 + $0x290] sm:$0xff]   ;;  %v9545_v37 = vld [vmem:[%s10921_s20 + $0x2d8] sm:$0xff]  }
0x2d4c   :  { %8874 = vmatprep.subr.bf16.mxu1 %v9508_v53  ;;  %8896 = vmatprep.subr.bf16.mxu0 %v9509_v46  ;;  %v9546_v43 = vld [vmem:[%s10921_s20 + $0x218] sm:$0xff]   ;;  %v9548_v46 = vld [vmem:[%s10921_s20 + $0x260] sm:$0xff]  }
0x2d4d   :  { %v9547_v53 = vld [vmem:[%s10921_s20 + $0x298] sm:$0xff]  }
0x2d4f   :  { %8875 = vmatpush3.bf16.msra.mxu1 %v9510_v10  ;;  %8897 = vmatpush3.bf16.msra.mxu0 %v9511_v14  ;;  %v9549_v10 = vld [vmem:[%s10921_s20 + $0x2e0] sm:$0xff]  }
0x2d50   :  { %8876 = vmatprep.subr.bf16.mxu1 %v9512_v13  ;;  %8898 = vmatprep.subr.bf16.mxu0 %v9513_v11  ;;  %v9550_v14 = vld [vmem:[%s10921_s20 + $0x220] sm:$0xff]   ;;  %v9552_v11 = vld [vmem:[%s10921_s20 + $0x268] sm:$0xff]  }
0x2d51   :  { %v9551_v13 = vld [vmem:[%s10921_s20 + $0x2a0] sm:$0xff]  }
0x2d53   :  { %8877 = vmatpush3.bf16.msra.mxu1 %v9514_v22  ;;  %8899 = vmatpush3.bf16.msra.mxu0 %v9515_v15  ;;  %v9553_v22 = vld [vmem:[%s10921_s20 + $0x2e8] sm:$0xff]  }
0x2d54   :  { %8878 = vmatprep.subr.bf16.mxu1 %v9516_v23  ;;  %8900 = vmatprep.subr.bf16.mxu0 %v9517_v47  ;;  %v9554_v15 = vld [vmem:[%s10921_s20 + $0x228] sm:$0xff]   ;;  %v9556_v47 = vld [vmem:[%s10921_s20 + $0x270] sm:$0xff]  }
0x2d55   :  { %v9555_v23 = vld [vmem:[%s10921_s20 + $0x2a8] sm:$0xff]  }
0x2d57   :  { %8879 = vmatpush3.bf16.msra.mxu1 %v9518_v48  ;;  %8901 = vmatpush3.bf16.msra.mxu0 %v9519_v49  ;;  %v9557_v48 = vld [vmem:[%s10921_s20 + $0x2f0] sm:$0xff]  }
0x2d58   :  { %8880 = vmatprep.subr.bf16.mxu1 %v9520_v50  ;;  %8902 = vmatprep.subr.bf16.mxu0 %v9521_v51  ;;  %v9558_v49 = vld [vmem:[%s10921_s20 + $0x230] sm:$0xff]   ;;  %v9560_v51 = vld [vmem:[%s10921_s20 + $0x278] sm:$0xff]  }
0x2d59   :  { %v9559_v50 = vld [vmem:[%s10921_s20 + $0x2b0] sm:$0xff]  }
0x2d5b   :  { %8881 = vmatpush3.bf16.msra.mxu1 %v9522_v30  ;;  %8903 = vmatpush3.bf16.msra.mxu0 %v9523_v57  ;;  %v9561_v30 = vld [vmem:[%s10921_s20 + $0x2f8] sm:$0xff]  }
0x2d5c   :  { %8882 = vmatprep.subr.bf16.mxu1 %v9524_v16  ;;  %8904 = vmatprep.subr.bf16.mxu0 %v9525_v26  ;;  %v9562_v57 = vld [vmem:[%s10921_s20 + $0x238] sm:$0xff]   ;;  %v10792_v26 = vld [vmem:[%s10918_s19 + $0x30] sm:$0xff] }
0x2d5d   :  { %v9563_v16 = vld [vmem:[%s10921_s20 + $0x2b8] sm:$0xff]  }
0x2d5f   :  { %8883 = vmatpush3.bf16.msra.mxu1 %v9526_v21  ;;  %8905 = vmatpush3.bf16.msra.mxu0 %v9527_v24  ;;  %v10795_v21 = vld [vmem:[%s10918_s19 + $0x70] sm:$0xff]  ;;  %v10798_v24 = vld [vmem:[%s10918_s19 + $0x38] sm:$0xff] }
0x2d60   :  { %8884 = vmatprep.subr.bf16.mxu1 %v9528_v20  ;;  %8906 = vmatprep.subr.bf16.mxu0 %v9529_v5  ;;  %v8498_v20 = vcombine.high %v10792_v26, %v10795_v21  ;;  %v10803_v5 = vld [vmem:[%s10918_s19 + $0x78] sm:$0xff]  ;;  %v8497_v25 = vcombine.low %v10792_v26, %v10795_v21  ;;  %v9566_v26 = vld [vmem:[%s10921_s20 + $0x300] sm:$0xff]  }
0x2d61   :  { %v8499_v28 = vcombine.low %v10798_v24, %v10803_v5  ;;  %v8500_v29 = vcombine.high %v10798_v24, %v10803_v5  ;;  %v9567_v21 = vld [vmem:[%s10921_s20 + $0x380] sm:$0xff]   ;;  %v9568_v24 = vld [vmem:[%s10921_s20 + $0x348] sm:$0xff]  }
0x2d62   :  { %v9569_v5 = vld [vmem:[%s10921_s20 + $0x3c8] sm:$0xff]  }
0x2d63   :  { %8885 = vmatpush3.bf16.msra.mxu1 %v9530_v33  ;;  %8907 = vmatpush3.bf16.msra.mxu0 %v9531_v35 }
0x2d64   :  { %6998 = vmatprep.subr.bf16.mxu1 %v8456_v36  ;;  %7041 = vmatprep.subr.bf16.mxu0 %v8458_v38 }
0x2d66   :  { %6879 = vmatmul.mubr.bf16.vlgmr.msra.gmra.mrb[112].mxu1 %v10709_v18  ;;  %6920 = vmatmul.mubr.bf16.vlgmr.msra.gmra.mrb[116].mxu0 %v10711_v19  ;;  %v9532_v18 = vld [vmem:[%s10921_s20 + $0x240] sm:$0xff]  }
0x2d67   :  { %6999 = vmatpush1.bf16.msra.mxu1 %v8455_v34  ;;  %7042 = vmatpush1.bf16.msra.mxu0 %v8457_v27  ;;  %v9533_v19 = vld [vmem:[%s10921_s20 + $0x2c0] sm:$0xff]  }
0x2d68   :  { %7000 = vmatprep.subr.bf16.mxu1 %v8460_v52  ;;  %7043 = vmatprep.subr.bf16.mxu0 %v8462_v54 }
0x2d69   :  { %7030 = vmatprep.mubr.bf16.mxu1 %v9744_v60  ;;  %7073 = vmatprep.mubr.bf16.mxu0 %v9744_v60 }
0x2d6b   :  { %7001 = vmatpush1.bf16.msra.mxu1 %v8459_v39  ;;  %7044 = vmatpush1.bf16.msra.mxu0 %v8461_v45 }
0x2d6c   :  { %8914 = vmatprep.subr.bf16.mxu1 %v9532_v18  ;;  %8936 = vmatprep.subr.bf16.mxu0 %v9533_v19 }
0x2d6e   :  { %8463 = vmatmul.mubr.msk.bf16.vlgmr.msra.gmra.mrb[116].mxu1 %vm211_vm2, %v10653_v41  ;;  %8464 = vmatmul.mubr.msk.bf16.vlgmr.msra.gmra.mrb[120].mxu0 %vm211_vm2, %v10653_v41 }
0x2d6f   :  { %8915 = vmatpush3.bf16.msra.mxu1 %v9534_v55  ;;  %8937 = vmatpush3.bf16.msra.mxu0 %v9535_v56 }
0x2d70   :  { %8916 = vmatprep.subr.bf16.mxu1 %v9536_v17  ;;  %8938 = vmatprep.subr.bf16.mxu0 %v9537_v31 }
0x2d73   :  { %8917 = vmatpush3.bf16.msra.mxu1 %v9538_v58  ;;  %8939 = vmatpush3.bf16.msra.mxu0 %v9539_v59  ;;  %v6936_v59 = vld [vmem:[%s10922_s18 + $0x8] sm:$0xf] }
0x2d74   :  { %8918 = vmatprep.subr.bf16.mxu1 %v9540_v61  ;;  %8940 = vmatprep.subr.bf16.mxu0 %v9541_v62 }
0x2d77   :  { %8919 = vmatpush3.bf16.msra.mxu1 %v9542_v63  ;;  %8941 = vmatpush3.bf16.msra.mxu0 %v9543_v0 }
0x2d78   :  { %8920 = vmatprep.subr.bf16.mxu1 %v9544_v7  ;;  %8942 = vmatprep.subr.bf16.mxu0 %v9545_v37  ;;  %v6941_v37 = vrot.slane %v6936_v59, %v10207_v2 }
0x2d7b   :  { %8921 = vmatpush3.bf16.msra.mxu1 %v9546_v43  ;;  %8943 = vmatpush3.bf16.msra.mxu0 %v9547_v53  ;;  %v6949_v43 = vrot.slane %v6936_v59, %v10209_v3 }
0x2d7c   :  { %8922 = vmatprep.subr.bf16.mxu1 %v9548_v46  ;;  %8944 = vmatprep.subr.bf16.mxu0 %v9549_v10  ;;  %v6945_v10 = vrot.slane %v6936_v59, %v10212_v6 }
0x2d7f   :  { %8923 = vmatpush3.bf16.msra.mxu1 %v9550_v14  ;;  %8945 = vmatpush3.bf16.msra.mxu0 %v9551_v13  ;;  %v6953_v14 = vrot.slane %v6936_v59, %v10214_v4  ;;  %v9564_v59 = vld [vmem:[%s10921_s20 + $0x340] sm:$0xff]  }
0x2d80   :  { %8924 = vmatprep.subr.bf16.mxu1 %v9552_v11  ;;  %8946 = vmatprep.subr.bf16.mxu0 %v9553_v22 }
0x2d83   :  { %8925 = vmatpush3.bf16.msra.mxu1 %v9554_v15  ;;  %8947 = vmatpush3.bf16.msra.mxu0 %v9555_v23 }
0x2d84   :  { %8926 = vmatprep.subr.bf16.mxu1 %v9556_v47  ;;  %8948 = vmatprep.subr.bf16.mxu0 %v9557_v48 }
0x2d87   :  { %8927 = vmatpush3.bf16.msra.mxu1 %v9558_v49  ;;  %8949 = vmatpush3.bf16.msra.mxu0 %v9559_v50 }
0x2d88   :  { %8928 = vmatprep.subr.bf16.mxu1 %v9560_v51  ;;  %8950 = vmatprep.subr.bf16.mxu0 %v9561_v30 }
0x2d8b   :  { %8929 = vmatpush3.bf16.msra.mxu1 %v9562_v57  ;;  %8951 = vmatpush3.bf16.msra.mxu0 %v9563_v16 }
0x2d8c   :  { %7506 = vmatprep.subr.bf16.mxu1 %v8498_v20  ;;  %7549 = vmatprep.subr.bf16.mxu0 %v8500_v29 }
0x2e19   :  { %v8842_v32 = vpop.f32.mrb[108].mxu1  ;;  %v8864_v33 = vpop.f32.mrb[112].mxu0 }
0x2e1a   :  { %v8843_v35 = vpop.f32.mrb[109].mxu1  ;;  %v8865_v36 = vpop.f32.mrb[113].mxu0 }
0x2e1b   :  { %v8844_v38 = vadd.f32 %v8843_v35, %v8842_v32  ;;  %v8866_v9 = vadd.f32 %v8865_v36, %v8864_v33  ;;  %v8845_v40 = vpop.f32.mrb[110].mxu1  ;;  %v8867_v42 = vpop.f32.mrb[114].mxu0 }
0x2e1c   :  { %v8846_v12 = vpop.f32.mrb[111].mxu1  ;;  %v8868_v34 = vpop.f32.mrb[115].mxu0 }
0x2e1d   :  { %v6648_v27 = vadd.f32 %v8866_v9, %v8844_v38  ;;  %v8847_v52 = vadd.f32 %v8846_v12, %v8845_v40  ;;  %v8869_v54 = vadd.f32 %v8868_v34, %v8867_v42  ;;  %v7440_v40 = vld [vmem:[%s10918_s19 + $0xb0] sm:$0xff] }
0x2e1e   :  { %v7442_v42 = vld [vmem:[%s10918_s19 + $0xf0] sm:$0xff] }
0x2e1f   :  { %v6651_v39 = vadd.f32 %v8869_v54, %v8847_v52  ;;  %v7441_v54 = vld [vmem:[%s10918_s19 + $0xb8] sm:$0xff] }
0x2e39   :  { %v8886_v45 = vpop.f32.mrb[112].mxu1  ;;  %v8908_v18 = vpop.f32.mrb[116].mxu0 }
0x2e3a   :  { %v8887_v19 = vpop.f32.mrb[113].mxu1  ;;  %v8909_v55 = vpop.f32.mrb[117].mxu0 }
0x2e3b   :  { %v8888_v56 = vadd.f32 %v8887_v19, %v8886_v45  ;;  %v8910_v17 = vadd.f32 %v8909_v55, %v8908_v18  ;;  %v8889_v31 = vpop.f32.mrb[114].mxu1  ;;  %v8911_v58 = vpop.f32.mrb[118].mxu0 }
0x2e3c   :  { %v8890_v61 = vpop.f32.mrb[115].mxu1  ;;  %v8912_v62 = vpop.f32.mrb[119].mxu0 }
0x2e3d   :  { %v6881_v63 = vadd.f32 %v8888_v56, %v6648_v27  ;;  %v8891_v0 = vadd.f32 %v8890_v61, %v8889_v31  ;;  %v8913_v7 = vadd.f32 %v8912_v62, %v8911_v58  ;;  %v8502_v56 = vcombine.high %v7440_v40, %v7442_v42  ;;  %v9565_v61 = vld [vmem:[%s10921_s20 + $0x3c0] sm:$0xff]   ;;  %v9573_v62 = vld [vmem:[%s10921_s20 + $0x3d0] sm:$0xff]  }
0x2e3e   :  { %v8501_v31 = vcombine.low %v7440_v40, %v7442_v42  ;;  %v7444_v42 = vld [vmem:[%s10922_s18 + $0xc] sm:$0xf] }
0x2e3f   :  { %v10814_v53 = vadd.f32 %v8910_v17, %v6881_v63  ;;  %v6884_v46 = vadd.f32 %v8891_v0, %v6651_v39  ;;  %v7443_v39 = vld [vmem:[%s10918_s19 + $0xf8] sm:$0xff]  ;;  %v9574_v63 = vld [vmem:[%s10921_s20 + $0x310] sm:$0xff]  }
0x2e40   :  { %v8504_v17 = vcombine.high %v7441_v54, %v7443_v39  ;;  %v8503_v58 = vcombine.low %v7441_v54, %v7443_v39  ;;  %v9575_v0 = vld [vmem:[%s10921_s20 + $0x390] sm:$0xff]   ;;  %v7449_v39 = vrot.slane %v7444_v42, %v10207_v2 }
0x2e41   :  { %v10818_v13 = vadd.f32 %v8913_v7, %v6884_v46  ;;  %v7032_v11 = vpop.f32.mrb[116].mxu1  ;;  %v7075_v22 = vpop.f32.mrb[120].mxu0  ;;  %v9577_v7 = vld [vmem:[%s10921_s20 + $0x3d8] sm:$0xff]   ;;  %v9580_v46 = vld [vmem:[%s10921_s20 + $0x360] sm:$0xff]  }
0x2e42   :  { %v7033_v15 = vadd.f32 %v7032_v11, %v6941_v37  ;;  %v7076_v23 = vadd.f32 %v7075_v22, %v6949_v43  ;;  %v7034_v47 = vpop.f32.mrb[117].mxu1  ;;  %v7077_v48 = vpop.f32.mrb[121].mxu0  ;;  %v9583_v11 = vld [vmem:[%s10921_s20 + $0x3a0] sm:$0xff]   ;;  %v9584_v22 = vld [vmem:[%s10921_s20 + $0x368] sm:$0xff]  }
0x2e43   :  { %v7035_v49 = vadd.f32 %v7034_v47, %v6945_v10  ;;  %v7078_v50 = vadd.f32 %v7077_v48, %v6953_v14  ;;  %v7036_v51 = vpop.f32.mrb[118].mxu1  ;;  %v7079_v30 = vpop.f32.mrb[122].mxu0  ;;  %v9587_v47 = vld [vmem:[%s10921_s20 + $0x3a8] sm:$0xff]   ;;  %v9588_v48 = vld [vmem:[%s10921_s20 + $0x370] sm:$0xff]  }
0x2e44   :  { %v7037_v57 = vadd.f32 %v7036_v51, %v6941_v37  ;;  %v7080_v16 = vadd.f32 %v7079_v30, %v6949_v43  ;;  %v7038_v20 = vpop.f32.mrb[119].mxu1  ;;  %v7081_v29 = vpop.f32.mrb[123].mxu0  ;;  %v7084_v35 = vmax.f32 %v7033_v15, 0.0  ;;  %v7086_v36 = vmax.f32 %v7076_v23, 0.0  ;;  %v9578_v37 = vld [vmem:[%s10921_s20 + $0x318] sm:$0xff]   ;;  %v9585_v15 = vld [vmem:[%s10921_s20 + $0x3e8] sm:$0xff]  }
0x2e45   :  { %v7039_v32 = vadd.f32 %v7038_v20, %v6945_v10  ;;  %v7082_v33 = vadd.f32 %v7081_v29, %v6953_v14  ;;  %v7085_v12 = vmax.f32 %v7035_v49, 0.0  ;;  %v7087_v34 = vmax.f32 %v7078_v50, 0.0  ;;  %v9579_v43 = vld [vmem:[%s10921_s20 + $0x398] sm:$0xff]   ;;  %v9581_v10 = vld [vmem:[%s10921_s20 + $0x3e0] sm:$0xff]   ;;  %v9586_v23 = vld [vmem:[%s10921_s20 + $0x328] sm:$0xff]  }
0x2e46   :  { %v7088_v38 = vmax.f32 %v7037_v57, 0.0  ;;  %v7090_v9 = vmax.f32 %v7080_v16, 0.0  ;;  %v9582_v14 = vld [vmem:[%s10921_s20 + $0x320] sm:$0xff]   ;;  %v9589_v49 = vld [vmem:[%s10921_s20 + $0x3f0] sm:$0xff]   ;;  %v9592_v30 = vld [vmem:[%s10921_s20 + $0x378] sm:$0xff]  }
0x2e47   :  { %v7089_v27 = vmax.f32 %v7039_v32, 0.0  ;;  %v7091_v52 = vmax.f32 %v7082_v33, 0.0  ;;  %v9590_v50 = vld [vmem:[%s10921_s20 + $0x330] sm:$0xff]   ;;  %v9593_v57 = vld [vmem:[%s10921_s20 + $0x3f8] sm:$0xff]  }
0x2e48   :  { %v7092_v45 = vpack.c.bf16 %v7088_v38, %v7084_v35  ;;  %v7094_v18 = vpack.c.bf16 %v7090_v9, %v7086_v36  ;;  %v9591_v51 = vld [vmem:[%s10921_s20 + $0x3b0] sm:$0xff]   ;;  %v9594_v16 = vld [vmem:[%s10921_s20 + $0x338] sm:$0xff]  }
0x2e49   :  { %v7093_v19 = vpack.c.bf16 %v7089_v27, %v7085_v12  ;;  %v7095_v55 = vpack.c.bf16 %v7091_v52, %v7087_v34  ;;  %v9595_v20 = vld [vmem:[%s10921_s20 + $0x3b8] sm:$0xff]  }
0x2e4b   :  { %7384 = vmatprep.mubr.bf16.mxu1 %v7093_v19  ;;  %7425 = vmatprep.mubr.bf16.mxu0 %v7095_v55  ;;  %v7453_v55 = vrot.slane %v7444_v42, %v10212_v6 }
0x2e4c   :  { %7385 = vmatmul.mubr.bf16.vlgmr.msra.gmra.mrb[120].mxu1 %v7092_v45  ;;  %7426 = vmatmul.mubr.bf16.vlgmr.msra.gmra.mrb[124].mxu0 %v7094_v18  ;;  %v7457_v45 = vrot.slane %v7444_v42, %v10209_v3 }
0x2e4d   :  { %7507 = vmatpush1.bf16.msra.mxu1 %v8497_v25  ;;  %7550 = vmatpush1.bf16.msra.mxu0 %v8499_v28  ;;  %v9571_v25 = vld [vmem:[%s10921_s20 + $0x388] sm:$0xff]   ;;  %v9572_v28 = vld [vmem:[%s10921_s20 + $0x350] sm:$0xff]  }
0x2e4e   :  { %7508 = vmatprep.subr.bf16.mxu1 %v8502_v56  ;;  %7551 = vmatprep.subr.bf16.mxu0 %v8504_v17  ;;  %v7461_v56 = vrot.slane %v7444_v42, %v10214_v4 }
0x2e4f   :  { %7538 = vmatprep.mubr.bf16.mxu1 %v9744_v60  ;;  %7581 = vmatprep.mubr.bf16.mxu0 %v9744_v60  ;;  %v9570_v60 = vld [vmem:[%s10921_s20 + $0x308] sm:$0xff]  }
0x2e51   :  { %7509 = vmatpush1.bf16.msra.mxu1 %v8501_v31  ;;  %7552 = vmatpush1.bf16.msra.mxu0 %v8503_v58 }
0x2e52   :  { %8958 = vmatprep.subr.bf16.mxu1 %v9564_v59  ;;  %8980 = vmatprep.subr.bf16.mxu0 %v9565_v61 }
0x2e54   :  { %8505 = vmatmul.mubr.msk.bf16.vlgmr.msra.gmra.mrb[124].mxu1 %vm211_vm2, %v10653_v41  ;;  %8506 = vmatmul.mubr.msk.bf16.vlgmr.msra.gmra.mrb[128].mxu0 %vm211_vm2, %v10653_v41  ;;  %v9576_v41 = vld [vmem:[%s10921_s20 + $0x358] sm:$0xff]  }
0x2e55   :  { %8959 = vmatpush3.bf16.msra.mxu1 %v9566_v26  ;;  %8981 = vmatpush3.bf16.msra.mxu0 %v9567_v21 }
0x2e56   :  { %8960 = vmatprep.subr.bf16.mxu1 %v9568_v24  ;;  %8982 = vmatprep.subr.bf16.mxu0 %v9569_v5 }
0x2e59   :  { %8961 = vmatpush3.bf16.msra.mxu1 %v9570_v60  ;;  %8983 = vmatpush3.bf16.msra.mxu0 %v9571_v25 }
0x2e5a   :  { %8962 = vmatprep.subr.bf16.mxu1 %v9572_v28  ;;  %8984 = vmatprep.subr.bf16.mxu0 %v9573_v62 }
0x2e5d   :  { %8963 = vmatpush3.bf16.msra.mxu1 %v9574_v63  ;;  %8985 = vmatpush3.bf16.msra.mxu0 %v9575_v0 }
0x2e5e   :  { %8964 = vmatprep.subr.bf16.mxu1 %v9576_v41  ;;  %8986 = vmatprep.subr.bf16.mxu0 %v9577_v7 }
0x2e61   :  { %8965 = vmatpush3.bf16.msra.mxu1 %v9578_v37  ;;  %8987 = vmatpush3.bf16.msra.mxu0 %v9579_v43 }
0x2e62   :  { %8966 = vmatprep.subr.bf16.mxu1 %v9580_v46  ;;  %8988 = vmatprep.subr.bf16.mxu0 %v9581_v10 }
0x2e65   :  { %8967 = vmatpush3.bf16.msra.mxu1 %v9582_v14  ;;  %8989 = vmatpush3.bf16.msra.mxu0 %v9583_v11 }
0x2e66   :  { %8968 = vmatprep.subr.bf16.mxu1 %v9584_v22  ;;  %8990 = vmatprep.subr.bf16.mxu0 %v9585_v15 }
0x2e69   :  { %8969 = vmatpush3.bf16.msra.mxu1 %v9586_v23  ;;  %8991 = vmatpush3.bf16.msra.mxu0 %v9587_v47 }
0x2e6a   :  { %8970 = vmatprep.subr.bf16.mxu1 %v9588_v48  ;;  %8992 = vmatprep.subr.bf16.mxu0 %v9589_v49 }
0x2e6d   :  { %8971 = vmatpush3.bf16.msra.mxu1 %v9590_v50  ;;  %8993 = vmatpush3.bf16.msra.mxu0 %v9591_v51 }
0x2e6e   :  { %8972 = vmatprep.subr.bf16.mxu1 %v9592_v30  ;;  %8994 = vmatprep.subr.bf16.mxu0 %v9593_v57 }
0x2e71   :  { %8973 = vmatpush3.bf16.msra.mxu1 %v9594_v16  ;;  %8995 = vmatpush3.bf16.msra.mxu0 %v9595_v20 }
0x2e72   :  { %9283 = vmatprep.subr.bf16.mxu1 %v9731_v1 }
0x2f1f   :  { %v8930_v29 = vpop.f32.mrb[120].mxu1  ;;  %v8952_v32 = vpop.f32.mrb[124].mxu0 }
0x2f20   :  { %v8931_v33 = vpop.f32.mrb[121].mxu1  ;;  %v8953_v35 = vpop.f32.mrb[125].mxu0 }
0x2f21   :  { %v8932_v36 = vadd.f32 %v8931_v33, %v8930_v29  ;;  %v8954_v38 = vadd.f32 %v8953_v35, %v8952_v32  ;;  %v8933_v9 = vpop.f32.mrb[122].mxu1  ;;  %v8955_v40 = vpop.f32.mrb[126].mxu0  ;;  %v8539_v32 = vld [vmem:[%s10923_s22] ss:$0 sm:$0xff] }
0x2f22   :  { %v8934_v12 = vpop.f32.mrb[123].mxu1  ;;  %v8956_v34 = vpop.f32.mrb[127].mxu0 }
0x2f23   :  { %v7428_v27 = vadd.f32 %v8954_v38, %v8932_v36  ;;  %v8935_v52 = vadd.f32 %v8934_v12, %v8933_v9  ;;  %v8957_v54 = vadd.f32 %v8956_v34, %v8955_v40 }
0x2f25   :  { %v7434_v18 = vadd.f32 %v7428_v27, %v10814_v53  ;;  %v7431_v19 = vadd.f32 %v8957_v54, %v8935_v52 }
0x2f27   :  { %v7435_v17 = vadd.f32 %v7431_v19, %v10818_v13  ;;  %v7540_v31 = vpop.f32.mrb[124].mxu1  ;;  %v7583_v58 = vpop.f32.mrb[128].mxu0 }
0x2f28   :  { %v7541_v59 = vadd.f32 %v7540_v31, %v7449_v39  ;;  %v7584_v61 = vadd.f32 %v7583_v58, %v7457_v45  ;;  %v7542_v26 = vpop.f32.mrb[125].mxu1  ;;  %v7585_v21 = vpop.f32.mrb[129].mxu0 }
0x2f29   :  { %v7543_v24 = vadd.f32 %v7542_v26, %v7453_v55  ;;  %v7586_v5 = vadd.f32 %v7585_v21, %v7461_v56  ;;  %v7544_v2 = vpop.f32.mrb[126].mxu1  ;;  %v7587_v60 = vpop.f32.mrb[130].mxu0 }
0x2f2a   :  { %v7545_v3 = vadd.f32 %v7544_v2, %v7449_v39  ;;  %v7588_v25 = vadd.f32 %v7587_v60, %v7457_v45  ;;  %v7546_v53 = vpop.f32.mrb[127].mxu1  ;;  %v7589_v28 = vpop.f32.mrb[131].mxu0  ;;  %v7592_v63 = vmax.f32 %v7541_v59, 0.0  ;;  %v7594_v4 = vmax.f32 %v7584_v61, 0.0 }
0x2f2b   :  { %v7547_v62 = vadd.f32 %v7546_v53, %v7453_v55  ;;  %v7590_v6 = vadd.f32 %v7589_v28, %v7461_v56  ;;  %v7593_v41 = vmax.f32 %v7543_v24, 0.0  ;;  %v7595_v7 = vmax.f32 %v7586_v5, 0.0  ;;  %v8540_v5 = vld [vmem:[%s10924_s23] ss:$0 sm:$0xff] }
0x2f2c   :  { %v7596_v0 = vmax.f32 %v7545_v3, 0.0  ;;  %v7598_v13 = vmax.f32 %v7588_v25, 0.0  ;;  %v8541_v25 = vld [vmem:[%s9884_s12] ss:$0 sm:$0xff] }
0x2f2d   :  { %v7597_v37 = vmax.f32 %v7547_v62, 0.0  ;;  %v7599_v43 = vmax.f32 %v7590_v6, 0.0 }
0x2f2e   :  { %v7600_v46 = vpack.c.bf16 %v7596_v0, %v7592_v63  ;;  %v7602_v10 = vpack.c.bf16 %v7598_v13, %v7594_v4  ;;  %v8542_v13 = vld [vmem:[%s9894_s27] ss:$0 sm:$0xff] }
0x2f2f   :  { %v7601_v14 = vpack.c.bf16 %v7597_v37, %v7593_v41  ;;  %v7603_v11 = vpack.c.bf16 %v7599_v43, %v7595_v7 }
0x2f31   :  { %7892 = vmatprep.mubr.bf16.mxu1 %v7601_v14  ;;  %7933 = vmatprep.mubr.bf16.mxu0 %v7603_v11 }
0x2f32   :  { %7893 = vmatmul.mubr.bf16.vlgmr.msra.gmra.mrb[128].mxu1 %v7600_v46  ;;  %7934 = vmatmul.mubr.bf16.vlgmr.msra.gmra.mrb[132].mxu0 %v7602_v10 }
0x2f33   :  { %9287 = vmatprep.mubr.msk.bf16.mxu1 %vm9732_vm1, %v9731_v1 }
0x3005   :  { %v8974_v22 = vpop.f32.mrb[128].mxu1  ;;  %v8996_v15 = vpop.f32.mrb[132].mxu0 }
0x3006   :  { %v8975_v23 = vpop.f32.mrb[129].mxu1  ;;  %v8997_v47 = vpop.f32.mrb[133].mxu0 }
0x3007   :  { %v8976_v48 = vadd.f32 %v8975_v23, %v8974_v22  ;;  %v8998_v49 = vadd.f32 %v8997_v47, %v8996_v15  ;;  %v8977_v50 = vpop.f32.mrb[130].mxu1  ;;  %v8999_v51 = vpop.f32.mrb[134].mxu0 }
0x3008   :  { %v8978_v30 = vpop.f32.mrb[131].mxu1  ;;  %v9000_v57 = vpop.f32.mrb[135].mxu0 }
0x3009   :  { %v7936_v16 = vadd.f32 %v8998_v49, %v8976_v48  ;;  %v8979_v20 = vadd.f32 %v8978_v30, %v8977_v50  ;;  %v9001_v29 = vadd.f32 %v9000_v57, %v8999_v51 }
0x300b   :  { %v7942_v33 = vadd.f32 %v7936_v16, %v7434_v18  ;;  %v7939_v35 = vadd.f32 %v9001_v29, %v8979_v20 }
0x300d   :  { %v7943_v36 = vadd.f32 %v7939_v35, %v7435_v17  ;;  %v7951_v38 = vadd.f32 %v8539_v32, %v7942_v33  ;;  %v9597_v17 = vld [vmem:[%s9889_s6 + $0x8] sm:$0xff]  }
0x300f   :  { %v7953_v9 = vadd.f32 %v7951_v38, %v10647_v8  ;;  %v7952_v40 = vadd.f32 %v8539_v32, %v7943_v36 }
0x3011   :  { %v7955_v42 = vsel %vm211_vm2, %v7953_v9, 0.0  ;;  %v7954_v12 = vadd.f32 %v7952_v40, %v10649_v44  ;;  %v9596_v44 = vld [vmem:[%s9889_s6] sm:$0xff]   ;;  %s9745_s6 = smov [#allocation2]  }
0x3012   :  { %7956 = vadd.xlane.f32.xlu1 %v7955_v42  ;;  %9284 = vmatpush3.bf16.msra.mxu1 %v9596_v44  ;;  %s8082_s26 = sshll.u32 %s9745_s6, 4  ;;  %s8083_s26 = int_to_ptr.vmem [resolvable:$true] %s8082_s26 }
0x3013   :  { %v7958_v34 = vsel %vm211_vm2, %v7954_v12, 0.0  ;;  %9285 = vmatprep.subr.bf16.mxu1 %v9731_v1  ;;  %s9678_s12 = scalar_lea.vmem %s8083_s26, 32  ;;  %p9683_p1 = scmp.lt.s32.totalorder %s8083_s26, %s8083_s26 }
0x3014   :  { %p9679_p0 = scmp.ne.s32.totalorder %s8083_s26, %s9678_s12  ;;  %p9684_p2 = scmp.lt.s32.totalorder %s9678_s12, %s9678_s12 }
0x3016   :  { %7959 = vadd.xlane.f32.xlu1 %v7958_v34  ;;  %9286 = vmatpush3.bf16.msra.mxu1 %v9597_v17  ;;  %p9685_p3 = por %p9684_p2, %p9683_p1 }
0x3018   :  { %p9686_p4 = pnand %p9685_p3, %p9679_p0 }
0x309f   :  { %v7957_v27 = vpop.xlane.xlu1 %7956 }
0x30a0   :  { %v7961_v52 = vmul.f32 0.03125, %v7957_v27 }
0x30a2   :  { %v7963_v54 = vsub.f32 %v7953_v9, %v7961_v52 }
0x30a3   :  { %v7960_v39 = vpop.xlane.xlu1 %7959 }
0x30a4   :  { %v7962_v45 = vmul.f32 0.03125, %v7960_v39  ;;  %v7965_v18 = vmul.f32 %v7963_v54, %v7963_v54 }
0x30a6   :  { %v7964_v19 = vsub.f32 %v7954_v12, %v7962_v45  ;;  %v7967_v8 = vsel %vm211_vm2, %v7965_v18, 0.0 }
0x30a7   :  { %7968 = vadd.xlane.f32.xlu0 %v7967_v8 }
0x30a8   :  { %v7966_v55 = vmul.f32 %v7964_v19, %v7964_v19 }
0x30aa   :  { %v7970_v56 = vsel %vm211_vm2, %v7966_v55, 0.0 }
0x30ab   :  { %7971 = vadd.xlane.f32.xlu1 %v7970_v56 }
0x3134   :  { %v7969_v31 = vpop.xlane.xlu0 %7968 }
0x3135   :  { %v7973_v58 = vmul.f32 0.03125, %v7969_v31 }
0x3137   :  { %v7975_v59 = vadd.f32 1e-05, %v7973_v58 }
0x3138   :  { %v7972_v61 = vpop.xlane.xlu1 %7971 }
0x3139   :  { %9674 = vrsqrt.f32 %v7975_v59  ;;  %v7974_v26 = vmul.f32 0.03125, %v7972_v61 }
0x313b   :  { %v7976_v21 = vadd.f32 1e-05, %v7974_v26 }
0x313d   :  { %9676 = vrsqrt.f32 %v7976_v21 }
0x3143   :  { %v9675_v24 = vpop.eup %9674 }
0x3144   :  { %v7979_v2 = vmul.f32 %v9675_v24, %v7963_v54 }
0x3146   :  { %v7988_v60 = vmul.f32 %v8540_v5, %v7979_v2 }
0x3147   :  { %v9677_v3 = vpop.eup %9676 }
0x3148   :  { %v7980_v53 = vmul.f32 %v9677_v3, %v7964_v19  ;;  %v7997_v1 = vadd.f32 %v8541_v25, %v7988_v60 }
0x314a   :  { %v7989_v28 = vmul.f32 %v8540_v5, %v7980_v53  ;;  %v8000_v6 = vrot.slane %v7997_v1, 7 }
0x314c   :  { %v7998_v62 = vadd.f32 %v8541_v25, %v7989_v28 }
0x314e   :  { %v8003_v63 = vrot.slane %v7998_v62, 6 }
0x3150   :  { %v8006_v4 = vsel %vm8005_vm5, %v8000_v6, %v8003_v63 }
0x3151   :  { %v8007_v0 = vpack.c.bf16 %v8006_v4, %v8006_v4 }
0x3153   :  { %9288 = vmatmul.mubr.msk.bf16.vlgmr.msra.gmra.mrb[132].mxu1 %vm211_vm2, %v8007_v0 }
0x3226   :  { %v8068_v41 = vpop.f32.mrb[132].mxu1 }
0x3227   :  { %v8069_v7 = vadd.f32 %v8542_v13, %v8068_v41  ;;  %v9289_v37 = vpop.f32.mrb[133].mxu1 }
0x3228   :  { %v8071_v43 = vpop.f32.mrb[134].mxu1 }
0x3229   :  { %v9290_v46 = vpop.f32.mrb[135].mxu1  ;;  %8075 = vst.msk [vmem:[#allocation2] sm:$0x3] %vm8074_vm6, %v8069_v7 }
0x322a   :  { %9689 = shalt.err (!%p9686_p4)
}
0x322b   :  { %s9690_s27 = scalar_lea.hbm %s9899_s4, 32 }
0x322c   :  { %p9691_p5 = scmp.ne.s32.totalorder %s9899_s4, %s9690_s27  ;;  %p9694_p6 = scmp.lt.u32.totalorder %s9690_s27, %s9899_s4 }
0x322e   :  { %p9696_p7 = pnand %p9694_p6, %p9691_p5 }
0x3230   :  { %9699 = shalt.err (!%p9696_p7)
}
0x3231   :  { %8085 = dma.vmem_to_hbm [thread:$0]  %s8083_s26, 32, %s9899_s4, [#allocation3]  }
0x3232   :  { %9700 = dma.done.wait [#allocation3], 32  }
0x3233   :  { %9701 = vsyncadd [#allocation3], 4294967264 }
0x3234   :  { %8089 = vsyncpa [#allocation3], 1 }

</bundles_post_ra>
